<compile_context>
chip_gen: v6e
topology: v6e:2x2x1
jax: 0.10.0
libtpu: 0.0.40
codegen_flags: <defaults>
</compile_context>

<pallas_src>
import functools

import jax
import jax.numpy as jnp
from jax.experimental import pallas as pl
from jax.experimental.pallas import tpu as pltpu

_LANE = 128          # lane width: keep output last dims 128-dense (unmasked stores)
_SUB = 16            # sublane alignment covering bf16 (16, 128) native tiles
_TILE_M = 1024       # row tile for the tiled conv matmuls (bf16 tiles: ~2-3 MiB each)
_TILE_M_HEAD = 512   # head has K = 4096 (wider), keep its tile smaller
_FUSED_MAX_M = 2048  # at/below this M, run matmul+BN+LeakyReLU as ONE pallas_call
_VMEM_LIMIT = 32 * 1024 * 1024  # explicit scoped-VMEM budget (fits v5e/v6e/v7x)
_BN_EPS = 1e-5
_LRELU_SLOPE = 0.2


def _round_up(x: int, m: int) -> int:
    return (x + m - 1) // m * m


# ---------------------------------------------------------------------------
# Pallas kernels (hot path)
# ---------------------------------------------------------------------------
def _fused_layer_kernel(p_ref, w_ref, g_ref, b_ref, o_ref, *, inv_count):
    """Whole conv block in one shot: y = P @ W (bf16 in, f32 acc), training-mode
    BatchNorm with batch stats computed in-register, gamma/beta, LeakyReLU(0.2).

    Zero-padded rows of P contribute exactly zero to the sums; inv_count = 1/M_true.
    """
    y = jnp.dot(p_ref[...], w_ref[...], preferred_element_type=jnp.float32)
    mean = jnp.sum(y, axis=0, keepdims=True) * inv_count
    ex2 = jnp.sum(y * y, axis=0, keepdims=True) * inv_count
    var = jnp.maximum(ex2 - mean * mean, 0.0)          # biased variance, as in PyTorch BN
    scale = jax.lax.rsqrt(var + _BN_EPS) * g_ref[...]
    shift = b_ref[...] - mean * scale
    z = y * scale + shift
    o_ref[...] = jnp.where(z >= 0.0, z, _LRELU_SLOPE * z).astype(o_ref.dtype)


def _matmul_stats_kernel(p_ref, w_ref, y_ref, psum_ref, psq_ref):
    """Tiled pass 1: y = P @ W (f32 MXU acc, stored bf16) + per-tile channel stats.

    Stats are taken on the f32 accumulator before the bf16 downcast and replicated
    across the 8 sublanes of this tile's stats slot (keeps the (8, 128) layout rule);
    the wrapper divides by 8 * M_true when reducing them.
    """
    y = jnp.dot(p_ref[...], w_ref[...], preferred_element_type=jnp.float32)
    y_ref[...] = y.astype(y_ref.dtype)
    s = jnp.sum(y, axis=0, keepdims=True)
    q = jnp.sum(y * y, axis=0, keepdims=True)
    psum_ref[...] = jnp.broadcast_to(s, psum_ref.shape)
    psq_ref[...] = jnp.broadcast_to(q, psq_ref.shape)


def _scale_shift_lrelu_kernel(y_ref, scale_ref, shift_ref, o_ref):
    """Tiled pass 2: pure streaming y*scale + shift followed by LeakyReLU(0.2)."""
    z = y_ref[...].astype(jnp.float32) * scale_ref[...] + shift_ref[...]
    o_ref[...] = jnp.where(z >= 0.0, z, _LRELU_SLOPE * z).astype(o_ref.dtype)


def _head_kernel(p_ref, w_ref, b_ref, o_ref):
    """Head conv (Cout padded 1 -> 128 for lane-dense stores) + bias + sigmoid."""
    y = jnp.dot(p_ref[...], w_ref[...], preferred_element_type=jnp.float32)
    t = y + b_ref[...]
    o_ref[...] = 1.0 / (1.0 + jnp.exp(-t))             # bounded in [0, 1]


# ---------------------------------------------------------------------------
# Glue: im2col + weight reshaping (plain JAX layout ops, all in bf16)
# ---------------------------------------------------------------------------
def _im2col(x_nhwc, kh, kw, stride, pad):
    """Returns (patches (B*Ho*Wo, kh*kw*Cin), Ho, Wo). Column order: (ki, kj, cin)."""
    x = jnp.pad(x_nhwc, ((0, 0), (pad, pad), (pad, pad), (0, 0)))
    B, H, W, C = x.shape
    Ho = (H - kh) // stride + 1
    Wo = (W - kw) // stride + 1
    slabs = []
    for i in range(kh):
        for j in range(kw):
            slabs.append(x[:, i:i + Ho * stride:stride, j:j + Wo * stride:stride, :])
    p = jnp.stack(slabs, axis=3)                      # (B, Ho, Wo, kh*kw, C)
    return p.reshape(B * Ho * Wo, kh * kw * C), Ho, Wo


def _weight_to_mat(w_oihw):
    """PyTorch (Cout, Cin, kh, kw) -> (kh*kw*Cin, Cout) matching _im2col column order."""
    c_out = w_oihw.shape[0]
    return jnp.transpose(w_oihw, (2, 3, 1, 0)).reshape(-1, c_out)


# ---------------------------------------------------------------------------
# Conv + BN + LeakyReLU block
# ---------------------------------------------------------------------------
def _conv_bn_lrelu(x_nhwc, w_oihw, gamma, beta, *, stride, pad):
    c_out, _, kh, kw = w_oihw.shape
    patches, ho, wo = _im2col(x_nhwc, kh, kw, stride, pad)   # bf16 (cast in wrapper)
    m_true, k = patches.shape                                # K never padded
    c_pad = _round_up(c_out, _LANE)

    w_mat = jnp.pad(_weight_to_mat(w_oihw),
                    ((0, 0), (0, c_pad - c_out))).astype(jnp.bfloat16)
    g = jnp.pad(gamma, (0, c_pad - c_out)).reshape(1, c_pad).astype(jnp.float32)
    b = jnp.pad(beta, (0, c_pad - c_out)).reshape(1, c_pad).astype(jnp.float32)

    if m_true <= _FUSED_MAX_M:
        # --- small/medium batch: single fused pallas_call, no HBM intermediate ---
        m_pad = _round_up(m_true, _SUB)
        patches = jnp.pad(patches, ((0, m_pad - m_true), (0, 0)))
        act = pl.pallas_call(
            functools.partial(_fused_layer_kernel, inv_count=1.0 / m_true),
            grid=(1,),
            in_specs=[
                pl.BlockSpec((m_pad, k), lambda i: (0, 0)),
                pl.BlockSpec((k, c_pad), lambda i: (0, 0)),
                pl.BlockSpec((1, c_pad), lambda i: (0, 0)),
                pl.BlockSpec((1, c_pad), lambda i: (0, 0)),
            ],
            out_specs=pl.BlockSpec((m_pad, c_pad), lambda i: (0, 0)),
            out_shape=jax.ShapeDtypeStruct((m_pad, c_pad), jnp.bfloat16),
            compiler_params=pltpu.CompilerParams(
                dimension_semantics=("arbitrary",),
                vmem_limit_bytes=_VMEM_LIMIT),
        )(patches, w_mat, g, b)
    else:
        # --- large batch: tiled 2-pass path (BN needs global batch stats) ---
        tile_m = _TILE_M
        m_pad = _round_up(m_true, tile_m)
        n_tiles = m_pad // tile_m
        patches = jnp.pad(patches, ((0, m_pad - m_true), (0, 0)))

        # Pass 1: tiled matmul (bf16 -> f32 acc, stored bf16) + per-tile channel stats.
        y, psum, psq = pl.pallas_call(
            _matmul_stats_kernel,
            grid=(n_tiles,),
            in_specs=[
                pl.BlockSpec((tile_m, k), lambda i: (i, 0)),
                pl.BlockSpec((k, c_pad), lambda i: (0, 0)),
            ],
            out_specs=[
                pl.BlockSpec((tile_m, c_pad), lambda i: (i, 0)),
                pl.BlockSpec((8, c_pad), lambda i: (i, 0)),
                pl.BlockSpec((8, c_pad), lambda i: (i, 0)),
            ],
            out_shape=[
                jax.ShapeDtypeStruct((m_pad, c_pad), jnp.bfloat16),
                jax.ShapeDtypeStruct((8 * n_tiles, c_pad), jnp.float32),
                jax.ShapeDtypeStruct((8 * n_tiles, c_pad), jnp.float32),
            ],
            compiler_params=pltpu.CompilerParams(
                dimension_semantics=("parallel",),
                vmem_limit_bytes=_VMEM_LIMIT),
        )(patches, w_mat)

        # Tiny one-shot reduction to per-channel scale/shift (divide by TRUE row
        # count; zero-padded rows contribute nothing), so pass 2 is pure streaming.
        inv = 1.0 / (8.0 * m_true)
        mean = jnp.sum(psum, axis=0, keepdims=True) * inv
        ex2 = jnp.sum(psq, axis=0, keepdims=True) * inv
        var = jnp.maximum(ex2 - mean * mean, 0.0)
        scale = jax.lax.rsqrt(var + _BN_EPS) * g
        shift = b - mean * scale

        # Pass 2: streaming scale/shift + LeakyReLU, bf16 in / bf16 out.
        act = pl.pallas_call(
            _scale_shift_lrelu_kernel,
            grid=(n_tiles,),
            in_specs=[
                pl.BlockSpec((tile_m, c_pad), lambda i: (i, 0)),
                pl.BlockSpec((1, c_pad), lambda i: (0, 0)),
                pl.BlockSpec((1, c_pad), lambda i: (0, 0)),
            ],
            out_specs=pl.BlockSpec((tile_m, c_pad), lambda i: (i, 0)),
            out_shape=jax.ShapeDtypeStruct((m_pad, c_pad), jnp.bfloat16),
            compiler_params=pltpu.CompilerParams(
                dimension_semantics=("parallel",),
                vmem_limit_bytes=_VMEM_LIMIT),
        )(y, scale, shift)

    bsz = x_nhwc.shape[0]
    return act[:m_true, :c_out].reshape(bsz, ho, wo, c_out)


# ---------------------------------------------------------------------------
# Head conv (256 -> 1) + bias + sigmoid, Cout padded to 128 for lane density
# ---------------------------------------------------------------------------
def _conv_bias_sigmoid(x_nhwc, w_oihw, bias, *, stride, pad):
    c_out, _, kh, kw = w_oihw.shape                    # c_out == 1
    patches, ho, wo = _im2col(x_nhwc, kh, kw, stride, pad)
    m_true, k = patches.shape                          # k = 4096 (already 128-aligned)

    tile_m = min(_TILE_M_HEAD, _round_up(m_true, _SUB))
    m_pad = _round_up(m_true, tile_m)
    n_tiles = m_pad // tile_m

    patches = jnp.pad(patches, ((0, m_pad - m_true), (0, 0)))
    w_mat = jnp.pad(_weight_to_mat(w_oihw),
                    ((0, 0), (0, _LANE - c_out))).astype(jnp.bfloat16)
    b = jnp.broadcast_to(bias.reshape(1, 1).astype(jnp.float32), (1, _LANE))

    out = pl.pallas_call(
        _head_kernel,
        grid=(n_tiles,),
        in_specs=[
            pl.BlockSpec((tile_m, k), lambda i: (i, 0)),
            pl.BlockSpec((k, _LANE), lambda i: (0, 0)),
            pl.BlockSpec((1, _LANE), lambda i: (0, 0)),
        ],
        out_specs=pl.BlockSpec((tile_m, _LANE), lambda i: (i, 0)),
        out_shape=jax.ShapeDtypeStruct((m_pad, _LANE), jnp.float32),
        compiler_params=pltpu.CompilerParams(
            dimension_semantics=("parallel",),
            vmem_limit_bytes=_VMEM_LIMIT),
    )(patches, w_mat, b)

    bsz = x_nhwc.shape[0]
    return out[:m_true, :c_out].reshape(bsz, ho * wo * c_out)


# ---------------------------------------------------------------------------
# Parameters (deterministic, shapes from Discriminator.__init__, image_size=28)
# ---------------------------------------------------------------------------
def init_params(key, image_size=28):
    ks = jax.random.split(key, 6)
    scale = 0.05
    return {
        "embedding": jax.random.normal(ks[0], (10, image_size ** 2), jnp.float32),
        "w1": scale * jax.random.normal(ks[1], (64, 2, 4, 4), jnp.float32),
        "g1": jnp.ones((64,), jnp.float32), "b1": jnp.zeros((64,), jnp.float32),
        "w2": scale * jax.random.normal(ks[2], (128, 64, 4, 4), jnp.float32),
        "g2": jnp.ones((128,), jnp.float32), "b2": jnp.zeros((128,), jnp.float32),
        "w3": scale * jax.random.normal(ks[3], (256, 128, 3, 3), jnp.float32),
        "g3": jnp.ones((256,), jnp.float32), "b3": jnp.zeros((256,), jnp.float32),
        "w4": scale * jax.random.normal(ks[4], (1, 256, 4, 4), jnp.float32),
        "b4": jnp.zeros((1,), jnp.float32),
    }


# ---------------------------------------------------------------------------
# Forward pass == Discriminator.forward
# ---------------------------------------------------------------------------
@jax.jit
def discriminator_forward(params, x_nchw, y_labels):
    # y = embedding(y).view(-1, 1, 28, 28); x = cat([x, y], dim=1)
    emb = params["embedding"][y_labels]                       # (B, 784)
    y_img = emb.reshape(-1, 1, 28, 28)
    x = jnp.concatenate([x_nchw, y_img], axis=1)              # (B, 2, 28, 28)
    # bf16 BEFORE transpose / im2col / pad: halves all layout-op HBM traffic.
    h = jnp.transpose(x, (0, 2, 3, 1)).astype(jnp.bfloat16)   # NCHW -> NHWC
    # block1: conv 2->64, k4 s2 p1 (28->14), BN, LeakyReLU(0.2)
    h = _conv_bn_lrelu(h, params["w1"], params["g1"], params["b1"], stride=2, pad=1)
    # block2: conv 64->128, k4 s2 p1 (14->7)
    h = _conv_bn_lrelu(h, params["w2"], params["g2"], params["b2"], stride=2, pad=1)
    # block3: conv 128->256, k3 s2 p1 (7->4)
    h = _conv_bn_lrelu(h, params["w3"], params["g3"], params["b3"], stride=2, pad=1)
    # conv1: 256->1, k4 s1 p0 (4->1), flatten, sigmoid -> (B, 1)
    return _conv_bias_sigmoid(h, params["w4"], params["b4"], stride=1, pad=0)


if __name__ == "__main__":
    IMAGE_SIZE = 28  # required by y.view(-1, 1, 28, 28) in the PyTorch forward
    key = jax.random.PRNGKey(0)
    k_param, k_x, k_y = jax.random.split(key, 3)
    params = init_params(k_param, IMAGE_SIZE)

    # Small batch: every layer takes the fully fused (single pallas_call) path.
    B = 2
    x = jax.random.normal(k_x, (B, 1, IMAGE_SIZE, IMAGE_SIZE), jnp.float32)
    y = jax.random.randint(k_y, (B,), 0, 10)
    out = jax.block_until_ready(discriminator_forward(params, x, y))
    assert out.shape == (B, 1), out.shape
    assert bool(jnp.all((out >= 0.0) & (out <= 1.0))), "sigmoid output out of range"

    # Larger batch: exercises the tiled two-pass (matmul+stats / scale-shift) path.
    B2 = 16
    x2 = jax.random.normal(k_x, (B2, 1, IMAGE_SIZE, IMAGE_SIZE), jnp.float32)
    y2 = jax.random.randint(k_y, (B2,), 0, 10)
    out2 = jax.block_until_ready(discriminator_forward(params, x2, y2))
    assert out2.shape == (B2, 1), out2.shape
    assert bool(jnp.all((out2 >= 0.0) & (out2 <= 1.0))), "sigmoid output out of range"

    print("KERNEL_OK")
</pallas_src>

<mosaic_0001>
module attributes {stable_mosaic.version = 11 : i64} {
  func.func @_fused_layer_kernel(%arg0: i32, %arg1: memref<400x32xbf16, #tpu.memory_space<vmem>>, %arg2: memref<32x128xbf16, #tpu.memory_space<vmem>>, %arg3: memref<1x128xf32, #tpu.memory_space<vmem>>, %arg4: memref<1x128xf32, #tpu.memory_space<vmem>>, %arg5: memref<400x128xbf16, #tpu.memory_space<vmem>>) attributes {dimension_semantics = [#tpu.dimension_semantics<arbitrary>], iteration_bounds = array<i64: 1>, scalar_prefetch = 0 : i64, scratch_operands = 0 : i64, tpu.core_type = #tpu.core_type<tc>, window_params = [{pipeline_mode = #tpu.pipeline_mode<synchronous>, transform_indices = @transform_0, window_bounds = array<i64: 400, 32>}, {pipeline_mode = #tpu.pipeline_mode<synchronous>, transform_indices = @transform_1, window_bounds = array<i64: 32, 128>}, {pipeline_mode = #tpu.pipeline_mode<synchronous>, transform_indices = @transform_2, window_bounds = array<i64: 1, 128>}, {pipeline_mode = #tpu.pipeline_mode<synchronous>, transform_indices = @transform_3, window_bounds = array<i64: 1, 128>}, {pipeline_mode = #tpu.pipeline_mode<synchronous>, transform_indices = @transform_4, window_bounds = array<i64: 400, 128>}]} {
    %c0 = arith.constant 0 : index
    %c0_0 = arith.constant 0 : index
    %0 = vector.load %arg1[%c0, %c0_0] : memref<400x32xbf16, #tpu.memory_space<vmem>>, vector<400x32xbf16>
    %c0_1 = arith.constant 0 : index
    %c0_2 = arith.constant 0 : index
    %1 = vector.load %arg2[%c0_1, %c0_2] : memref<32x128xbf16, #tpu.memory_space<vmem>>, vector<32x128xbf16>
    %cst = arith.constant dense<0.000000e+00> : vector<400x128xf32>
    %2 = tpu.matmul %0, %1, %cst {dimension_numbers = #tpu.dot_dimension_numbers<[1], [0], [0], [1], [0, 0, 1, 1], [], []>} : vector<400x32xbf16>, vector<32x128xbf16>, vector<400x128xf32> -> vector<400x128xf32>
    %cst_3 = arith.constant dense<0.000000e+00> : vector<128xf32>
    %3 = vector.multi_reduction <add>, %2, %cst_3 [0] : vector<400x128xf32> to vector<128xf32>
    %4 = vector.shape_cast %3 : vector<128xf32> to vector<1x128xf32>
    %cst_4 = arith.constant 0.00255102036 : f32
    %5 = vector.broadcast %cst_4 : f32 to vector<1x128xf32>
    %6 = arith.mulf %4, %5 : vector<1x128xf32>
    %7 = arith.mulf %2, %2 : vector<400x128xf32>
    %cst_5 = arith.constant dense<0.000000e+00> : vector<128xf32>
    %8 = vector.multi_reduction <add>, %7, %cst_5 [0] : vector<400x128xf32> to vector<128xf32>
    %9 = vector.shape_cast %8 : vector<128xf32> to vector<1x128xf32>
    %cst_6 = arith.constant 0.00255102036 : f32
    %10 = vector.broadcast %cst_6 : f32 to vector<1x128xf32>
    %11 = arith.mulf %9, %10 : vector<1x128xf32>
    %12 = arith.mulf %6, %6 : vector<1x128xf32>
    %13 = arith.subf %11, %12 : vector<1x128xf32>
    %cst_7 = arith.constant 0.000000e+00 : f32
    %14 = vector.broadcast %cst_7 : f32 to vector<1x128xf32>
    %15 = arith.maximumf %13, %14 : vector<1x128xf32>
    %cst_8 = arith.constant 9.99999974E-6 : f32
    %16 = vector.broadcast %cst_8 : f32 to vector<1x128xf32>
    %17 = arith.addf %15, %16 : vector<1x128xf32>
    %18 = math.rsqrt %17 : vector<1x128xf32>
    %c0_9 = arith.constant 0 : index
    %c0_10 = arith.constant 0 : index
    %19 = vector.load %arg3[%c0_9, %c0_10] : memref<1x128xf32, #tpu.memory_space<vmem>>, vector<1x128xf32>
    %20 = arith.mulf %18, %19 : vector<1x128xf32>
    %c0_11 = arith.constant 0 : index
    %c0_12 = arith.constant 0 : index
    %21 = vector.load %arg4[%c0_11, %c0_12] : memref<1x128xf32, #tpu.memory_space<vmem>>, vector<1x128xf32>
    %22 = arith.mulf %6, %20 : vector<1x128xf32>
    %23 = arith.subf %21, %22 : vector<1x128xf32>
    %24 = vector.broadcast %20 : vector<1x128xf32> to vector<400x128xf32>
    %25 = arith.mulf %2, %24 : vector<400x128xf32>
    %26 = vector.broadcast %23 : vector<1x128xf32> to vector<400x128xf32>
    %27 = arith.addf %25, %26 : vector<400x128xf32>
    %cst_13 = arith.constant 0.000000e+00 : f32
    %28 = vector.broadcast %cst_13 : f32 to vector<400x128xf32>
    %29 = arith.cmpf oge, %27, %28 : vector<400x128xf32>
    %cst_14 = arith.constant 2.000000e-01 : f32
    %30 = vector.broadcast %cst_14 : f32 to vector<400x128xf32>
    %31 = arith.mulf %30, %27 : vector<400x128xf32>
    %32 = arith.select %29, %27, %31 : vector<400x128xi1>, vector<400x128xf32>
    %33 = arith.truncf %32 : vector<400x128xf32> to vector<400x128xbf16>
    %c0_15 = arith.constant 0 : index
    %c0_16 = arith.constant 0 : index
    %34 = vector.load %arg5[%c0_15, %c0_16] : memref<400x128xbf16, #tpu.memory_space<vmem>>, vector<400x128xbf16>
    tpu.vector_store %arg5[%c0_15, %c0_16], %33 {strides = array<i32>} : memref<400x128xbf16, #tpu.memory_space<vmem>>, vector<400x128xbf16>,
    return
  }
  func.func @transform_0(%arg0: i32) -> (i32, i32) {
    %c0_i32 = arith.constant 0 : i32
    %c0_i32_0 = arith.constant 0 : i32
    %c0_i32_1 = arith.constant 0 : i32
    return %c0_i32, %c0_i32_0 : i32, i32
  }
  func.func @transform_1(%arg0: i32) -> (i32, i32) {
    %c0_i32 = arith.constant 0 : i32
    %c0_i32_0 = arith.constant 0 : i32
    %c0_i32_1 = arith.constant 0 : i32
    return %c0_i32, %c0_i32_0 : i32, i32
  }
  func.func @transform_2(%arg0: i32) -> (i32, i32) {
    %c0_i32 = arith.constant 0 : i32
    %c0_i32_0 = arith.constant 0 : i32
    %c0_i32_1 = arith.constant 0 : i32
    return %c0_i32, %c0_i32_0 : i32, i32
  }
  func.func @transform_3(%arg0: i32) -> (i32, i32) {
    %c0_i32 = arith.constant 0 : i32
    %c0_i32_0 = arith.constant 0 : i32
    %c0_i32_1 = arith.constant 0 : i32
    return %c0_i32, %c0_i32_0 : i32, i32
  }
  func.func @transform_4(%arg0: i32) -> (i32, i32) {
    %c0_i32 = arith.constant 0 : i32
    %c0_i32_0 = arith.constant 0 : i32
    %c0_i32_1 = arith.constant 0 : i32
    return %c0_i32, %c0_i32_0 : i32, i32
  }
}

module attributes {stable_mosaic.version = 11 : i64} {
  func.func @_fused_layer_kernel(%arg0: i32, %arg1: memref<112x1024xbf16, #tpu.memory_space<vmem>>, %arg2: memref<1024x128xbf16, #tpu.memory_space<vmem>>, %arg3: memref<1x128xf32, #tpu.memory_space<vmem>>, %arg4: memref<1x128xf32, #tpu.memory_space<vmem>>, %arg5: memref<112x128xbf16, #tpu.memory_space<vmem>>) attributes {dimension_semantics = [#tpu.dimension_semantics<arbitrary>], iteration_bounds = array<i64: 1>, scalar_prefetch = 0 : i64, scratch_operands = 0 : i64, tpu.core_type = #tpu.core_type<tc>, window_params = [{pipeline_mode = #tpu.pipeline_mode<synchronous>, transform_indices = @transform_0, window_bounds = array<i64: 112, 1024>}, {pipeline_mode = #tpu.pipeline_mode<synchronous>, transform_indices = @transform_1, window_bounds = array<i64: 1024, 128>}, {pipeline_mode = #tpu.pipeline_mode<synchronous>, transform_indices = @transform_2, window_bounds = array<i64: 1, 128>}, {pipeline_mode = #tpu.pipeline_mode<synchronous>, transform_indices = @transform_3, window_bounds = array<i64: 1, 128>}, {pipeline_mode = #tpu.pipeline_mode<synchronous>, transform_indices = @transform_4, window_bounds = array<i64: 112, 128>}]} {
    %c0 = arith.constant 0 : index
    %c0_0 = arith.constant 0 : index
    %0 = vector.load %arg1[%c0, %c0_0] : memref<112x1024xbf16, #tpu.memory_space<vmem>>, vector<112x1024xbf16>
    %c0_1 = arith.constant 0 : index
    %c0_2 = arith.constant 0 : index
    %1 = vector.load %arg2[%c0_1, %c0_2] : memref<1024x128xbf16, #tpu.memory_space<vmem>>, vector<1024x128xbf16>
    %cst = arith.constant dense<0.000000e+00> : vector<112x128xf32>
    %2 = tpu.matmul %0, %1, %cst {dimension_numbers = #tpu.dot_dimension_numbers<[1], [0], [0], [1], [0, 0, 1, 1], [], []>} : vector<112x1024xbf16>, vector<1024x128xbf16>, vector<112x128xf32> -> vector<112x128xf32>
    %cst_3 = arith.constant dense<0.000000e+00> : vector<128xf32>
    %3 = vector.multi_reduction <add>, %2, %cst_3 [0] : vector<112x128xf32> to vector<128xf32>
    %4 = vector.shape_cast %3 : vector<128xf32> to vector<1x128xf32>
    %cst_4 = arith.constant 0.0102040814 : f32
    %5 = vector.broadcast %cst_4 : f32 to vector<1x128xf32>
    %6 = arith.mulf %4, %5 : vector<1x128xf32>
    %7 = arith.mulf %2, %2 : vector<112x128xf32>
    %cst_5 = arith.constant dense<0.000000e+00> : vector<128xf32>
    %8 = vector.multi_reduction <add>, %7, %cst_5 [0] : vector<112x128xf32> to vector<128xf32>
    %9 = vector.shape_cast %8 : vector<128xf32> to vector<1x128xf32>
    %cst_6 = arith.constant 0.0102040814 : f32
    %10 = vector.broadcast %cst_6 : f32 to vector<1x128xf32>
    %11 = arith.mulf %9, %10 : vector<1x128xf32>
    %12 = arith.mulf %6, %6 : vector<1x128xf32>
    %13 = arith.subf %11, %12 : vector<1x128xf32>
    %cst_7 = arith.constant 0.000000e+00 : f32
    %14 = vector.broadcast %cst_7 : f32 to vector<1x128xf32>
    %15 = arith.maximumf %13, %14 : vector<1x128xf32>
    %cst_8 = arith.constant 9.99999974E-6 : f32
    %16 = vector.broadcast %cst_8 : f32 to vector<1x128xf32>
    %17 = arith.addf %15, %16 : vector<1x128xf32>
    %18 = math.rsqrt %17 : vector<1x128xf32>
    %c0_9 = arith.constant 0 : index
    %c0_10 = arith.constant 0 : index
    %19 = vector.load %arg3[%c0_9, %c0_10] : memref<1x128xf32, #tpu.memory_space<vmem>>, vector<1x128xf32>
    %20 = arith.mulf %18, %19 : vector<1x128xf32>
    %c0_11 = arith.constant 0 : index
    %c0_12 = arith.constant 0 : index
    %21 = vector.load %arg4[%c0_11, %c0_12] : memref<1x128xf32, #tpu.memory_space<vmem>>, vector<1x128xf32>
    %22 = arith.mulf %6, %20 : vector<1x128xf32>
    %23 = arith.subf %21, %22 : vector<1x128xf32>
    %24 = vector.broadcast %20 : vector<1x128xf32> to vector<112x128xf32>
    %25 = arith.mulf %2, %24 : vector<112x128xf32>
    %26 = vector.broadcast %23 : vector<1x128xf32> to vector<112x128xf32>
    %27 = arith.addf %25, %26 : vector<112x128xf32>
    %cst_13 = arith.constant 0.000000e+00 : f32
    %28 = vector.broadcast %cst_13 : f32 to vector<112x128xf32>
    %29 = arith.cmpf oge, %27, %28 : vector<112x128xf32>
    %cst_14 = arith.constant 2.000000e-01 : f32
    %30 = vector.broadcast %cst_14 : f32 to vector<112x128xf32>
    %31 = arith.mulf %30, %27 : vector<112x128xf32>
    %32 = arith.select %29, %27, %31 : vector<112x128xi1>, vector<112x128xf32>
    %33 = arith.truncf %32 : vector<112x128xf32> to vector<112x128xbf16>
    %c0_15 = arith.constant 0 : index
    %c0_16 = arith.constant 0 : index
    %34 = vector.load %arg5[%c0_15, %c0_16] : memref<112x128xbf16, #tpu.memory_space<vmem>>, vector<112x128xbf16>
    tpu.vector_store %arg5[%c0_15, %c0_16], %33 {strides = array<i32>} : memref<112x128xbf16, #tpu.memory_space<vmem>>, vector<112x128xbf16>,
    return
  }
  func.func @transform_0(%arg0: i32) -> (i32, i32) {
    %c0_i32 = arith.constant 0 : i32
    %c0_i32_0 = arith.constant 0 : i32
    %c0_i32_1 = arith.constant 0 : i32
    return %c0_i32, %c0_i32_0 : i32, i32
  }
  func.func @transform_1(%arg0: i32) -> (i32, i32) {
    %c0_i32 = arith.constant 0 : i32
    %c0_i32_0 = arith.constant 0 : i32
    %c0_i32_1 = arith.constant 0 : i32
    return %c0_i32, %c0_i32_0 : i32, i32
  }
  func.func @transform_2(%arg0: i32) -> (i32, i32) {
    %c0_i32 = arith.constant 0 : i32
    %c0_i32_0 = arith.constant 0 : i32
    %c0_i32_1 = arith.constant 0 : i32
    return %c0_i32, %c0_i32_0 : i32, i32
  }
  func.func @transform_3(%arg0: i32) -> (i32, i32) {
    %c0_i32 = arith.constant 0 : i32
    %c0_i32_0 = arith.constant 0 : i32
    %c0_i32_1 = arith.constant 0 : i32
    return %c0_i32, %c0_i32_0 : i32, i32
  }
  func.func @transform_4(%arg0: i32) -> (i32, i32) {
    %c0_i32 = arith.constant 0 : i32
    %c0_i32_0 = arith.constant 0 : i32
    %c0_i32_1 = arith.constant 0 : i32
    return %c0_i32, %c0_i32_0 : i32, i32
  }
}

module attributes {stable_mosaic.version = 11 : i64} {
  func.func @_fused_layer_kernel(%arg0: i32, %arg1: memref<32x1152xbf16, #tpu.memory_space<vmem>>, %arg2: memref<1152x256xbf16, #tpu.memory_space<vmem>>, %arg3: memref<1x256xf32, #tpu.memory_space<vmem>>, %arg4: memref<1x256xf32, #tpu.memory_space<vmem>>, %arg5: memref<32x256xbf16, #tpu.memory_space<vmem>>) attributes {dimension_semantics = [#tpu.dimension_semantics<arbitrary>], iteration_bounds = array<i64: 1>, scalar_prefetch = 0 : i64, scratch_operands = 0 : i64, tpu.core_type = #tpu.core_type<tc>, window_params = [{pipeline_mode = #tpu.pipeline_mode<synchronous>, transform_indices = @transform_0, window_bounds = array<i64: 32, 1152>}, {pipeline_mode = #tpu.pipeline_mode<synchronous>, transform_indices = @transform_1, window_bounds = array<i64: 1152, 256>}, {pipeline_mode = #tpu.pipeline_mode<synchronous>, transform_indices = @transform_2, window_bounds = array<i64: 1, 256>}, {pipeline_mode = #tpu.pipeline_mode<synchronous>, transform_indices = @transform_3, window_bounds = array<i64: 1, 256>}, {pipeline_mode = #tpu.pipeline_mode<synchronous>, transform_indices = @transform_4, window_bounds = array<i64: 32, 256>}]} {
    %c0 = arith.constant 0 : index
    %c0_0 = arith.constant 0 : index
    %0 = vector.load %arg1[%c0, %c0_0] : memref<32x1152xbf16, #tpu.memory_space<vmem>>, vector<32x1152xbf16>
    %c0_1 = arith.constant 0 : index
    %c0_2 = arith.constant 0 : index
    %1 = vector.load %arg2[%c0_1, %c0_2] : memref<1152x256xbf16, #tpu.memory_space<vmem>>, vector<1152x256xbf16>
    %cst = arith.constant dense<0.000000e+00> : vector<32x256xf32>
    %2 = tpu.matmul %0, %1, %cst {dimension_numbers = #tpu.dot_dimension_numbers<[1], [0], [0], [1], [0, 0, 1, 1], [], []>} : vector<32x1152xbf16>, vector<1152x256xbf16>, vector<32x256xf32> -> vector<32x256xf32>
    %cst_3 = arith.constant dense<0.000000e+00> : vector<256xf32>
    %3 = vector.multi_reduction <add>, %2, %cst_3 [0] : vector<32x256xf32> to vector<256xf32>
    %4 = vector.shape_cast %3 : vector<256xf32> to vector<1x256xf32>
    %cst_4 = arith.constant 3.125000e-02 : f32
    %5 = vector.broadcast %cst_4 : f32 to vector<1x256xf32>
    %6 = arith.mulf %4, %5 : vector<1x256xf32>
    %7 = arith.mulf %2, %2 : vector<32x256xf32>
    %cst_5 = arith.constant dense<0.000000e+00> : vector<256xf32>
    %8 = vector.multi_reduction <add>, %7, %cst_5 [0] : vector<32x256xf32> to vector<256xf32>
    %9 = vector.shape_cast %8 : vector<256xf32> to vector<1x256xf32>
    %cst_6 = arith.constant 3.125000e-02 : f32
    %10 = vector.broadcast %cst_6 : f32 to vector<1x256xf32>
    %11 = arith.mulf %9, %10 : vector<1x256xf32>
    %12 = arith.mulf %6, %6 : vector<1x256xf32>
    %13 = arith.subf %11, %12 : vector<1x256xf32>
    %cst_7 = arith.constant 0.000000e+00 : f32
    %14 = vector.broadcast %cst_7 : f32 to vector<1x256xf32>
    %15 = arith.maximumf %13, %14 : vector<1x256xf32>
    %cst_8 = arith.constant 9.99999974E-6 : f32
    %16 = vector.broadcast %cst_8 : f32 to vector<1x256xf32>
    %17 = arith.addf %15, %16 : vector<1x256xf32>
    %18 = math.rsqrt %17 : vector<1x256xf32>
    %c0_9 = arith.constant 0 : index
    %c0_10 = arith.constant 0 : index
    %19 = vector.load %arg3[%c0_9, %c0_10] : memref<1x256xf32, #tpu.memory_space<vmem>>, vector<1x256xf32>
    %20 = arith.mulf %18, %19 : vector<1x256xf32>
    %c0_11 = arith.constant 0 : index
    %c0_12 = arith.constant 0 : index
    %21 = vector.load %arg4[%c0_11, %c0_12] : memref<1x256xf32, #tpu.memory_space<vmem>>, vector<1x256xf32>
    %22 = arith.mulf %6, %20 : vector<1x256xf32>
    %23 = arith.subf %21, %22 : vector<1x256xf32>
    %24 = vector.broadcast %20 : vector<1x256xf32> to vector<32x256xf32>
    %25 = arith.mulf %2, %24 : vector<32x256xf32>
    %26 = vector.broadcast %23 : vector<1x256xf32> to vector<32x256xf32>
    %27 = arith.addf %25, %26 : vector<32x256xf32>
    %cst_13 = arith.constant 0.000000e+00 : f32
    %28 = vector.broadcast %cst_13 : f32 to vector<32x256xf32>
    %29 = arith.cmpf oge, %27, %28 : vector<32x256xf32>
    %cst_14 = arith.constant 2.000000e-01 : f32
    %30 = vector.broadcast %cst_14 : f32 to vector<32x256xf32>
    %31 = arith.mulf %30, %27 : vector<32x256xf32>
    %32 = arith.select %29, %27, %31 : vector<32x256xi1>, vector<32x256xf32>
    %33 = arith.truncf %32 : vector<32x256xf32> to vector<32x256xbf16>
    %c0_15 = arith.constant 0 : index
    %c0_16 = arith.constant 0 : index
    %34 = vector.load %arg5[%c0_15, %c0_16] : memref<32x256xbf16, #tpu.memory_space<vmem>>, vector<32x256xbf16>
    tpu.vector_store %arg5[%c0_15, %c0_16], %33 {strides = array<i32>} : memref<32x256xbf16, #tpu.memory_space<vmem>>, vector<32x256xbf16>,
    return
  }
  func.func @transform_0(%arg0: i32) -> (i32, i32) {
    %c0_i32 = arith.constant 0 : i32
    %c0_i32_0 = arith.constant 0 : i32
    %c0_i32_1 = arith.constant 0 : i32
    return %c0_i32, %c0_i32_0 : i32, i32
  }
  func.func @transform_1(%arg0: i32) -> (i32, i32) {
    %c0_i32 = arith.constant 0 : i32
    %c0_i32_0 = arith.constant 0 : i32
    %c0_i32_1 = arith.constant 0 : i32
    return %c0_i32, %c0_i32_0 : i32, i32
  }
  func.func @transform_2(%arg0: i32) -> (i32, i32) {
    %c0_i32 = arith.constant 0 : i32
    %c0_i32_0 = arith.constant 0 : i32
    %c0_i32_1 = arith.constant 0 : i32
    return %c0_i32, %c0_i32_0 : i32, i32
  }
  func.func @transform_3(%arg0: i32) -> (i32, i32) {
    %c0_i32 = arith.constant 0 : i32
    %c0_i32_0 = arith.constant 0 : i32
    %c0_i32_1 = arith.constant 0 : i32
    return %c0_i32, %c0_i32_0 : i32, i32
  }
  func.func @transform_4(%arg0: i32) -> (i32, i32) {
    %c0_i32 = arith.constant 0 : i32
    %c0_i32_0 = arith.constant 0 : i32
    %c0_i32_1 = arith.constant 0 : i32
    return %c0_i32, %c0_i32_0 : i32, i32
  }
}

module attributes {stable_mosaic.version = 11 : i64} {
  func.func @_head_kernel(%arg0: i32, %arg1: memref<16x4096xbf16, #tpu.memory_space<vmem>>, %arg2: memref<4096x128xbf16, #tpu.memory_space<vmem>>, %arg3: memref<1x128xf32, #tpu.memory_space<vmem>>, %arg4: memref<16x128xf32, #tpu.memory_space<vmem>>) attributes {dimension_semantics = [#tpu.dimension_semantics<parallel>], iteration_bounds = array<i64: 1>, scalar_prefetch = 0 : i64, scratch_operands = 0 : i64, tpu.core_type = #tpu.core_type<tc>, window_params = [{transform_indices = @transform_0, window_bounds = array<i64: 16, 4096>}, {pipeline_mode = #tpu.pipeline_mode<synchronous>, transform_indices = @transform_1, window_bounds = array<i64: 4096, 128>}, {pipeline_mode = #tpu.pipeline_mode<synchronous>, transform_indices = @transform_2, window_bounds = array<i64: 1, 128>}, {transform_indices = @transform_3, window_bounds = array<i64: 16, 128>}]} {
    %c0 = arith.constant 0 : index
    %c0_0 = arith.constant 0 : index
    %0 = vector.load %arg1[%c0, %c0_0] : memref<16x4096xbf16, #tpu.memory_space<vmem>>, vector<16x4096xbf16>
    %c0_1 = arith.constant 0 : index
    %c0_2 = arith.constant 0 : index
    %1 = vector.load %arg2[%c0_1, %c0_2] : memref<4096x128xbf16, #tpu.memory_space<vmem>>, vector<4096x128xbf16>
    %cst = arith.constant dense<0.000000e+00> : vector<16x128xf32>
    %2 = tpu.matmul %0, %1, %cst {dimension_numbers = #tpu.dot_dimension_numbers<[1], [0], [0], [1], [0, 0, 1, 1], [], []>} : vector<16x4096xbf16>, vector<4096x128xbf16>, vector<16x128xf32> -> vector<16x128xf32>
    %c0_3 = arith.constant 0 : index
    %c0_4 = arith.constant 0 : index
    %3 = vector.load %arg3[%c0_3, %c0_4] : memref<1x128xf32, #tpu.memory_space<vmem>>, vector<1x128xf32>
    %4 = vector.broadcast %3 : vector<1x128xf32> to vector<16x128xf32>
    %5 = arith.addf %2, %4 : vector<16x128xf32>
    %cst_5 = arith.constant 0.000000e+00 : f32
    %6 = vector.broadcast %cst_5 : f32 to vector<16x128xf32>
    %7 = arith.subf %6, %5 : vector<16x128xf32>
    %8 = math.exp %7 : vector<16x128xf32>
    %cst_6 = arith.constant 1.000000e+00 : f32
    %9 = vector.broadcast %cst_6 : f32 to vector<16x128xf32>
    %10 = arith.addf %9, %8 : vector<16x128xf32>
    %cst_7 = arith.constant 1.000000e+00 : f32
    %11 = vector.broadcast %cst_7 : f32 to vector<16x128xf32>
    %12 = arith.divf %11, %10 : vector<16x128xf32>
    %c0_8 = arith.constant 0 : index
    %c0_9 = arith.constant 0 : index
    %13 = vector.load %arg4[%c0_8, %c0_9] : memref<16x128xf32, #tpu.memory_space<vmem>>, vector<16x128xf32>
    tpu.vector_store %arg4[%c0_8, %c0_9], %12 {strides = array<i32>} : memref<16x128xf32, #tpu.memory_space<vmem>>, vector<16x128xf32>,
    return
  }
  func.func @transform_0(%arg0: i32) -> (i32, i32) {
    %c0_i32 = arith.constant 0 : i32
    %c0_i32_0 = arith.constant 0 : i32
    return %arg0, %c0_i32 : i32, i32
  }
  func.func @transform_1(%arg0: i32) -> (i32, i32) {
    %c0_i32 = arith.constant 0 : i32
    %c0_i32_0 = arith.constant 0 : i32
    %c0_i32_1 = arith.constant 0 : i32
    return %c0_i32, %c0_i32_0 : i32, i32
  }
  func.func @transform_2(%arg0: i32) -> (i32, i32) {
    %c0_i32 = arith.constant 0 : i32
    %c0_i32_0 = arith.constant 0 : i32
    %c0_i32_1 = arith.constant 0 : i32
    return %c0_i32, %c0_i32_0 : i32, i32
  }
  func.func @transform_3(%arg0: i32) -> (i32, i32) {
    %c0_i32 = arith.constant 0 : i32
    %c0_i32_0 = arith.constant 0 : i32
    return %arg0, %c0_i32 : i32, i32
  }
}

</mosaic_0001>

<bundles_post_ra>
// kernel: discriminator_forward.4
= control target key start
LH: loop header
LB: loop body
LE: loop exit
PB: predicated region body
PF: predicated region fallthrough
CT: control target
= control target key end

     0   :  { %v1671_v0 = vmov 0.0   ;;  %vm1672_vm0 = vmmov 0   ;;  %vm209_vm1 = vcmask 261120   ;;  %s2737_s1 = inlined_call_operand.vmem [shape: bf16[32,128], index: 1, kind: input, shape index: {}]   ;;  %s2738_s0 = inlined_call_operand.vmem [shape: bf16[400,32], index: 0, kind: input, shape index: {}]   ;;  %s2739_s2 = inlined_call_operand.vmem [shape: f32[1,128], index: 2, kind: input, shape index: {}]   ;;  %s2740_s3 = inlined_call_operand.vmem [shape: f32[1,128], index: 3, kind: input, shape index: {}]   ;;  %s2741_s4 = inlined_call_operand.vmem [shape: bf16[400,128], index: 4, kind: output, shape index: {}]  }
   0x1   :  { %1532 = vmatprep.subr.bf16.mxu0 %v1671_v0  ;;  %v1642_v1 = vld [vmem:[%s2737_s1 + $0x8] sm:$0xff]   ;;  %1536 = vmatprep.mubr.msk.bf16.mxu0 %vm1672_vm0, %v1671_v0  ;;  %v1643_v2 = vld [vmem:[%s2737_s1] sm:$0xff]   ;;  %v1653_v6 = vld [vmem:[%s2738_s0 + $0x70] sm:$0xff]  }
   0x2   :  { %1636 = vmatprep.subr.bf16.mxu1 %v1671_v0  ;;  %1588 = vmatprep.mubr.msk.bf16.mxu1 %vm1672_vm0, %v1671_v0  ;;  %v1644_v3 = vld [vmem:[%s2738_s0] sm:$0xff]   ;;  %v1651_v4 = vld [vmem:[%s2738_s0 + $0x68] sm:$0xff]   ;;  %v1646_v7 = vld [vmem:[%s2738_s0 + $0x10] sm:$0xff]  }
   0x3   :  { %1533 = vmatpush3.bf16.msra.mxu0 %v1642_v1  ;;  %1638 = vmatpush3.bf16.msra.mxu1 %v1642_v1  ;;  %v1645_v5 = vld [vmem:[%s2738_s0 + $0x8] sm:$0xff]   ;;  %v1655_v8 = vld [vmem:[%s2738_s0 + $0x78] sm:$0xff]   ;;  %v1657_v10 = vld [vmem:[%s2738_s0 + $0x80] sm:$0xff]  }
   0x4   :  { %1534 = vmatprep.subr.bf16.mxu0 %v1671_v0  ;;  %1637 = vmatprep.subr.bf16.mxu1 %v1671_v0  ;;  %v1647_v9 = vld [vmem:[%s2738_s0 + $0x18] sm:$0xff]   ;;  %v1648_v11 = vld [vmem:[%s2738_s0 + $0x20] sm:$0xff]   ;;  %v1659_v12 = vld [vmem:[%s2738_s0 + $0x88] sm:$0xff]  }
   0x5   :  { %v1649_v13 = vld [vmem:[%s2738_s0 + $0x28] sm:$0xff]   ;;  %v1661_v14 = vld [vmem:[%s2738_s0 + $0x90] sm:$0xff]   ;;  %v1663_v16 = vld [vmem:[%s2738_s0 + $0x98] sm:$0xff]  }
   0x6   :  { %v1650_v15 = vld [vmem:[%s2738_s0 + $0x30] sm:$0xff]   ;;  %v1652_v17 = vld [vmem:[%s2738_s0 + $0x38] sm:$0xff]   ;;  %v1664_v18 = vld [vmem:[%s2738_s0 + $0xa0] sm:$0xff]  }
   0x7   :  { %1535 = vmatpush3.bf16.msra.mxu0 %v1643_v2  ;;  %1639 = vmatpush3.bf16.msra.mxu1 %v1643_v2  ;;  %v1654_v19 = vld [vmem:[%s2738_s0 + $0x40] sm:$0xff]   ;;  %v1665_v20 = vld [vmem:[%s2738_s0 + $0xa8] sm:$0xff]   ;;  %v1666_v22 = vld [vmem:[%s2738_s0 + $0xb0] sm:$0xff]  }
   0x8   :  { %v1656_v21 = vld [vmem:[%s2738_s0 + $0x48] sm:$0xff]   ;;  %v1658_v23 = vld [vmem:[%s2738_s0 + $0x50] sm:$0xff]   ;;  %v1667_v24 = vld [vmem:[%s2738_s0 + $0xb8] sm:$0xff]  }
   0x9   :  { %v1660_v25 = vld [vmem:[%s2738_s0 + $0x58] sm:$0xff]   ;;  %v1668_v26 = vld [vmem:[%s2738_s0 + $0xc0] sm:$0xff]  }
   0xa   :  { %1537 = vmatmul.mubr.msk.bf16.vlgmr.msra.gmra.mxu0 %vm209_vm1, %v1644_v3  ;;  %1589 = vmatmul.mubr.msk.bf16.vlgmr.msra.gmra.mxu1 %vm209_vm1, %v1651_v4  ;;  %v1662_v27 = vld [vmem:[%s2738_s0 + $0x60] sm:$0xff]  }
   0xb   :  { %1540 = vmatprep.mubr.msk.bf16.mxu0 %vm1672_vm0, %v1671_v0  ;;  %1592 = vmatprep.mubr.msk.bf16.mxu1 %vm1672_vm0, %v1671_v0 }
  0x12   :  { %1541 = vmatmul.mubr.msk.bf16.gmra.mxu0 %vm209_vm1, %v1645_v5  ;;  %1593 = vmatmul.mubr.msk.bf16.gmra.mxu1 %vm209_vm1, %v1653_v6 }
  0x13   :  { %1544 = vmatprep.mubr.msk.bf16.mxu0 %vm1672_vm0, %v1671_v0  ;;  %1596 = vmatprep.mubr.msk.bf16.mxu1 %vm1672_vm0, %v1671_v0 }
  0x1a   :  { %1545 = vmatmul.mubr.msk.bf16.gmra.mxu0 %vm209_vm1, %v1646_v7  ;;  %1597 = vmatmul.mubr.msk.bf16.gmra.mxu1 %vm209_vm1, %v1655_v8 }
  0x1b   :  { %1548 = vmatprep.mubr.msk.bf16.mxu0 %vm1672_vm0, %v1671_v0  ;;  %1600 = vmatprep.mubr.msk.bf16.mxu1 %vm1672_vm0, %v1671_v0 }
  0x22   :  { %1549 = vmatmul.mubr.msk.bf16.gmra.mxu0 %vm209_vm1, %v1647_v9  ;;  %1601 = vmatmul.mubr.msk.bf16.gmra.mxu1 %vm209_vm1, %v1657_v10 }
  0x23   :  { %1552 = vmatprep.mubr.msk.bf16.mxu0 %vm1672_vm0, %v1671_v0  ;;  %1604 = vmatprep.mubr.msk.bf16.mxu1 %vm1672_vm0, %v1671_v0 }
  0x2a   :  { %1553 = vmatmul.mubr.msk.bf16.gmra.mxu0 %vm209_vm1, %v1648_v11  ;;  %1605 = vmatmul.mubr.msk.bf16.gmra.mxu1 %vm209_vm1, %v1659_v12 }
  0x2b   :  { %1556 = vmatprep.mubr.msk.bf16.mxu0 %vm1672_vm0, %v1671_v0  ;;  %1608 = vmatprep.mubr.msk.bf16.mxu1 %vm1672_vm0, %v1671_v0 }
  0x32   :  { %1557 = vmatmul.mubr.msk.bf16.gmra.mxu0 %vm209_vm1, %v1649_v13  ;;  %1609 = vmatmul.mubr.msk.bf16.gmra.mxu1 %vm209_vm1, %v1661_v14 }
  0x33   :  { %1560 = vmatprep.mubr.msk.bf16.mxu0 %vm1672_vm0, %v1671_v0  ;;  %1612 = vmatprep.mubr.msk.bf16.mxu1 %vm1672_vm0, %v1671_v0 }
  0x3a   :  { %1561 = vmatmul.mubr.msk.bf16.gmra.mxu0 %vm209_vm1, %v1650_v15  ;;  %1613 = vmatmul.mubr.msk.bf16.gmra.mxu1 %vm209_vm1, %v1663_v16 }
  0x3b   :  { %1564 = vmatprep.mubr.msk.bf16.mxu0 %vm1672_vm0, %v1671_v0  ;;  %1616 = vmatprep.mubr.msk.bf16.mxu1 %vm1672_vm0, %v1671_v0 }
  0x42   :  { %1565 = vmatmul.mubr.msk.bf16.gmra.mxu0 %vm209_vm1, %v1652_v17  ;;  %1617 = vmatmul.mubr.msk.bf16.gmra.mxu1 %vm209_vm1, %v1664_v18 }
  0x43   :  { %1568 = vmatprep.mubr.msk.bf16.mxu0 %vm1672_vm0, %v1671_v0  ;;  %1620 = vmatprep.mubr.msk.bf16.mxu1 %vm1672_vm0, %v1671_v0 }
  0x4a   :  { %1569 = vmatmul.mubr.msk.bf16.gmra.mxu0 %vm209_vm1, %v1654_v19  ;;  %1621 = vmatmul.mubr.msk.bf16.gmra.mxu1 %vm209_vm1, %v1665_v20 }
  0x4b   :  { %1572 = vmatprep.mubr.msk.bf16.mxu0 %vm1672_vm0, %v1671_v0  ;;  %1624 = vmatprep.mubr.msk.bf16.mxu1 %vm1672_vm0, %v1671_v0 }
  0x52   :  { %1573 = vmatmul.mubr.msk.bf16.gmra.mxu0 %vm209_vm1, %v1656_v21  ;;  %1625 = vmatmul.mubr.msk.bf16.gmra.mxu1 %vm209_vm1, %v1666_v22 }
  0x53   :  { %1576 = vmatprep.mubr.msk.bf16.mxu0 %vm1672_vm0, %v1671_v0  ;;  %1628 = vmatprep.mubr.msk.bf16.mxu1 %vm1672_vm0, %v1671_v0 }
  0x5a   :  { %1577 = vmatmul.mubr.msk.bf16.gmra.mxu0 %vm209_vm1, %v1658_v23  ;;  %1629 = vmatmul.mubr.msk.bf16.gmra.mxu1 %vm209_vm1, %v1667_v24 }
  0x5b   :  { %1580 = vmatprep.mubr.msk.bf16.mxu0 %vm1672_vm0, %v1671_v0  ;;  %1632 = vmatprep.mubr.msk.bf16.mxu1 %vm1672_vm0, %v1671_v0 }
  0x62   :  { %1581 = vmatmul.mubr.msk.bf16.gmra.mxu0 %vm209_vm1, %v1660_v25  ;;  %1633 = vmatmul.mubr.msk.bf16.gmra.mxu1 %vm209_vm1, %v1668_v26 }
  0x63   :  { %1584 = vmatprep.mubr.msk.bf16.mxu0 %vm1672_vm0, %v1671_v0 }
  0x6a   :  { %1585 = vmatmul.mubr.msk.bf16.gmra.mxu0 %vm209_vm1, %v1662_v27 }
  0xca   :  { %v1858_v28 = vpop.f32.mrf.mxu0  ;;  %v1860_v30 = vpop.f32.mrf.mxu1 }
  0xcb   :  { %v574_v18 = vmul.f32 %v1858_v28, %v1858_v28 }
  0xcc   :  { %v1538_v29 = vpop.f32.mrf.mxu0  ;;  %v1590_v32 = vpop.f32.mrf.mxu1 }
  0xce   :  { %v1862_v31 = vpop.f32.mrf.mxu0  ;;  %v1864_v34 = vpop.f32.mrf.mxu1 }
  0xcf   :  { %v575_v15 = vmul.f32 %v1862_v31, %v1862_v31  ;;  %v518_v19 = vadd.f32 %v1862_v31, %v1858_v28 }
  0xd0   :  { %v1539_v33 = vpop.f32.mrf.mxu0  ;;  %v1591_v36 = vpop.f32.mrf.mxu1 }
  0xd1   :  { %v624_v23 = vadd.f32 %v575_v15, %v574_v18 }
  0xd2   :  { %v1866_v35 = vpop.f32.mrf.mxu0  ;;  %v1868_v38 = vpop.f32.mrf.mxu1 }
  0xd3   :  { %v576_v20 = vmul.f32 %v1866_v35, %v1866_v35  ;;  %v519_v24 = vadd.f32 %v518_v19, %v1866_v35 }
  0xd4   :  { %v1542_v37 = vpop.f32.mrf.mxu0  ;;  %v1594_v40 = vpop.f32.mrf.mxu1 }
  0xd5   :  { %v625_v29 = vadd.f32 %v624_v23, %v576_v20 }
  0xd6   :  { %v1870_v39 = vpop.f32.mrf.mxu0  ;;  %v1872_v42 = vpop.f32.mrf.mxu1 }
  0xd7   :  { %v577_v25 = vmul.f32 %v1870_v39, %v1870_v39  ;;  %v520_v32 = vadd.f32 %v519_v24, %v1870_v39 }
  0xd8   :  { %v1543_v41 = vpop.f32.mrf.mxu0  ;;  %v1595_v44 = vpop.f32.mrf.mxu1 }
  0xd9   :  { %v626_v40 = vadd.f32 %v625_v29, %v577_v25 }
  0xda   :  { %v1874_v43 = vpop.f32.mrf.mxu0  ;;  %v1876_v46 = vpop.f32.mrf.mxu1 }
  0xdb   :  { %v578_v33 = vmul.f32 %v1874_v43, %v1874_v43  ;;  %v521_v41 = vadd.f32 %v520_v32, %v1874_v43 }
  0xdc   :  { %v1546_v45 = vpop.f32.mrf.mxu0  ;;  %v1598_v48 = vpop.f32.mrf.mxu1 }
  0xde   :  { %v1878_v47 = vpop.f32.mrf.mxu0  ;;  %v1880_v50 = vpop.f32.mrf.mxu1 }
  0xdf   :  { %v579_v44 = vmul.f32 %v1878_v47, %v1878_v47 }
  0xe0   :  { %v1547_v49 = vpop.f32.mrf.mxu0  ;;  %v1599_v52 = vpop.f32.mrf.mxu1 }
  0xe1   :  { %v627_v49 = vadd.f32 %v626_v40, %v578_v33  ;;  %v522_v52 = vadd.f32 %v521_v41, %v1878_v47 }
  0xe2   :  { %v1882_v51 = vpop.f32.mrf.mxu0  ;;  %v1884_v54 = vpop.f32.mrf.mxu1 }
  0xe4   :  { %v1550_v53 = vpop.f32.mrf.mxu0  ;;  %v1602_v56 = vpop.f32.mrf.mxu1 }
  0xe5   :  { %v580_v53 = vmul.f32 %v1882_v51, %v1882_v51 }
  0xe6   :  { %v1886_v55 = vpop.f32.mrf.mxu0  ;;  %v1888_v58 = vpop.f32.mrf.mxu1 }
  0xe8   :  { %v1551_v57 = vpop.f32.mrf.mxu0  ;;  %v1603_v60 = vpop.f32.mrf.mxu1 }
  0xe9   :  { %v628_v60 = vadd.f32 %v627_v49, %v579_v44 }
  0xea   :  { %v1890_v59 = vpop.f32.mrf.mxu0  ;;  %v1892_v62 = vpop.f32.mrf.mxu1 }
  0xec   :  { %v1554_v61 = vpop.f32.mrf.mxu0  ;;  %v1606_v0 = vpop.f32.mrf.mxu1 }
  0xed   :  { %v523_v61 = vadd.f32 %v522_v52, %v1882_v51  ;;  %v581_v0 = vmul.f32 %v1886_v55, %v1886_v55 }
  0xee   :  { %v1894_v63 = vpop.f32.mrf.mxu0  ;;  %v1896_v2 = vpop.f32.mrf.mxu1 }
  0xef   :  { %v583_v18 = vmul.f32 %v1894_v63, %v1894_v63 }
  0xf0   :  { %v1555_v1 = vpop.f32.mrf.mxu0  ;;  %v1607_v4 = vpop.f32.mrf.mxu1 }
  0xf2   :  { %v1898_v3 = vpop.f32.mrf.mxu0  ;;  %v1900_v6 = vpop.f32.mrf.mxu1 }
  0xf3   :  { %v584_v24 = vmul.f32 %v1898_v3, %v1898_v3 }
  0xf4   :  { %v1558_v5 = vpop.f32.mrf.mxu0  ;;  %v1610_v8 = vpop.f32.mrf.mxu1 }
  0xf5   :  { %v629_v5 = vadd.f32 %v628_v60, %v580_v53  ;;  %v524_v8 = vadd.f32 %v523_v61, %v1886_v55 }
  0xf6   :  { %v1902_v7 = vpop.f32.mrf.mxu0  ;;  %v1904_v10 = vpop.f32.mrf.mxu1 }
  0xf7   :  { %v630_v15 = vadd.f32 %v629_v5, %v581_v0  ;;  %v585_v33 = vmul.f32 %v1902_v7, %v1902_v7 }
  0xf8   :  { %v1559_v9 = vpop.f32.mrf.mxu0  ;;  %v1611_v12 = vpop.f32.mrf.mxu1 }
  0xf9   :  { %v582_v9 = vmul.f32 %v1890_v59, %v1890_v59 }
  0xfa   :  { %v1906_v11 = vpop.f32.mrf.mxu0  ;;  %v1908_v14 = vpop.f32.mrf.mxu1 }
  0xfc   :  { %v1562_v13 = vpop.f32.mrf.mxu0  ;;  %v1614_v17 = vpop.f32.mrf.mxu1 }
  0xfd   :  { %v525_v17 = vadd.f32 %v524_v8, %v1890_v59 }
  0xfe   :  { %v1912_v16 = vpop.f32.mrf.mxu0  ;;  %v1920_v22 = vpop.f32.mrf.mxu1 }
  0xff   :  { %v526_v23 = vadd.f32 %v525_v17, %v1894_v63  ;;  %v587_v60 = vmul.f32 %v1912_v16, %v1912_v16 }
 0x100   :  { %v1563_v21 = vpop.f32.mrf.mxu0  ;;  %v1615_v27 = vpop.f32.mrf.mxu1 }
 0x101   :  { %v631_v21 = vadd.f32 %v630_v15, %v582_v9  ;;  %v527_v32 = vadd.f32 %v526_v23, %v1898_v3 }
 0x102   :  { %v1925_v26 = vpop.f32.mrf.mxu0  ;;  %v1930_v37 = vpop.f32.mrf.mxu1 }
 0x103   :  { %v632_v29 = vadd.f32 %v631_v21, %v583_v18  ;;  %v528_v44 = vadd.f32 %v527_v32, %v1902_v7  ;;  %v588_v8 = vmul.f32 %v1925_v26, %v1925_v26 }
 0x104   :  { %v1566_v36 = vpop.f32.mrf.mxu0  ;;  %v1618_v48 = vpop.f32.mrf.mxu1 }
 0x105   :  { %v633_v41 = vadd.f32 %v632_v29, %v584_v24  ;;  %v586_v48 = vmul.f32 %v1906_v11, %v1906_v11 }
 0x106   :  { %v1935_v45 = vpop.f32.mrf.mxu0  ;;  %v1940_v57 = vpop.f32.mrf.mxu1 }
 0x107   :  { %v634_v53 = vadd.f32 %v633_v41, %v585_v33  ;;  %v589_v18 = vmul.f32 %v1935_v45, %v1935_v45 }
 0x108   :  { %v1567_v56 = vpop.f32.mrf.mxu0  ;;  %v1619_v4 = vpop.f32.mrf.mxu1 }
 0x109   :  { %v529_v56 = vadd.f32 %v528_v44, %v1906_v11  ;;  %v635_v4 = vadd.f32 %v634_v53, %v586_v48 }
 0x10a   :  { %v1945_v1 = vpop.f32.mrf.mxu0  ;;  %v1950_v13 = vpop.f32.mrf.mxu1 }
 0x10b   :  { %2776 = vst [vmem:[#allocation2_spill] sm:$0xff] %v1950_v13  ;;  %v530_v5 = vadd.f32 %v529_v56, %v1912_v16  ;;  %v636_v15 = vadd.f32 %v635_v4, %v587_v60 }
 0x10c   :  { %v1570_v12 = vpop.f32.mrf.mxu0  ;;  %v1622_v20 = vpop.f32.mrf.mxu1 }
 0x10d   :  { %v531_v17 = vadd.f32 %v530_v5, %v1925_v26  ;;  %v637_v23 = vadd.f32 %v636_v15, %v588_v8 }
 0x10e   :  { %v1955_v19 = vpop.f32.mrf.mxu0  ;;  %v1960_v27 = vpop.f32.mrf.mxu1 }
 0x10f   :  { %2777 = vst [vmem:[#allocation3_spill] sm:$0xff] %v1960_v27  ;;  %v532_v24 = vadd.f32 %v531_v17, %v1935_v45  ;;  %v638_v33 = vadd.f32 %v637_v23, %v589_v18  ;;  %v591_v41 = vmul.f32 %v1955_v19, %v1955_v19 }
 0x110   :  { %v1571_v25 = vpop.f32.mrf.mxu0  ;;  %v1623_v40 = vpop.f32.mrf.mxu1 }
 0x111   :  { %v590_v25 = vmul.f32 %v1945_v1, %v1945_v1  ;;  %v533_v40 = vadd.f32 %v532_v24, %v1945_v1 }
 0x112   :  { %v1965_v36 = vpop.f32.mrf.mxu0  ;;  %v1970_v52 = vpop.f32.mrf.mxu1 }
 0x113   :  { %2778 = vst [vmem:[#allocation4_spill] sm:$0xff] %v1970_v52  ;;  %v534_v53 = vadd.f32 %v533_v40, %v1955_v19  ;;  %v592_v56 = vmul.f32 %v1965_v36, %v1965_v36 }
 0x114   :  { %v1574_v49 = vpop.f32.mrf.mxu0  ;;  %v1626_v0 = vpop.f32.mrf.mxu1 }
 0x115   :  { %v639_v49 = vadd.f32 %v638_v33, %v590_v25  ;;  %v535_v5 = vadd.f32 %v534_v53, %v1965_v36 }
 0x116   :  { %v1975_v61 = vpop.f32.mrf.mxu0  ;;  %v1980_v12 = vpop.f32.mrf.mxu1 }
 0x117   :  { %2779 = vst [vmem:[#allocation5_spill] sm:$0xff] %v1980_v12  ;;  %v640_v4 = vadd.f32 %v639_v49, %v591_v41  ;;  %v593_v8 = vmul.f32 %v1975_v61, %v1975_v61  ;;  %v536_v18 = vadd.f32 %v535_v5, %v1975_v61 }
 0x118   :  { %v1575_v9 = vpop.f32.mrf.mxu0  ;;  %v1627_v21 = vpop.f32.mrf.mxu1 }
 0x119   :  { %v641_v17 = vadd.f32 %v640_v4, %v592_v56 }
 0x11a   :  { %v1985_v20 = vpop.f32.mrf.mxu0  ;;  %v1990_v32 = vpop.f32.mrf.mxu1 }
 0x11b   :  { %2780 = vst [vmem:[#allocation6_spill] sm:$0xff] %v1990_v32  ;;  %v594_v21 = vmul.f32 %v1985_v20, %v1985_v20  ;;  %v642_v25 = vadd.f32 %v641_v17, %v593_v8 }
 0x11c   :  { %v1578_v29 = vpop.f32.mrf.mxu0  ;;  %v1630_v48 = vpop.f32.mrf.mxu1 }
 0x11d   :  { %v537_v29 = vadd.f32 %v536_v18, %v1985_v20  ;;  %v643_v48 = vadd.f32 %v642_v25, %v594_v21 }
 0x11e   :  { %v1995_v44 = vpop.f32.mrf.mxu0  ;;  %v2000_v0 = vpop.f32.mrf.mxu1 }
 0x11f   :  { %2781 = vst [vmem:[#allocation7_spill] sm:$0xff] %v2000_v0  ;;  %v595_v33 = vmul.f32 %v1995_v44, %v1995_v44  ;;  %v538_v49 = vadd.f32 %v537_v29, %v1995_v44 }
 0x120   :  { %v1579_v60 = vpop.f32.mrf.mxu0  ;;  %v1631_v15 = vpop.f32.mrf.mxu1 }
 0x121   :  { %v644_v4 = vadd.f32 %v643_v48, %v595_v33 }
 0x122   :  { %v2005_v9 = vpop.f32.mrf.mxu0  ;;  %v2010_v24 = vpop.f32.mrf.mxu1 }
 0x123   :  { %2782 = vst [vmem:[#allocation8_spill] sm:$0xff] %v2005_v9  ;;  %2783 = vst [vmem:[#allocation9_spill] sm:$0xff] %v2010_v24  ;;  %v596_v53 = vmul.f32 %v2005_v9, %v2005_v9  ;;  %v539_v5 = vadd.f32 %v538_v49, %v2005_v9 }
 0x124   :  { %v1582_v23 = vpop.f32.mrf.mxu0  ;;  %v1634_v41 = vpop.f32.mrf.mxu1 }
 0x125   :  { %v645_v18 = vadd.f32 %v644_v4, %v596_v53  ;;  %v600_v53 = vmul.f32 %v1860_v30, %v1860_v30 }
 0x126   :  { %v2015_v40 = vpop.f32.mrf.mxu0  ;;  %v2020_v60 = vpop.f32.mrf.mxu1 }
 0x127   :  { %2784 = vst [vmem:[#allocation10_spill] sm:$0xff] %v2020_v60  ;;  %v597_v8 = vmul.f32 %v2015_v40, %v2015_v40  ;;  %v540_v21 = vadd.f32 %v539_v5, %v2015_v40 }
 0x128   :  { %v1583_v56 = vpop.f32.mrf.mxu0  ;;  %v1635_v17 = vpop.f32.mrf.mxu1 }
 0x129   :  { %v646_v29 = vadd.f32 %v645_v18, %v597_v8  ;;  %v601_v8 = vmul.f32 %v1864_v34, %v1864_v34 }
 0x12a   :  { %v2025_v15 = vpop.f32.mrf.mxu0 }
 0x12b   :  { %v598_v23 = vmul.f32 %v2025_v15, %v2025_v15  ;;  %v541_v41 = vadd.f32 %v540_v21, %v2025_v15  ;;  %v602_v21 = vmul.f32 %v1868_v38, %v1868_v38 }
 0x12c   :  { %v1586_v25 = vpop.f32.mrf.mxu0 }
 0x12d   :  { %v647_v33 = vadd.f32 %v646_v29, %v598_v23 }
 0x12e   :  { %v2031_v56 = vpop.f32.mrf.mxu0 }
 0x12f   :  { %v542_v48 = vadd.f32 %v541_v41, %v2031_v56  ;;  %v599_v49 = vmul.f32 %v2031_v56, %v2031_v56 }
 0x130   :  { %v1587_v9 = vpop.f32.mrf.mxu0 }
 0x131   :  { %v543_v4 = vadd.f32 %v542_v48, %v1860_v30  ;;  %v648_v5 = vadd.f32 %v647_v33, %v599_v49  ;;  %v603_v9 = vmul.f32 %v1872_v42, %v1872_v42  ;;  %v604_v33 = vmul.f32 %v1876_v46, %v1876_v46 }
 0x133   :  { %v544_v17 = vadd.f32 %v543_v4, %v1864_v34  ;;  %v649_v18 = vadd.f32 %v648_v5, %v600_v53  ;;  %v605_v53 = vmul.f32 %v1880_v50, %v1880_v50 }
 0x135   :  { %v545_v23 = vadd.f32 %v544_v17, %v1868_v38  ;;  %v650_v25 = vadd.f32 %v649_v18, %v601_v8  ;;  %v606_v8 = vmul.f32 %v1884_v54, %v1884_v54 }
 0x137   :  { %v546_v29 = vadd.f32 %v545_v23, %v1872_v42  ;;  %v651_v41 = vadd.f32 %v650_v25, %v602_v21  ;;  %v607_v21 = vmul.f32 %v1888_v58, %v1888_v58 }
 0x139   :  { %v547_v48 = vadd.f32 %v546_v29, %v1876_v46  ;;  %v652_v49 = vadd.f32 %v651_v41, %v603_v9  ;;  %v608_v9 = vmul.f32 %v1892_v62, %v1892_v62 }
 0x13b   :  { %v548_v4 = vadd.f32 %v547_v48, %v1880_v50  ;;  %v653_v5 = vadd.f32 %v652_v49, %v604_v33  ;;  %v609_v33 = vmul.f32 %v1896_v2, %v1896_v2 }
 0x13d   :  { %v654_v17 = vadd.f32 %v653_v5, %v605_v53  ;;  %v549_v18 = vadd.f32 %v548_v4, %v1884_v54  ;;  %v610_v53 = vmul.f32 %v1900_v6, %v1900_v6 }
 0x13f   :  { %v550_v23 = vadd.f32 %v549_v18, %v1888_v58  ;;  %v655_v25 = vadd.f32 %v654_v17, %v606_v8  ;;  %v611_v8 = vmul.f32 %v1904_v10, %v1904_v10 }
 0x141   :  { %v551_v29 = vadd.f32 %v550_v23, %v1892_v62  ;;  %v656_v41 = vadd.f32 %v655_v25, %v607_v21  ;;  %v612_v21 = vmul.f32 %v1908_v14, %v1908_v14 }
 0x143   :  { %v552_v48 = vadd.f32 %v551_v29, %v1896_v2  ;;  %v657_v49 = vadd.f32 %v656_v41, %v608_v9  ;;  %v613_v29 = vmul.f32 %v1920_v22, %v1920_v22 }
 0x145   :  { %v553_v4 = vadd.f32 %v552_v48, %v1900_v6  ;;  %v658_v5 = vadd.f32 %v657_v49, %v609_v33  ;;  %v614_v49 = vmul.f32 %v1930_v37, %v1930_v37 }
 0x147   :  { %v554_v17 = vadd.f32 %v553_v4, %v1904_v10  ;;  %v659_v18 = vadd.f32 %v658_v5, %v610_v53  ;;  %v615_v5 = vmul.f32 %v1940_v57, %v1940_v57 }
 0x149   :  { %v555_v23 = vadd.f32 %v554_v17, %v1908_v14  ;;  %v660_v25 = vadd.f32 %v659_v18, %v611_v8  ;;  %v616_v18 = vmul.f32 %v1950_v13, %v1950_v13 }
 0x14b   :  { %v556_v9 = vadd.f32 %v555_v23, %v1920_v22  ;;  %v661_v41 = vadd.f32 %v660_v25, %v612_v21  ;;  %v617_v25 = vmul.f32 %v1960_v27, %v1960_v27 }
 0x14d   :  { %v662_v48 = vadd.f32 %v661_v41, %v613_v29  ;;  %v557_v33 = vadd.f32 %v556_v9, %v1930_v37  ;;  %v618_v41 = vmul.f32 %v1970_v52, %v1970_v52 }
 0x14f   :  { %v663_v4 = vadd.f32 %v662_v48, %v614_v49  ;;  %v558_v53 = vadd.f32 %v557_v33, %v1940_v57  ;;  %v619_v49 = vmul.f32 %v1980_v12, %v1980_v12 }
 0x151   :  { %v664_v17 = vadd.f32 %v663_v4, %v615_v5  ;;  %v559_v8 = vadd.f32 %v558_v53, %v1950_v13  ;;  %v620_v5 = vmul.f32 %v1990_v32, %v1990_v32 }
 0x153   :  { %v665_v23 = vadd.f32 %v664_v17, %v616_v18  ;;  %v560_v21 = vadd.f32 %v559_v8, %v1960_v27  ;;  %v621_v18 = vmul.f32 %v2000_v0, %v2000_v0 }
 0x155   :  { %v666_v9 = vadd.f32 %v665_v23, %v617_v25  ;;  %v561_v29 = vadd.f32 %v560_v21, %v1970_v52  ;;  %v622_v25 = vmul.f32 %v2010_v24, %v2010_v24 }
 0x157   :  { %v667_v48 = vadd.f32 %v666_v9, %v618_v41  ;;  %v562_v33 = vadd.f32 %v561_v29, %v1980_v12  ;;  %v623_v41 = vmul.f32 %v2020_v60, %v2020_v60 }
 0x159   :  { %v668_v4 = vadd.f32 %v667_v48, %v619_v49  ;;  %v563_v53 = vadd.f32 %v562_v33, %v1990_v32 }
 0x15b   :  { %v669_v17 = vadd.f32 %v668_v4, %v620_v5  ;;  %v564_v8 = vadd.f32 %v563_v53, %v2000_v0 }
 0x15d   :  { %v670_v23 = vadd.f32 %v669_v17, %v621_v18  ;;  %v565_v21 = vadd.f32 %v564_v8, %v2010_v24 }
 0x15f   :  { %v671_v9 = vadd.f32 %v670_v23, %v622_v25  ;;  %v566_v29 = vadd.f32 %v565_v21, %v2020_v60  ;;  %v690_v60 = vlaneseq }
 0x161   :  { %v567_v48 = vrot.slane %v566_v29, 4  ;;  %v672_v33 = vadd.f32 %v671_v9, %v623_v41  ;;  %v691_v41 = vshrl.u32 %v690_v60, 7 }
 0x163   :  { %v568_v49 = vadd.f32 %v567_v48, %v566_v29  ;;  %v673_v4 = vrot.slane %v672_v33, 4  ;;  %v685_v29 = vld [vmem:[%s2739_s2] sm:$0x1] }
 0x165   :  { %v569_v53 = vrot.slane %v568_v49, 2  ;;  %v674_v5 = vadd.f32 %v673_v4, %v672_v33  ;;  %v692_v33 = vsub.s32 0, %v691_v41  ;;  %v2789_v41 = vld [vmem:[#allocation5_spill] sm:$0xff] }
 0x167   :  { %v570_v32 = vadd.f32 %v569_v53, %v568_v49  ;;  %v675_v0 = vrot.slane %v674_v5, 2 }
 0x169   :  { %v571_v17 = vrot.slane %v570_v32, 1  ;;  %v676_v18 = vadd.f32 %v675_v0, %v674_v5 }
 0x16b   :  { %v572_v8 = vadd.f32 %v571_v17, %v570_v32  ;;  %v677_v12 = vrot.slane %v676_v18, 1 }
 0x16d   :  { %v573_v52 = vmul.f32 0.0025510204, %v572_v8  ;;  %v678_v24 = vadd.f32 %v677_v12, %v676_v18  ;;  %v687_v12 = vld [vmem:[%s2740_s3] sm:$0x1]  ;;  %v2785_v8 = vld [vmem:[#allocation8_spill] sm:$0xff] }
 0x16f   :  { %v679_v23 = vmul.f32 0.0025510204, %v678_v24  ;;  %v680_v25 = vmul.f32 %v573_v52, %v573_v52 }
 0x171   :  { %v681_v21 = vsub.f32 %v679_v23, %v680_v25 }
 0x173   :  { %v682_v27 = vmax.f32 %v681_v21, 0.0  ;;  %v2787_v21 = vld [vmem:[#allocation3_spill] sm:$0xff] }
 0x175   :  { %v683_v13 = vadd.f32 1e-05, %v682_v27 }
 0x177   :  { %1669 = vrsqrt.f32 %v683_v13 }
 0x184   :  { %v1670_v9 = vpop.eup %1669 }
 0x185   :  { %v686_v48 = vmul.f32 %v1670_v9, %v685_v29  ;;  %v2788_v9 = vld [vmem:[#allocation4_spill] sm:$0xff] }
 0x187   :  { %v688_v0 = vmul.f32 %v686_v48, %v573_v52  ;;  %v693_v32 = vrot.slane %v686_v48, %v692_v33  ;;  %v2790_v48 = vld [vmem:[#allocation6_spill] sm:$0xff] }
 0x189   :  { %v689_v24 = vsub.f32 %v687_v12, %v688_v0  ;;  %v694_v49 = vmul.f32 %v693_v32, %v1858_v28  ;;  %v695_v13 = vmul.f32 %v693_v32, %v1862_v31  ;;  %v696_v27 = vmul.f32 %v693_v32, %v1866_v35  ;;  %v2792_v0 = vld [vmem:[#allocation9_spill] sm:$0xff]  ;;  %v2793_v12 = vld [vmem:[#allocation10_spill] sm:$0xff] }
 0x18a   :  { %v697_v4 = vmul.f32 %v693_v32, %v1870_v39  ;;  %v698_v53 = vmul.f32 %v693_v32, %v1874_v43  ;;  %v699_v60 = vmul.f32 %v693_v32, %v1878_v47  ;;  %v700_v52 = vmul.f32 %v693_v32, %v1882_v51 }
 0x18b   :  { %v701_v5 = vmul.f32 %v693_v32, %v1886_v55  ;;  %v702_v17 = vmul.f32 %v693_v32, %v1890_v59  ;;  %v703_v18 = vmul.f32 %v693_v32, %v1894_v63  ;;  %v704_v28 = vmul.f32 %v693_v32, %v1898_v3 }
 0x18c   :  { %v705_v31 = vmul.f32 %v693_v32, %v1902_v7  ;;  %v706_v35 = vmul.f32 %v693_v32, %v1906_v11  ;;  %v707_v39 = vmul.f32 %v693_v32, %v1912_v16  ;;  %v708_v43 = vmul.f32 %v693_v32, %v1925_v26 }
 0x18d   :  { %v709_v47 = vmul.f32 %v693_v32, %v1935_v45  ;;  %v710_v51 = vmul.f32 %v693_v32, %v1945_v1  ;;  %v711_v55 = vmul.f32 %v693_v32, %v1955_v19  ;;  %v712_v59 = vmul.f32 %v693_v32, %v1965_v36 }
 0x18e   :  { %v713_v63 = vmul.f32 %v693_v32, %v1975_v61  ;;  %v714_v3 = vmul.f32 %v693_v32, %v1985_v20  ;;  %v715_v7 = vmul.f32 %v693_v32, %v1995_v44  ;;  %v716_v11 = vmul.f32 %v693_v32, %v2785_v8 }
 0x18f   :  { %v717_v16 = vmul.f32 %v693_v32, %v2015_v40  ;;  %v718_v26 = vmul.f32 %v693_v32, %v2025_v15  ;;  %v719_v45 = vmul.f32 %v693_v32, %v2031_v56  ;;  %v720_v1 = vmul.f32 %v693_v32, %v1860_v30  ;;  %v2786_v56 = vld [vmem:[#allocation2_spill] sm:$0xff] }
 0x190   :  { %v721_v19 = vmul.f32 %v693_v32, %v1864_v34  ;;  %v722_v36 = vmul.f32 %v693_v32, %v1868_v38  ;;  %v723_v61 = vmul.f32 %v693_v32, %v1872_v42  ;;  %v724_v20 = vmul.f32 %v693_v32, %v1876_v46 }
 0x191   :  { %v725_v44 = vmul.f32 %v693_v32, %v1880_v50  ;;  %v726_v23 = vmul.f32 %v693_v32, %v1884_v54  ;;  %v727_v40 = vmul.f32 %v693_v32, %v1888_v58  ;;  %v728_v15 = vmul.f32 %v693_v32, %v1892_v62 }
 0x192   :  { %v2149_v25 = vrot.slane %v689_v24, %v692_v33  ;;  %v729_v30 = vmul.f32 %v693_v32, %v1896_v2  ;;  %v730_v34 = vmul.f32 %v693_v32, %v1900_v6  ;;  %v731_v38 = vmul.f32 %v693_v32, %v1904_v10  ;;  %v2791_v33 = vld [vmem:[#allocation7_spill] sm:$0xff] }
 0x193   :  { %v732_v42 = vmul.f32 %v693_v32, %v1908_v14  ;;  %v733_v46 = vmul.f32 %v693_v32, %v1920_v22  ;;  %v734_v50 = vmul.f32 %v693_v32, %v1930_v37  ;;  %v735_v54 = vmul.f32 %v693_v32, %v1940_v57 }
 0x194   :  { %v736_v58 = vmul.f32 %v693_v32, %v2786_v56  ;;  %v737_v62 = vmul.f32 %v693_v32, %v2787_v21  ;;  %v738_v29 = vmul.f32 %v693_v32, %v2788_v9  ;;  %v739_v2 = vmul.f32 %v693_v32, %v2789_v41 }
 0x195   :  { %v740_v6 = vmul.f32 %v693_v32, %v2790_v48  ;;  %v741_v10 = vmul.f32 %v693_v32, %v2791_v33  ;;  %v742_v14 = vmul.f32 %v693_v32, %v2792_v0  ;;  %v2166_v22 = vmul.f32 %v693_v32, %v2793_v12 }
 0x196   :  { %v2169_v37 = vadd.f32 %v2149_v25, %v694_v49  ;;  %v2172_v57 = vadd.f32 %v2149_v25, %v695_v13  ;;  %v2175_v24 = vadd.f32 %v2149_v25, %v696_v27  ;;  %v2178_v8 = vadd.f32 %v2149_v25, %v697_v4 }
 0x197   :  { %v2181_v56 = vadd.f32 %v2149_v25, %v698_v53  ;;  %v2184_v21 = vadd.f32 %v2149_v25, %v699_v60  ;;  %v2187_v32 = vadd.f32 %v2149_v25, %v700_v52  ;;  %v2190_v49 = vadd.f32 %v2149_v25, %v701_v5 }
 0x198   :  { %v2193_v13 = vadd.f32 %v2149_v25, %v702_v17  ;;  %v2196_v27 = vadd.f32 %v2149_v25, %v703_v18  ;;  %v2199_v4 = vadd.f32 %v2149_v25, %v704_v28  ;;  %v2202_v53 = vadd.f32 %v2149_v25, %v705_v31 }
 0x199   :  { %v2205_v60 = vadd.f32 %v2149_v25, %v706_v35  ;;  %v2208_v52 = vadd.f32 %v2149_v25, %v707_v39  ;;  %v2211_v5 = vadd.f32 %v2149_v25, %v708_v43  ;;  %v2214_v17 = vadd.f32 %v2149_v25, %v709_v47 }
 0x19a   :  { %v2217_v18 = vadd.f32 %v2149_v25, %v710_v51  ;;  %v2220_v28 = vadd.f32 %v2149_v25, %v711_v55  ;;  %v2223_v31 = vadd.f32 %v2149_v25, %v712_v59  ;;  %v2226_v35 = vadd.f32 %v2149_v25, %v713_v63 }
 0x19b   :  { %v2229_v39 = vadd.f32 %v2149_v25, %v714_v3  ;;  %v2232_v43 = vadd.f32 %v2149_v25, %v715_v7  ;;  %v2235_v47 = vadd.f32 %v2149_v25, %v716_v11  ;;  %v2238_v51 = vadd.f32 %v2149_v25, %v717_v16 }
 0x19c   :  { %v2241_v55 = vadd.f32 %v2149_v25, %v718_v26  ;;  %v2244_v59 = vadd.f32 %v2149_v25, %v719_v45  ;;  %v2247_v63 = vadd.f32 %v2149_v25, %v720_v1  ;;  %v2250_v3 = vadd.f32 %v2149_v25, %v721_v19 }
 0x19d   :  { %2794 = vst [vmem:[#allocation8_spill] sm:$0xff] %v2238_v51  ;;  %v2253_v7 = vadd.f32 %v2149_v25, %v722_v36  ;;  %v2256_v11 = vadd.f32 %v2149_v25, %v723_v61  ;;  %v2259_v16 = vadd.f32 %v2149_v25, %v724_v20  ;;  %v2262_v26 = vadd.f32 %v2149_v25, %v725_v44 }
 0x19e   :  { %2795 = vst [vmem:[#allocation2_spill] sm:$0xff] %v2247_v63  ;;  %v2265_v45 = vadd.f32 %v2149_v25, %v726_v23  ;;  %v2268_v1 = vadd.f32 %v2149_v25, %v727_v40  ;;  %v2271_v19 = vadd.f32 %v2149_v25, %v728_v15  ;;  %v2274_v36 = vadd.f32 %v2149_v25, %v729_v30 }
 0x19f   :  { %2796 = vst [vmem:[#allocation3_spill] sm:$0xff] %v2256_v11  ;;  %v2277_v61 = vadd.f32 %v2149_v25, %v730_v34  ;;  %v2280_v20 = vadd.f32 %v2149_v25, %v731_v38  ;;  %v2283_v44 = vadd.f32 %v2149_v25, %v732_v42  ;;  %v2286_v23 = vadd.f32 %v2149_v25, %v733_v46 }
 0x1a0   :  { %2797 = vst [vmem:[#allocation4_spill] sm:$0xff] %v2274_v36  ;;  %v2289_v40 = vadd.f32 %v2149_v25, %v734_v50  ;;  %v2292_v15 = vadd.f32 %v2149_v25, %v735_v54  ;;  %v2295_v30 = vadd.f32 %v2149_v25, %v736_v58  ;;  %v2298_v34 = vadd.f32 %v2149_v25, %v737_v62 }
 0x1a1   :  { %2798 = vst [vmem:[#allocation5_spill] sm:$0xff] %v2280_v20  ;;  %2799 = vst [vmem:[#allocation6_spill] sm:$0xff] %v2283_v44  ;;  %v2301_v38 = vadd.f32 %v2149_v25, %v738_v29  ;;  %v2304_v42 = vadd.f32 %v2149_v25, %v739_v2  ;;  %v2307_v46 = vadd.f32 %v2149_v25, %v740_v6  ;;  %vm800_vm2 = vcmp.ge.f32.partialorder %v2169_v37, 0.0 }
 0x1a2   :  { %2800 = vst [vmem:[#allocation7_spill] sm:$0xff] %v2286_v23  ;;  %2801 = vst [vmem:[#allocation9_spill] sm:$0xff] %v2289_v40  ;;  %v2310_v50 = vadd.f32 %v2149_v25, %v741_v10  ;;  %vm801_vm3 = vcmp.ge.f32.partialorder %v2172_v57, 0.0  ;;  %vm802_vm4 = vcmp.ge.f32.partialorder %v2175_v24, 0.0  ;;  %vm803_vm5 = vcmp.ge.f32.partialorder %v2178_v8, 0.0 }
 0x1a3   :  { %2802 = vst [vmem:[#allocation10_spill] sm:$0xff] %v2292_v15  ;;  %2803 = vst [vmem:[#allocation11_spill] sm:$0xff] %v2295_v30  ;;  %vm804_vm6 = vcmp.ge.f32.partialorder %v2181_v56, 0.0  ;;  %vm805_vm7 = vcmp.ge.f32.partialorder %v2184_v21, 0.0  ;;  %vm806_vm8 = vcmp.ge.f32.partialorder %v2187_v32, 0.0  ;;  %vm807_vm9 = vcmp.ge.f32.partialorder %v2190_v49, 0.0 }
 0x1a4   :  { %2804 = vst [vmem:[#allocation12_spill] sm:$0xff] %v2298_v34  ;;  %2805 = vst [vmem:[#allocation13_spill] sm:$0xff] %v2301_v38  ;;  %vm808_vm10 = vcmp.ge.f32.partialorder %v2193_v13, 0.0  ;;  %v2322_v54 = vadd.f32 %v2149_v25, %v742_v14  ;;  %vm809_vm11 = vcmp.ge.f32.partialorder %v2196_v27, 0.0  ;;  %v850_v58 = vmul.f32 0.2, %v2169_v37 }
 0x1a5   :  { %v851_v62 = vmul.f32 0.2, %v2172_v57  ;;  %v852_v9 = vmul.f32 0.2, %v2175_v24  ;;  %v2330_v29 = vadd.f32 %v2149_v25, %v2166_v22  ;;  %vm810_vm12 = vcmp.ge.f32.partialorder %v2199_v4, 0.0 }
 0x1a6   :  { %v853_v41 = vmul.f32 0.2, %v2178_v8  ;;  %v854_v2 = vmul.f32 0.2, %v2181_v56  ;;  %v855_v48 = vmul.f32 0.2, %v2184_v21  ;;  %v2343_v25 = vsel %vm800_vm2, %v2169_v37, %v850_v58 }
 0x1a7   :  { %2806 = vst [vmem:[#allocation14_spill] sm:$0xff] %v2330_v29  ;;  %vm811_vm13 = vcmp.ge.f32.partialorder %v2202_v53, 0.0  ;;  %v856_v6 = vmul.f32 0.2, %v2187_v32  ;;  %v857_v33 = vmul.f32 0.2, %v2190_v49  ;;  %v2358_v22 = vsel %vm801_vm3, %v2172_v57, %v851_v62 }
 0x1a8   :  { %v858_v10 = vmul.f32 0.2, %v2193_v13  ;;  %2807 = vst [vmem:[#allocation15_spill] sm:$0xff] %v2343_v25  ;;  %vm812_vm14 = vcmp.ge.f32.partialorder %v2205_v60, 0.0  ;;  %v2347_v0 = vmul.f32 0.2, %v2196_v27  ;;  %v2373_v29 = vsel %vm802_vm4, %v2175_v24, %v852_v9 }
 0x1a9   :  { %v2350_v14 = vmul.f32 0.2, %v2199_v4  ;;  %v2353_v12 = vmul.f32 0.2, %v2202_v53  ;;  %2808 = vst [vmem:[#allocation16_spill] sm:$0xff] %v2358_v22  ;;  %vm813_vm15 = vcmp.ge.f32.partialorder %v2208_v52, 0.0 }
 0x1aa   :  { %v2362_v37 = vmul.f32 0.2, %v2205_v60  ;;  %v2365_v58 = vmul.f32 0.2, %v2208_v52  ;;  %v2368_v25 = vmul.f32 0.2, %v2211_v5 }
 0x1ab   :  { %2810 = vst [vmem:[#allocation18_spill] sm:$0xff] %v2373_v29  ;;  %vm814_vm0 = vcmp.ge.f32.partialorder %v2211_v5, 0.0  ;;  %v2378_v57 = vmul.f32 0.2, %v2214_v17  ;;  %v2381_v62 = vmul.f32 0.2, %v2217_v18 }
 0x1ac   :  { %2809 = vst [vmem:[#allocation17_spill] sm:$0xff] %v2368_v25  ;;  %v2384_v22 = vmul.f32 0.2, %v2220_v28  ;;  %v2389_v25 = vsel %vm803_vm5, %v2178_v8, %v853_v41  ;;  %vm816_vm2 = vcmp.ge.f32.partialorder %v2217_v18, 0.0  ;;  %v2396_v24 = vmul.f32 0.2, %v2223_v31 }
 0x1ad   :  { %2811 = vst [vmem:[#allocation19_spill] sm:$0xff] %v2389_v25  ;;  %v2399_v9 = vmul.f32 0.2, %v2226_v35  ;;  %v2402_v29 = vmul.f32 0.2, %v2229_v39  ;;  %v2407_v8 = vsel %vm804_vm6, %v2181_v56, %v854_v2  ;;  %vm820_vm5 = vcmp.ge.f32.partialorder %v2229_v39, 0.0 }
 0x1ae   :  { %2813 = vst [vmem:[#allocation21_spill] sm:$0xff] %v2407_v8  ;;  %v2414_v41 = vmul.f32 0.2, %v2232_v43  ;;  %v2417_v25 = vmul.f32 0.2, %v2235_v47  ;;  %v2425_v56 = vsel %vm805_vm7, %v2184_v21, %v855_v48  ;;  %vm824_vm6 = vcmp.ge.f32.partialorder %v2241_v55, 0.0 }
 0x1af   :  { %2812 = vst [vmem:[#allocation20_spill] sm:$0xff] %v2402_v29  ;;  %v2420_v29 = vmul.f32 0.2, %v2238_v51  ;;  %2814 = vst [vmem:[#allocation22_spill] sm:$0xff] %v2425_v56  ;;  %v2432_v2 = vmul.f32 0.2, %v2241_v55  ;;  %v2443_v21 = vsel %vm806_vm8, %v2187_v32, %v856_v6 }
 0x1b0   :  { %v2435_v8 = vmul.f32 0.2, %v2244_v59  ;;  %v2438_v51 = vmul.f32 0.2, %v2247_v63  ;;  %2816 = vst [vmem:[#allocation24_spill] sm:$0xff] %v2443_v21  ;;  %vm831_vm1 = vcmp.ge.f32.partialorder %v2262_v26, 0.0 }
 0x1b1   :  { %v877_v48 = vmul.f32 0.2, %v2250_v3  ;;  %v878_v56 = vmul.f32 0.2, %v2253_v7  ;;  %v879_v63 = vmul.f32 0.2, %v2256_v11  ;;  %v2467_v11 = vsel %vm808_vm10, %v2193_v13, %v858_v10 }
 0x1b2   :  { %2815 = vst [vmem:[#allocation23_spill] sm:$0xff] %v2438_v51  ;;  %v2455_v51 = vsel %vm807_vm9, %v2190_v49, %v857_v33  ;;  %vm835_vm4 = vcmp.ge.f32.partialorder %v2274_v36, 0.0  ;;  %v880_v32 = vmul.f32 0.2, %v2259_v16  ;;  %v881_v6 = vmul.f32 0.2, %v2262_v26 }
 0x1b3   :  { %2817 = vst [vmem:[#allocation25_spill] sm:$0xff] %v2455_v51  ;;  %v882_v21 = vmul.f32 0.2, %v2265_v45  ;;  %2818 = vst [vmem:[#allocation26_spill] sm:$0xff] %v2467_v11  ;;  %vm836_vm9 = vcmp.ge.f32.partialorder %v2277_v61, 0.0  ;;  %v2480_v13 = vsel %vm809_vm11, %v2196_v27, %v2347_v0  ;;  %vm840_vm10 = vcmp.ge.f32.partialorder %v2289_v40, 0.0 }
 0x1b4   :  { %v883_v49 = vmul.f32 0.2, %v2268_v1  ;;  %v884_v33 = vmul.f32 0.2, %v2271_v19  ;;  %v885_v51 = vmul.f32 0.2, %v2274_v36  ;;  %v2493_v27 = vsel %vm810_vm12, %v2199_v4, %v2350_v14 }
 0x1b5   :  { %2819 = vst [vmem:[#allocation27_spill] sm:$0xff] %v2480_v13  ;;  %v886_v10 = vmul.f32 0.2, %v2277_v61  ;;  %v887_v11 = vmul.f32 0.2, %v2280_v20  ;;  %2820 = vst [vmem:[#allocation28_spill] sm:$0xff] %v2493_v27  ;;  %v2506_v4 = vsel %vm811_vm13, %v2202_v53, %v2353_v12 }
 0x1b6   :  { %v888_v36 = vmul.f32 0.2, %v2283_v44  ;;  %vm844_vm11 = vcmp.ge.f32.partialorder %v2301_v38, 0.0  ;;  %vm846_vm7 = vcmp.ge.f32.partialorder %v2307_v46, 0.0  ;;  %vm847_vm3 = vcmp.ge.f32.partialorder %v2310_v50, 0.0  ;;  %2821 = vst [vmem:[#allocation29_spill] sm:$0xff] %v2506_v4 }
 0x1b7   :  { %v889_v0 = vmul.f32 0.2, %v2286_v23  ;;  %v890_v13 = vmul.f32 0.2, %v2289_v40  ;;  %v891_v44 = vmul.f32 0.2, %v2292_v15  ;;  %v2517_v15 = vsel %vm812_vm14, %v2205_v60, %v2362_v37 }
 0x1b8   :  { %vm848_vm12 = vcmp.ge.f32.partialorder %v2322_v54, 0.0  ;;  %v2822_v14 = vld [vmem:[#allocation14_spill] sm:$0xff]  ;;  %v892_v27 = vmul.f32 0.2, %v2295_v30  ;;  %v893_v20 = vmul.f32 0.2, %v2298_v34  ;;  %v913_v4 = vsel %vm813_vm15, %v2208_v52, %v2365_v58 }
 0x1b9   :  { %vm849_vm8 = vcmp.ge.f32.partialorder %v2822_v14, 0.0  ;;  %v894_v23 = vmul.f32 0.2, %v2301_v38  ;;  %2823 = vst [vmem:[#allocation14_spill] sm:$0xff] %v2517_v15  ;;  %v895_v40 = vmul.f32 0.2, %v2304_v42  ;;  %v916_v15 = vsel %vm816_vm2, %v2217_v18, %v2381_v62 }
 0x1ba   :  { %v896_v53 = vmul.f32 0.2, %v2307_v46  ;;  %v897_v12 = vmul.f32 0.2, %v2310_v50  ;;  %v898_v34 = vmul.f32 0.2, %v2322_v54 }
 0x1bb   :  { %v899_v38 = vmul.f32 0.2, %v2822_v14  ;;  %v2824_v30 = vld [vmem:[#allocation17_spill] sm:$0xff]  ;;  %vm2825_vm13 = vcmp.ge.f32.partialorder %v2214_v17, 0.0  ;;  %vm2826_vm14 = vcmp.ge.f32.partialorder %v2220_v28, 0.0  ;;  %vm2827_vm15 = vcmp.ge.f32.partialorder %v2223_v31, 0.0 }
 0x1bc   :  { %v914_v60 = vsel %vm814_vm0, %v2211_v5, %v2824_v30  ;;  %v915_v37 = vsel %vm2825_vm13, %v2214_v17, %v2378_v57  ;;  %v917_v52 = vsel %vm2826_vm14, %v2220_v28, %v2384_v22  ;;  %v918_v5 = vsel %vm2827_vm15, %v2223_v31, %v2396_v24  ;;  %v2829_v30 = vld [vmem:[#allocation20_spill] sm:$0xff]  ;;  %v2835_v58 = vld [vmem:[#allocation23_spill] sm:$0xff]  ;;  %v2836_v57 = vld [vmem:[#allocation2_spill] sm:$0xff] }
 0x1bd   :  { %vm2828_vm0 = vcmp.ge.f32.partialorder %v2226_v35, 0.0  ;;  %v920_v18 = vsel %vm820_vm5, %v2229_v39, %v2829_v30  ;;  %vm2830_vm2 = vcmp.ge.f32.partialorder %v2232_v43, 0.0  ;;  %vm2831_vm13 = vcmp.ge.f32.partialorder %v2235_v47, 0.0  ;;  %v2832_v22 = vld [vmem:[#allocation8_spill] sm:$0xff]  ;;  %v2840_v62 = vld [vmem:[#allocation3_spill] sm:$0xff] }
 0x1be   :  { %v919_v17 = vsel %vm2828_vm0, %v2226_v35, %v2399_v9  ;;  %v921_v28 = vsel %vm2830_vm2, %v2232_v43, %v2414_v41  ;;  %v922_v31 = vsel %vm2831_vm13, %v2235_v47, %v2417_v25  ;;  %vm2833_vm14 = vcmp.ge.f32.partialorder %v2832_v22, 0.0  ;;  %v2846_v9 = vld [vmem:[#allocation4_spill] sm:$0xff]  ;;  %v2849_v41 = vld [vmem:[#allocation6_spill] sm:$0xff] }
 0x1bf   :  { %v923_v35 = vsel %vm2833_vm14, %v2832_v22, %v2420_v29  ;;  %v924_v39 = vsel %vm824_vm6, %v2241_v55, %v2432_v2  ;;  %vm2834_vm5 = vcmp.ge.f32.partialorder %v2244_v59, 0.0  ;;  %vm2837_vm15 = vcmp.ge.f32.partialorder %v2836_v57, 0.0  ;;  %v2853_v2 = vld [vmem:[#allocation9_spill] sm:$0xff] }
 0x1c0   :  { %v925_v43 = vsel %vm2834_vm5, %v2244_v59, %v2435_v8  ;;  %v926_v47 = vsel %vm2837_vm15, %v2836_v57, %v2835_v58  ;;  %vm2838_vm0 = vcmp.ge.f32.partialorder %v2250_v3, 0.0  ;;  %vm2839_vm2 = vcmp.ge.f32.partialorder %v2253_v7, 0.0  ;;  %v2847_v8 = vld [vmem:[#allocation5_spill] sm:$0xff]  ;;  %v2868_v58 = vld [vmem:[#allocation24_spill] sm:$0xff] }
 0x1c1   :  { %v927_v25 = vsel %vm2838_vm0, %v2250_v3, %v877_v48  ;;  %v928_v29 = vsel %vm2839_vm2, %v2253_v7, %v878_v56  ;;  %vm2841_vm6 = vcmp.ge.f32.partialorder %v2840_v62, 0.0  ;;  %vm2842_vm13 = vcmp.ge.f32.partialorder %v2259_v16, 0.0  ;;  %v2851_v56 = vld [vmem:[#allocation7_spill] sm:$0xff]  ;;  %v2866_v22 = vld [vmem:[#allocation21_spill] sm:$0xff] }
 0x1c2   :  { %v929_v55 = vsel %vm2841_vm6, %v2840_v62, %v879_v63  ;;  %v930_v59 = vsel %vm2842_vm13, %v2259_v16, %v880_v32  ;;  %v931_v24 = vsel %vm831_vm1, %v2262_v26, %v881_v6  ;;  %vm2843_vm14 = vcmp.ge.f32.partialorder %v2265_v45, 0.0  ;;  %v2856_v48 = vld [vmem:[#allocation11_spill] sm:$0xff]  ;;  %v2858_v32 = vld [vmem:[#allocation12_spill] sm:$0xff]  ;;  %v2860_v6 = vld [vmem:[#allocation13_spill] sm:$0xff] }
 0x1c3   :  { %v932_v3 = vsel %vm2843_vm14, %v2265_v45, %v882_v21  ;;  %vm2844_vm5 = vcmp.ge.f32.partialorder %v2268_v1, 0.0  ;;  %vm2845_vm15 = vcmp.ge.f32.partialorder %v2271_v19, 0.0  ;;  %v935_v16 = vsel %vm835_vm4, %v2846_v9, %v885_v51  ;;  %v2854_v21 = vld [vmem:[#allocation10_spill] sm:$0xff]  ;;  %v2869_v57 = vld [vmem:[#allocation25_spill] sm:$0xff]  ;;  %v2871_v62 = vld [vmem:[#allocation27_spill] sm:$0xff] }
 0x1c4   :  { %v933_v7 = vsel %vm2844_vm5, %v2268_v1, %v883_v49  ;;  %v934_v63 = vsel %vm2845_vm15, %v2271_v19, %v884_v33  ;;  %v936_v26 = vsel %vm836_vm9, %v2277_v61, %v886_v10  ;;  %vm2848_vm1 = vcmp.ge.f32.partialorder %v2847_v8, 0.0  ;;  %v2862_v10 = vld [vmem:[#allocation15_spill] sm:$0xff] }
 0x1c5   :  { %v937_v45 = vsel %vm2848_vm1, %v2847_v8, %v887_v11  ;;  %vm2850_vm0 = vcmp.ge.f32.partialorder %v2849_v41, 0.0  ;;  %vm2852_vm2 = vcmp.ge.f32.partialorder %v2851_v56, 0.0  ;;  %v940_v51 = vsel %vm840_vm10, %v2853_v2, %v890_v13 }
 0x1c6   :  { %v938_v1 = vsel %vm2850_vm0, %v2849_v41, %v888_v36  ;;  %v939_v19 = vsel %vm2852_vm2, %v2851_v56, %v889_v0  ;;  %vm2855_vm4 = vcmp.ge.f32.partialorder %v2854_v21, 0.0  ;;  %vm2857_vm9 = vcmp.ge.f32.partialorder %v2856_v48, 0.0 }
 0x1c7   :  { %v941_v61 = vsel %vm2855_vm4, %v2854_v21, %v891_v44  ;;  %v942_v11 = vsel %vm2857_vm9, %v2856_v48, %v892_v27  ;;  %vm2859_vm6 = vcmp.ge.f32.partialorder %v2858_v32, 0.0  ;;  %v944_v49 = vsel %vm844_vm11, %v2860_v6, %v894_v23  ;;  %v2863_v27 = vld [vmem:[#allocation16_spill] sm:$0xff] }
 0x1c8   :  { %v943_v36 = vsel %vm2859_vm6, %v2858_v32, %v893_v20  ;;  %vm2861_vm13 = vcmp.ge.f32.partialorder %v2304_v42, 0.0  ;;  %v946_v44 = vsel %vm846_vm7, %v2307_v46, %v896_v53  ;;  %v947_v13 = vsel %vm847_vm3, %v2310_v50, %v897_v12  ;;  %v2867_v46 = vld [vmem:[#allocation22_spill] sm:$0xff] }
 0x1c9   :  { %v945_v33 = vsel %vm2861_vm13, %v2304_v42, %v895_v40  ;;  %v948_v20 = vsel %vm848_vm12, %v2322_v54, %v898_v34  ;;  %v949_v23 = vsel %vm849_vm8, %v2822_v14, %v899_v38  ;;  %v1359_v0 = vpack.c.bf16 %v2863_v27, %v2862_v10  ;;  %v2864_v40 = vld [vmem:[#allocation18_spill] sm:$0xff]  ;;  %v2865_v42 = vld [vmem:[#allocation19_spill] sm:$0xff]  ;;  %v2872_v34 = vld [vmem:[#allocation28_spill] sm:$0xff] }
 0x1ca   :  { %v1364_v30 = vpack.c.bf16 %v2865_v42, %v2864_v40  ;;  %v1369_v53 = vpack.c.bf16 %v2867_v46, %v2866_v22  ;;  %v1374_v50 = vpack.c.bf16 %v2869_v57, %v2868_v58  ;;  %v2870_v12 = vld [vmem:[#allocation26_spill] sm:$0xff]  ;;  %v2873_v54 = vld [vmem:[#allocation29_spill] sm:$0xff]  ;;  %v1394_v41 = vpack.c.bf16 %v915_v37, %v914_v60 }
 0x1cb   :  { %v1379_v9 = vpack.c.bf16 %v2871_v62, %v2870_v12  ;;  %v1384_v8 = vpack.c.bf16 %v2873_v54, %v2872_v34  ;;  %1360 = vst [vmem:[%s2741_s4] sm:$0xff] %v1359_v0   ;;  %v2874_v38 = vld [vmem:[#allocation14_spill] sm:$0xff]  ;;  %v1399_v56 = vpack.c.bf16 %v917_v52, %v916_v15  ;;  %v1404_v2 = vpack.c.bf16 %v919_v17, %v918_v5 }
 0x1cc   :  { %1481 = vst [vmem:[%s2741_s4 + $0x8] sm:$0xff] %v1364_v30   ;;  %v1389_v14 = vpack.c.bf16 %v913_v4, %v2874_v38  ;;  %1482 = vst [vmem:[%s2741_s4 + $0x10] sm:$0xff] %v1369_v53   ;;  %v1409_v4 = vpack.c.bf16 %v921_v28, %v920_v18  ;;  %v1414_v60 = vpack.c.bf16 %v923_v35, %v922_v31 }
 0x1cd   :  { %1483 = vst [vmem:[%s2741_s4 + $0x18] sm:$0xff] %v1374_v50   ;;  %1484 = vst [vmem:[%s2741_s4 + $0x20] sm:$0xff] %v1379_v9   ;;  %v1419_v15 = vpack.c.bf16 %v925_v43, %v924_v39  ;;  %v1424_v37 = vpack.c.bf16 %v927_v25, %v926_v47  ;;  %v1429_v52 = vpack.c.bf16 %v929_v55, %v928_v29 }
 0x1ce   :  { %1485 = vst [vmem:[%s2741_s4 + $0x28] sm:$0xff] %v1384_v8   ;;  %1486 = vst [vmem:[%s2741_s4 + $0x30] sm:$0xff] %v1389_v14   ;;  %v1434_v5 = vpack.c.bf16 %v931_v24, %v930_v59  ;;  %v1439_v17 = vpack.c.bf16 %v933_v7, %v932_v3  ;;  %v1444_v18 = vpack.c.bf16 %v935_v16, %v934_v63 }
 0x1cf   :  { %1487 = vst [vmem:[%s2741_s4 + $0x38] sm:$0xff] %v1394_v41   ;;  %1488 = vst [vmem:[%s2741_s4 + $0x40] sm:$0xff] %v1399_v56   ;;  %v1449_v28 = vpack.c.bf16 %v937_v45, %v936_v26  ;;  %v1454_v31 = vpack.c.bf16 %v939_v19, %v938_v1  ;;  %v1459_v35 = vpack.c.bf16 %v941_v61, %v940_v51 }
 0x1d0   :  { %1489 = vst [vmem:[%s2741_s4 + $0x48] sm:$0xff] %v1404_v2   ;;  %1490 = vst [vmem:[%s2741_s4 + $0x50] sm:$0xff] %v1409_v4   ;;  %v1464_v39 = vpack.c.bf16 %v943_v36, %v942_v11  ;;  %v1469_v43 = vpack.c.bf16 %v945_v33, %v944_v49  ;;  %v1474_v47 = vpack.c.bf16 %v947_v13, %v946_v44 }
 0x1d1   :  { %1491 = vst [vmem:[%s2741_s4 + $0x58] sm:$0xff] %v1414_v60   ;;  %1492 = vst [vmem:[%s2741_s4 + $0x60] sm:$0xff] %v1419_v15   ;;  %v1479_v25 = vpack.c.bf16 %v949_v23, %v948_v20 }
 0x1d2   :  { %1493 = vst [vmem:[%s2741_s4 + $0x68] sm:$0xff] %v1424_v37   ;;  %1494 = vst [vmem:[%s2741_s4 + $0x70] sm:$0xff] %v1429_v52  }
 0x1d3   :  { %1495 = vst [vmem:[%s2741_s4 + $0x78] sm:$0xff] %v1434_v5   ;;  %1496 = vst [vmem:[%s2741_s4 + $0x80] sm:$0xff] %v1439_v17  }
 0x1d4   :  { %1497 = vst [vmem:[%s2741_s4 + $0x88] sm:$0xff] %v1444_v18   ;;  %1498 = vst [vmem:[%s2741_s4 + $0x90] sm:$0xff] %v1449_v28  }
 0x1d5   :  { %1499 = vst [vmem:[%s2741_s4 + $0x98] sm:$0xff] %v1454_v31   ;;  %1500 = vst [vmem:[%s2741_s4 + $0xa0] sm:$0xff] %v1459_v35  }
 0x1d6   :  { %1501 = vst [vmem:[%s2741_s4 + $0xa8] sm:$0xff] %v1464_v39   ;;  %1502 = vst [vmem:[%s2741_s4 + $0xb0] sm:$0xff] %v1469_v43  }
 0x1d7   :  { %1503 = vst [vmem:[%s2741_s4 + $0xb8] sm:$0xff] %v1474_v47   ;;  %1504 = vst [vmem:[%s2741_s4 + $0xc0] sm:$0xff] %v1479_v25  }

// kernel: discriminator_forward.5
= control target key start
LH: loop header
LB: loop body
LE: loop exit
PB: predicated region body
PF: predicated region fallthrough
CT: control target
= control target key end

     0   :  { %s2512_s1 = inlined_call_operand.vmem [shape: bf16[1024,128], index: 1, kind: input, shape index: {}]   ;;  %s2513_s0 = inlined_call_operand.vmem [shape: bf16[112,1024], index: 0, kind: input, shape index: {}]   ;;  %s2514_s2 = inlined_call_operand.vmem [shape: f32[1,128], index: 2, kind: input, shape index: {}]   ;;  %s2515_s3 = inlined_call_operand.vmem [shape: f32[1,128], index: 3, kind: input, shape index: {}]   ;;  %s2516_s4 = inlined_call_operand.vmem [shape: bf16[112,128], index: 4, kind: output, shape index: {}]  }
   0x1   :  { %v1861_v0 = vld [vmem:[%s2512_s1 + $0x78] sm:$0xff]   ;;  %v1865_v4 = vld [vmem:[%s2512_s1 + $0x70] sm:$0xff]   ;;  %v1869_v8 = vld [vmem:[%s2512_s1 + $0x68] sm:$0xff]  }
   0x2   :  { %v1862_v1 = vld [vmem:[%s2512_s1 + $0xf8] sm:$0xff]   ;;  %1629 = vmatprep.subr.bf16.mxu0 %v1861_v0  ;;  %v1866_v5 = vld [vmem:[%s2512_s1 + $0xf0] sm:$0xff]   ;;  %v1870_v9 = vld [vmem:[%s2512_s1 + $0xe8] sm:$0xff]  }
   0x3   :  { %v1863_v2 = vld [vmem:[%s2512_s1 + $0x38] sm:$0xff]   ;;  %1687 = vmatprep.subr.bf16.mxu1 %v1862_v1  ;;  %v1867_v6 = vld [vmem:[%s2512_s1 + $0x30] sm:$0xff]   ;;  %v1871_v10 = vld [vmem:[%s2512_s1 + $0x28] sm:$0xff]  }
   0x4   :  { %v1864_v3 = vld [vmem:[%s2512_s1 + $0xb8] sm:$0xff]   ;;  %1630 = vmatpush3.bf16.msra.mxu0 %v1863_v2  ;;  %v1868_v7 = vld [vmem:[%s2512_s1 + $0xb0] sm:$0xff]   ;;  %v1872_v11 = vld [vmem:[%s2512_s1 + $0xa8] sm:$0xff]  }
   0x5   :  { %1688 = vmatpush3.bf16.msra.mxu1 %v1864_v3  ;;  %1631 = vmatprep.subr.bf16.mxu0 %v1865_v4  ;;  %v1873_v12 = vld [vmem:[%s2512_s1 + $0x60] sm:$0xff]   ;;  %v1877_v16 = vld [vmem:[%s2512_s1 + $0x58] sm:$0xff]   ;;  %v1881_v20 = vld [vmem:[%s2512_s1 + $0x50] sm:$0xff]  }
   0x6   :  { %1689 = vmatprep.subr.bf16.mxu1 %v1866_v5  ;;  %v1874_v13 = vld [vmem:[%s2512_s1 + $0xe0] sm:$0xff]   ;;  %v1878_v17 = vld [vmem:[%s2512_s1 + $0xd8] sm:$0xff]   ;;  %v1882_v21 = vld [vmem:[%s2512_s1 + $0xd0] sm:$0xff]  }
   0x7   :  { %v1875_v14 = vld [vmem:[%s2512_s1 + $0x20] sm:$0xff]   ;;  %v1879_v18 = vld [vmem:[%s2512_s1 + $0x18] sm:$0xff]   ;;  %v1883_v22 = vld [vmem:[%s2512_s1 + $0x10] sm:$0xff]  }
   0x8   :  { %1632 = vmatpush3.bf16.msra.mxu0 %v1867_v6  ;;  %v1876_v15 = vld [vmem:[%s2512_s1 + $0xa0] sm:$0xff]   ;;  %v1880_v19 = vld [vmem:[%s2512_s1 + $0x98] sm:$0xff]   ;;  %v1884_v23 = vld [vmem:[%s2512_s1 + $0x90] sm:$0xff]  }
   0x9   :  { %1690 = vmatpush3.bf16.msra.mxu1 %v1868_v7  ;;  %1633 = vmatprep.subr.bf16.mxu0 %v1869_v8  ;;  %v1885_v24 = vld [vmem:[%s2512_s1 + $0x48] sm:$0xff]   ;;  %v1889_v28 = vld [vmem:[%s2512_s1 + $0x40] sm:$0xff]   ;;  %v1893_v40 = vld [vmem:[%s2512_s1 + $0x178] sm:$0xff]  }
   0xa   :  { %1691 = vmatprep.subr.bf16.mxu1 %v1870_v9  ;;  %v1886_v25 = vld [vmem:[%s2512_s1 + $0xc8] sm:$0xff]   ;;  %v1890_v29 = vld [vmem:[%s2512_s1 + $0xc0] sm:$0xff]   ;;  %v1894_v41 = vld [vmem:[%s2512_s1 + $0x138] sm:$0xff]  }
   0xb   :  { %v1887_v26 = vld [vmem:[%s2512_s1 + $0x8] sm:$0xff]   ;;  %v1891_v30 = vld [vmem:[%s2512_s1] sm:$0xff]   ;;  %v1895_v42 = vld [vmem:[%s2512_s1 + $0x1f8] sm:$0xff]  }
   0xc   :  { %1634 = vmatpush3.bf16.msra.mxu0 %v1871_v10  ;;  %v1888_v27 = vld [vmem:[%s2512_s1 + $0x88] sm:$0xff]   ;;  %v1892_v31 = vld [vmem:[%s2512_s1 + $0x80] sm:$0xff]   ;;  %v1896_v43 = vld [vmem:[%s2512_s1 + $0x1b8] sm:$0xff]  }
   0xd   :  { %1692 = vmatpush3.bf16.msra.mxu1 %v1872_v11  ;;  %1635 = vmatprep.subr.bf16.mxu0 %v1873_v12  ;;  %v18_v32 = vld [vmem:[%s2513_s0] sm:$0xff]  ;;  %v19_v34 = vld [vmem:[%s2513_s0 + $0x8] sm:$0xff]  ;;  %v1897_v50 = vld [vmem:[%s2512_s1 + $0x170] sm:$0xff]  }
   0xe   :  { %1693 = vmatprep.subr.bf16.mxu1 %v1874_v13  ;;  %v22_v33 = vld [vmem:[%s2513_s0 + $0x20] sm:$0xff]  ;;  %v23_v37 = vld [vmem:[%s2513_s0 + $0x28] sm:$0xff]  ;;  %v1898_v52 = vld [vmem:[%s2512_s1 + $0x130] sm:$0xff]  }
   0xf   :  { %v1440_v35 = vcombine.low %v18_v32, %v22_v33  ;;  %v1441_v36 = vcombine.high %v18_v32, %v22_v33  ;;  %v1442_v38 = vcombine.low %v19_v34, %v23_v37  ;;  %v1443_v39 = vcombine.high %v19_v34, %v23_v37  ;;  %v26_v44 = vld [vmem:[%s2513_s0 + $0x40] sm:$0xff]  ;;  %v27_v47 = vld [vmem:[%s2513_s0 + $0x48] sm:$0xff]  ;;  %v1899_v54 = vld [vmem:[%s2512_s1 + $0x1f0] sm:$0xff]  }
  0x10   :  { %1636 = vmatpush3.bf16.msra.mxu0 %v1875_v14  ;;  %v30_v45 = vld [vmem:[%s2513_s0 + $0x60] sm:$0xff]  ;;  %v31_v48 = vld [vmem:[%s2513_s0 + $0x68] sm:$0xff]  ;;  %v1900_v55 = vld [vmem:[%s2512_s1 + $0x1b0] sm:$0xff]  }
  0x11   :  { %1694 = vmatpush3.bf16.msra.mxu1 %v1876_v15  ;;  %1637 = vmatprep.subr.bf16.mxu0 %v1877_v16  ;;  %v1449_v46 = vcombine.high %v26_v44, %v30_v45  ;;  %v1451_v49 = vcombine.high %v27_v47, %v31_v48  ;;  %v1448_v51 = vcombine.low %v26_v44, %v30_v45  ;;  %v1901_v56 = vld [vmem:[%s2512_s1 + $0x168] sm:$0xff]   ;;  %v34_v57 = vld [vmem:[%s2513_s0 + $0x80] sm:$0xff]  ;;  %v1909_v14 = vld [vmem:[%s2512_s1 + $0x158] sm:$0xff]  }
  0x12   :  { %1695 = vmatprep.subr.bf16.mxu1 %v1878_v17  ;;  %898 = vmatprep.mubr.bf16.mxu0 %v1441_v36  ;;  %v1450_v53 = vcombine.low %v27_v47, %v31_v48  ;;  %v38_v58 = vld [vmem:[%s2513_s0 + $0xa0] sm:$0xff]  ;;  %v35_v59 = vld [vmem:[%s2513_s0 + $0x88] sm:$0xff]  ;;  %v1910_v15 = vld [vmem:[%s2512_s1 + $0x118] sm:$0xff]  }
  0x13   :  { %987 = vmatprep.mubr.bf16.mxu1 %v1443_v39  ;;  %v39_v60 = vld [vmem:[%s2513_s0 + $0xa8] sm:$0xff]  ;;  %v1457_v61 = vcombine.high %v34_v57, %v38_v58  ;;  %v1456_v2 = vcombine.low %v34_v57, %v38_v58  ;;  %v1905_v3 = vld [vmem:[%s2512_s1 + $0x160] sm:$0xff]   ;;  %v1911_v17 = vld [vmem:[%s2512_s1 + $0x1d8] sm:$0xff]  }
  0x14   :  { %1638 = vmatpush3.bf16.msra.mxu0 %v1879_v18  ;;  %v1459_v62 = vcombine.high %v35_v59, %v39_v60  ;;  %v1902_v63 = vld [vmem:[%s2512_s1 + $0x128] sm:$0xff]   ;;  %v1458_v4 = vcombine.low %v35_v59, %v39_v60  ;;  %v1906_v5 = vld [vmem:[%s2512_s1 + $0x120] sm:$0xff]   ;;  %v25_v57 = vld [vmem:[%s2513_s0 + $0x38] sm:$0xff] }
  0x15   :  { %1696 = vmatpush3.bf16.msra.mxu1 %v1880_v19  ;;  %1639 = vmatprep.subr.bf16.mxu0 %v1881_v20  ;;  %v1903_v0 = vld [vmem:[%s2512_s1 + $0x1e8] sm:$0xff]   ;;  %v42_v6 = vld [vmem:[%s2513_s0 + $0xc0] sm:$0xff] }
  0x16   :  { %1697 = vmatprep.subr.bf16.mxu1 %v1882_v21  ;;  %v1904_v1 = vld [vmem:[%s2512_s1 + $0x1a8] sm:$0xff]   ;;  %v46_v7 = vld [vmem:[%s2513_s0 + $0xe0] sm:$0xff] }
  0x17   :  { %v43_v8 = vld [vmem:[%s2513_s0 + $0xc8] sm:$0xff]  ;;  %v1465_v9 = vcombine.high %v42_v6, %v46_v7  ;;  %v1907_v12 = vld [vmem:[%s2512_s1 + $0x1e0] sm:$0xff]   ;;  %v1464_v16 = vcombine.low %v42_v6, %v46_v7  ;;  %v36_v6 = vld [vmem:[%s2513_s0 + $0x90] sm:$0xff] }
  0x18   :  { %1640 = vmatpush3.bf16.msra.mxu0 %v1883_v22  ;;  %v47_v10 = vld [vmem:[%s2513_s0 + $0xe8] sm:$0xff]  ;;  %v1908_v13 = vld [vmem:[%s2512_s1 + $0x1a0] sm:$0xff]   ;;  %v40_v7 = vld [vmem:[%s2513_s0 + $0xb0] sm:$0xff] }
  0x19   :  { %1698 = vmatpush3.bf16.msra.mxu1 %v1884_v23  ;;  %1641 = vmatprep.subr.bf16.mxu0 %v1885_v24  ;;  %v1467_v11 = vcombine.high %v43_v8, %v47_v10  ;;  %v50_v18 = vld [vmem:[%s2513_s0 + $0x100] sm:$0xff]  ;;  %v1466_v20 = vcombine.low %v43_v8, %v47_v10  ;;  %v51_v22 = vld [vmem:[%s2513_s0 + $0x108] sm:$0xff]  ;;  %v37_v8 = vld [vmem:[%s2513_s0 + $0x98] sm:$0xff] }
  0x1a   :  { %1699 = vmatprep.subr.bf16.mxu1 %v1886_v25  ;;  %v54_v19 = vld [vmem:[%s2513_s0 + $0x120] sm:$0xff]  ;;  %v55_v23 = vld [vmem:[%s2513_s0 + $0x128] sm:$0xff]  ;;  %v1912_v25 = vld [vmem:[%s2512_s1 + $0x198] sm:$0xff]  }
  0x1b   :  { %v1473_v21 = vcombine.high %v50_v18, %v54_v19  ;;  %v1475_v24 = vcombine.high %v51_v22, %v55_v23  ;;  %v59_v32 = vld [vmem:[%s2513_s0 + $0x148] sm:$0xff]  ;;  %v1472_v34 = vcombine.low %v50_v18, %v54_v19  ;;  %v1474_v36 = vcombine.low %v51_v22, %v55_v23  ;;  %v1922_v47 = vld [vmem:[%s2512_s1 + $0x100] sm:$0xff]   ;;  %v52_v22 = vld [vmem:[%s2513_s0 + $0x110] sm:$0xff] }
  0x1c   :  { %1642 = vmatpush3.bf16.msra.mxu0 %v1887_v26  ;;  %v1913_v26 = vld [vmem:[%s2512_s1 + $0x150] sm:$0xff]   ;;  %v63_v33 = vld [vmem:[%s2513_s0 + $0x168] sm:$0xff]  ;;  %v1460_v18 = vcombine.low %v36_v6, %v40_v7 }
  0x1d   :  { %1700 = vmatpush3.bf16.msra.mxu1 %v1888_v27  ;;  %1643 = vmatprep.subr.bf16.mxu0 %v1889_v28  ;;  %v1914_v27 = vld [vmem:[%s2512_s1 + $0x110] sm:$0xff]   ;;  %v1483_v39 = vcombine.high %v59_v32, %v63_v33  ;;  %v67_v44 = vld [vmem:[%s2513_s0 + $0x188] sm:$0xff] }
  0x1e   :  { %1701 = vmatprep.subr.bf16.mxu1 %v1890_v29  ;;  %v1915_v28 = vld [vmem:[%s2512_s1 + $0x1d0] sm:$0xff]   ;;  %v71_v45 = vld [vmem:[%s2513_s0 + $0x1a8] sm:$0xff] }
  0x1f   :  { %v1916_v29 = vld [vmem:[%s2512_s1 + $0x190] sm:$0xff]   ;;  %v1490_v59 = vcombine.low %v67_v44, %v71_v45 }
  0x20   :  { %1644 = vmatpush3.bf16.msra.mxu0 %v1891_v30  ;;  %v58_v30 = vld [vmem:[%s2513_s0 + $0x140] sm:$0xff]  ;;  %v56_v23 = vld [vmem:[%s2513_s0 + $0x130] sm:$0xff] }
  0x21   :  { %1702 = vmatpush3.bf16.msra.mxu1 %v1892_v31  ;;  %1745 = vmatprep.subr.bf16.mxu0 %v1893_v40  ;;  %v62_v31 = vld [vmem:[%s2513_s0 + $0x160] sm:$0xff]  ;;  %v1919_v40 = vld [vmem:[%s2512_s1 + $0x1c8] sm:$0xff]  }
  0x22   :  { %1803 = vmatprep.subr.bf16.mxu1 %v1895_v42  ;;  %v1481_v37 = vcombine.high %v58_v30, %v62_v31  ;;  %v66_v42 = vld [vmem:[%s2513_s0 + $0x180] sm:$0xff]  ;;  %v1480_v48 = vcombine.low %v58_v30, %v62_v31  ;;  %v60_v30 = vld [vmem:[%s2513_s0 + $0x150] sm:$0xff] }
  0x23   :  { %899 = vmatmul.mubr.bf16.vlgmr.msra.gmra.mxu0 %v1440_v35  ;;  %v1917_v35 = vld [vmem:[%s2512_s1 + $0x148] sm:$0xff]   ;;  %v64_v31 = vld [vmem:[%s2513_s0 + $0x170] sm:$0xff] }
  0x24   :  { %988 = vmatmul.mubr.bf16.vlgmr.msra.gmra.mxu1 %v1442_v38  ;;  %1746 = vmatpush3.bf16.msra.mxu0 %v1894_v41  ;;  %v1918_v38 = vld [vmem:[%s2512_s1 + $0x108] sm:$0xff]  }
  0x25   :  { %1804 = vmatpush3.bf16.msra.mxu1 %v1896_v43  ;;  %906 = vmatprep.mubr.bf16.mxu0 %v1449_v46  ;;  %v1920_v41 = vld [vmem:[%s2512_s1 + $0x188] sm:$0xff]   ;;  %v70_v43 = vld [vmem:[%s2513_s0 + $0x1a0] sm:$0xff] }
  0x26   :  { %995 = vmatprep.mubr.bf16.mxu1 %v1451_v49  ;;  %1747 = vmatprep.subr.bf16.mxu0 %v1897_v50  ;;  %v1921_v46 = vld [vmem:[%s2512_s1 + $0x140] sm:$0xff]   ;;  %v1482_v50 = vcombine.low %v59_v32, %v63_v33  ;;  %v1488_v58 = vcombine.low %v66_v42, %v70_v43  ;;  %v61_v32 = vld [vmem:[%s2513_s0 + $0x158] sm:$0xff] }
  0x27   :  { %1805 = vmatprep.subr.bf16.mxu1 %v1899_v54  ;;  %v1923_v49 = vld [vmem:[%s2512_s1 + $0x1c0] sm:$0xff]   ;;  %v20_v54 = vld [vmem:[%s2513_s0 + $0x10] sm:$0xff]  ;;  %v65_v33 = vld [vmem:[%s2513_s0 + $0x178] sm:$0xff] }
  0x28   :  { %1748 = vmatpush3.bf16.msra.mxu0 %v1898_v52  ;;  %v1924_v52 = vld [vmem:[%s2512_s1 + $0x180] sm:$0xff]  }
  0x29   :  { %1806 = vmatpush3.bf16.msra.mxu1 %v1900_v55  ;;  %1749 = vmatprep.subr.bf16.mxu0 %v1901_v56  ;;  %v24_v55 = vld [vmem:[%s2513_s0 + $0x30] sm:$0xff]  ;;  %v21_v56 = vld [vmem:[%s2513_s0 + $0x18] sm:$0xff] }
  0x2a   :  { %1807 = vmatprep.subr.bf16.mxu1 %v1903_v0  ;;  %v1445_v60 = vcombine.high %v20_v54, %v24_v55  ;;  %v29_v0 = vld [vmem:[%s2513_s0 + $0x58] sm:$0xff] }
  0x2b   :  { %907 = vmatmul.mubr.bf16.gmra.mxu0 %v1448_v51  ;;  %v1489_v51 = vcombine.high %v66_v42, %v70_v43  ;;  %v1484_v42 = vcombine.low %v60_v30, %v64_v31  ;;  %v1486_v43 = vcombine.low %v61_v32, %v65_v33 }
  0x2c   :  { %996 = vmatmul.mubr.bf16.gmra.mxu1 %v1450_v53  ;;  %914 = vmatprep.mubr.bf16.mxu0 %v1457_v61  ;;  %v1491_v53 = vcombine.high %v67_v44, %v71_v45  ;;  %v1447_v61 = vcombine.high %v21_v56, %v25_v57 }
  0x2d   :  { %1003 = vmatprep.mubr.bf16.mxu1 %v1459_v62  ;;  %1750 = vmatpush3.bf16.msra.mxu0 %v1902_v63  ;;  %v28_v62 = vld [vmem:[%s2513_s0 + $0x50] sm:$0xff] }
  0x2e   :  { %1808 = vmatpush3.bf16.msra.mxu1 %v1904_v1  ;;  %1751 = vmatprep.subr.bf16.mxu0 %v1905_v3  ;;  %v32_v63 = vld [vmem:[%s2513_s0 + $0x70] sm:$0xff]  ;;  %v33_v1 = vld [vmem:[%s2513_s0 + $0x78] sm:$0xff]  ;;  %v1446_v3 = vcombine.low %v21_v56, %v25_v57 }
  0x2f   :  { %1809 = vmatprep.subr.bf16.mxu1 %v1907_v12  ;;  %v1452_v10 = vcombine.low %v28_v62, %v32_v63  ;;  %v1461_v12 = vcombine.high %v36_v6, %v40_v7 }
  0x31   :  { %1752 = vmatpush3.bf16.msra.mxu0 %v1906_v5  ;;  %v1455_v5 = vcombine.high %v29_v0, %v33_v1 }
  0x32   :  { %1810 = vmatpush3.bf16.msra.mxu1 %v1908_v13  ;;  %1753 = vmatprep.subr.bf16.mxu0 %v1909_v14  ;;  %v44_v14 = vld [vmem:[%s2513_s0 + $0xd0] sm:$0xff] }
  0x33   :  { %915 = vmatmul.mubr.bf16.gmra.mxu0 %v1456_v2  ;;  %1811 = vmatprep.subr.bf16.mxu1 %v1911_v17  ;;  %v1444_v2 = vcombine.low %v20_v54, %v24_v55  ;;  %v49_v17 = vld [vmem:[%s2513_s0 + $0xf8] sm:$0xff] }
  0x34   :  { %1004 = vmatmul.mubr.bf16.gmra.mxu1 %v1458_v4  ;;  %922 = vmatprep.mubr.bf16.mxu0 %v1465_v9  ;;  %v1453_v4 = vcombine.high %v28_v62, %v32_v63  ;;  %v41_v9 = vld [vmem:[%s2513_s0 + $0xb8] sm:$0xff] }
  0x35   :  { %1011 = vmatprep.mubr.bf16.mxu1 %v1467_v11  ;;  %1754 = vmatpush3.bf16.msra.mxu0 %v1910_v15  ;;  %v1454_v11 = vcombine.low %v29_v0, %v33_v1  ;;  %v1463_v13 = vcombine.high %v37_v8, %v41_v9  ;;  %v48_v15 = vld [vmem:[%s2513_s0 + $0xf0] sm:$0xff]  ;;  %v1462_v19 = vcombine.low %v37_v8, %v41_v9 }
  0x36   :  { %1812 = vmatpush3.bf16.msra.mxu1 %v1912_v25  ;;  %1755 = vmatprep.subr.bf16.mxu0 %v1913_v26  ;;  %v57_v25 = vld [vmem:[%s2513_s0 + $0x138] sm:$0xff]  ;;  %v1468_v26 = vcombine.low %v44_v14, %v48_v15 }
  0x37   :  { %1813 = vmatprep.subr.bf16.mxu1 %v1915_v28  ;;  %v1477_v28 = vcombine.high %v52_v22, %v56_v23 }
  0x39   :  { %1756 = vmatpush3.bf16.msra.mxu0 %v1914_v27 }
  0x3a   :  { %1814 = vmatpush3.bf16.msra.mxu1 %v1916_v29  ;;  %1757 = vmatprep.subr.bf16.mxu0 %v1917_v35 }
  0x3b   :  { %923 = vmatmul.mubr.bf16.gmra.mxu0 %v1464_v16  ;;  %1815 = vmatprep.subr.bf16.mxu1 %v1919_v40  ;;  %v45_v16 = vld [vmem:[%s2513_s0 + $0xd8] sm:$0xff] }
  0x3c   :  { %1012 = vmatmul.mubr.bf16.gmra.mxu1 %v1466_v20  ;;  %930 = vmatprep.mubr.bf16.mxu0 %v1473_v21  ;;  %v1469_v20 = vcombine.high %v44_v14, %v48_v15  ;;  %v1471_v21 = vcombine.high %v45_v16, %v49_v17  ;;  %v1470_v27 = vcombine.low %v45_v16, %v49_v17  ;;  %v69_v40 = vld [vmem:[%s2513_s0 + $0x198] sm:$0xff] }
  0x3d   :  { %1019 = vmatprep.mubr.bf16.mxu1 %v1475_v24  ;;  %1758 = vmatpush3.bf16.msra.mxu0 %v1918_v38  ;;  %v53_v24 = vld [vmem:[%s2513_s0 + $0x118] sm:$0xff]  ;;  %v68_v38 = vld [vmem:[%s2513_s0 + $0x190] sm:$0xff] }
  0x3e   :  { %1816 = vmatpush3.bf16.msra.mxu1 %v1920_v41  ;;  %1759 = vmatprep.subr.bf16.mxu0 %v1921_v46  ;;  %v1479_v29 = vcombine.high %v53_v24, %v57_v25  ;;  %v1478_v35 = vcombine.low %v53_v24, %v57_v25  ;;  %v73_v41 = vld [vmem:[%s2513_s0 + $0x1b8] sm:$0xff] }
  0x3f   :  { %1817 = vmatprep.subr.bf16.mxu1 %v1923_v49  ;;  %v1495_v45 = vcombine.high %v69_v40, %v73_v41 }
  0x41   :  { %1760 = vmatpush3.bf16.msra.mxu0 %v1922_v47  ;;  %v1494_v47 = vcombine.low %v69_v40, %v73_v41 }
  0x42   :  { %1818 = vmatpush3.bf16.msra.mxu1 %v1924_v52 }
  0x43   :  { %931 = vmatmul.mubr.bf16.gmra.mxu0 %v1472_v34  ;;  %v1476_v34 = vcombine.low %v52_v22, %v56_v23 }
  0x44   :  { %1020 = vmatmul.mubr.bf16.gmra.mxu1 %v1474_v36  ;;  %938 = vmatprep.mubr.bf16.mxu0 %v1481_v37  ;;  %v1485_v36 = vcombine.high %v60_v30, %v64_v31  ;;  %v1487_v37 = vcombine.high %v61_v32, %v65_v33 }
  0x45   :  { %1027 = vmatprep.mubr.bf16.mxu1 %v1483_v39  ;;  %v72_v39 = vld [vmem:[%s2513_s0 + $0x1b0] sm:$0xff] }
  0x46   :  { %v1493_v44 = vcombine.high %v68_v38, %v72_v39  ;;  %v1492_v46 = vcombine.low %v68_v38, %v72_v39 }
  0x4b   :  { %939 = vmatmul.mubr.bf16.gmra.mxu0 %v1480_v48 }
  0x4c   :  { %1028 = vmatmul.mubr.bf16.gmra.mxu1 %v1482_v50  ;;  %946 = vmatprep.mubr.bf16.mxu0 %v1489_v51 }
  0x4d   :  { %1035 = vmatprep.mubr.bf16.mxu1 %v1491_v53 }
  0x53   :  { %947 = vmatmul.mubr.bf16.gmra.mxu0 %v1488_v58 }
  0x54   :  { %1036 = vmatmul.mubr.bf16.gmra.mxu1 %v1490_v59  ;;  %1076 = vmatprep.mubr.bf16.mxu0 %v1445_v60 }
  0x55   :  { %1165 = vmatprep.mubr.bf16.mxu1 %v1447_v61 }
  0x5b   :  { %1077 = vmatmul.mubr.bf16.vlgmr.msra.gmra.mxu0 %v1444_v2 }
  0x5c   :  { %1166 = vmatmul.mubr.bf16.vlgmr.msra.gmra.mxu1 %v1446_v3  ;;  %1084 = vmatprep.mubr.bf16.mxu0 %v1453_v4 }
  0x5d   :  { %1173 = vmatprep.mubr.bf16.mxu1 %v1455_v5 }
  0x63   :  { %1085 = vmatmul.mubr.bf16.gmra.mxu0 %v1452_v10 }
  0x64   :  { %1174 = vmatmul.mubr.bf16.gmra.mxu1 %v1454_v11  ;;  %1092 = vmatprep.mubr.bf16.mxu0 %v1461_v12 }
  0x65   :  { %1181 = vmatprep.mubr.bf16.mxu1 %v1463_v13 }
  0x6b   :  { %1093 = vmatmul.mubr.bf16.gmra.mxu0 %v1460_v18 }
  0x6c   :  { %1182 = vmatmul.mubr.bf16.gmra.mxu1 %v1462_v19  ;;  %1100 = vmatprep.mubr.bf16.mxu0 %v1469_v20 }
  0x6d   :  { %1189 = vmatprep.mubr.bf16.mxu1 %v1471_v21 }
  0x73   :  { %1101 = vmatmul.mubr.bf16.gmra.mxu0 %v1468_v26 }
  0x74   :  { %1190 = vmatmul.mubr.bf16.gmra.mxu1 %v1470_v27  ;;  %1108 = vmatprep.mubr.bf16.mxu0 %v1477_v28 }
  0x75   :  { %1197 = vmatprep.mubr.bf16.mxu1 %v1479_v29 }
  0x7b   :  { %1109 = vmatmul.mubr.bf16.gmra.mxu0 %v1476_v34 }
  0x7c   :  { %1198 = vmatmul.mubr.bf16.gmra.mxu1 %v1478_v35  ;;  %1116 = vmatprep.mubr.bf16.mxu0 %v1485_v36 }
  0x7d   :  { %1205 = vmatprep.mubr.bf16.mxu1 %v1487_v37 }
  0x83   :  { %1117 = vmatmul.mubr.bf16.gmra.mxu0 %v1484_v42 }
  0x84   :  { %1206 = vmatmul.mubr.bf16.gmra.mxu1 %v1486_v43  ;;  %1124 = vmatprep.mubr.bf16.mxu0 %v1493_v44 }
  0x85   :  { %1213 = vmatprep.mubr.bf16.mxu1 %v1495_v45 }
  0x8b   :  { %1125 = vmatmul.mubr.bf16.gmra.mxu0 %v1492_v46 }
  0x8c   :  { %1214 = vmatmul.mubr.bf16.gmra.mxu1 %v1494_v47 }
  0xe3   :  { %v1645_v48 = vpop.f32.mrf.mxu0 }
  0xe4   :  { %v1703_v49 = vpop.f32.mrf.mxu1 }
  0xe5   :  { %v1646_v50 = vpop.f32.mrf.mxu0 }
  0xe6   :  { %v1647_v51 = vadd.f32 %v1646_v50, %v1645_v48  ;;  %v1704_v52 = vpop.f32.mrf.mxu1 }
  0xe7   :  { %v1705_v53 = vadd.f32 %v1704_v52, %v1703_v49  ;;  %v1648_v54 = vpop.f32.mrf.mxu0 }
  0xe8   :  { %v1706_v55 = vpop.f32.mrf.mxu1 }
  0xe9   :  { %v2312_v56 = vadd.f32 %v1705_v53, %v1647_v51  ;;  %v1649_v57 = vpop.f32.mrf.mxu0 }
  0xea   :  { %v1650_v58 = vadd.f32 %v1649_v57, %v1648_v54  ;;  %v1707_v59 = vpop.f32.mrf.mxu1 }
  0xeb   :  { %v1708_v60 = vadd.f32 %v1707_v59, %v1706_v55  ;;  %v1651_v61 = vpop.f32.mrf.mxu0 }
  0xec   :  { %v1709_v62 = vpop.f32.mrf.mxu1 }
  0xed   :  { %v2314_v63 = vadd.f32 %v1708_v60, %v1650_v58  ;;  %v1652_v0 = vpop.f32.mrf.mxu0 }
  0xee   :  { %v1653_v1 = vadd.f32 %v1652_v0, %v1651_v61  ;;  %v1710_v2 = vpop.f32.mrf.mxu1 }
  0xef   :  { %v1711_v3 = vadd.f32 %v1710_v2, %v1709_v62  ;;  %v1654_v4 = vpop.f32.mrf.mxu0 }
  0xf0   :  { %v1712_v5 = vpop.f32.mrf.mxu1 }
  0xf1   :  { %v2316_v6 = vadd.f32 %v1711_v3, %v1653_v1  ;;  %v1655_v7 = vpop.f32.mrf.mxu0 }
  0xf2   :  { %v1656_v8 = vadd.f32 %v1655_v7, %v1654_v4  ;;  %v1713_v9 = vpop.f32.mrf.mxu1 }
  0xf3   :  { %v1714_v10 = vadd.f32 %v1713_v9, %v1712_v5  ;;  %v1657_v11 = vpop.f32.mrf.mxu0 }
  0xf4   :  { %v1715_v12 = vpop.f32.mrf.mxu1 }
  0xf5   :  { %v2318_v13 = vadd.f32 %v1714_v10, %v1656_v8  ;;  %v1658_v14 = vpop.f32.mrf.mxu0 }
  0xf6   :  { %v1659_v15 = vadd.f32 %v1658_v14, %v1657_v11  ;;  %v1716_v16 = vpop.f32.mrf.mxu1 }
  0xf7   :  { %v1717_v17 = vadd.f32 %v1716_v16, %v1715_v12  ;;  %v1660_v18 = vpop.f32.mrf.mxu0 }
  0xf8   :  { %v1718_v19 = vpop.f32.mrf.mxu1 }
  0xf9   :  { %v2320_v20 = vadd.f32 %v1717_v17, %v1659_v15  ;;  %v1661_v21 = vpop.f32.mrf.mxu0 }
  0xfa   :  { %v1662_v22 = vadd.f32 %v1661_v21, %v1660_v18  ;;  %v1719_v23 = vpop.f32.mrf.mxu1 }
  0xfb   :  { %v1720_v24 = vadd.f32 %v1719_v23, %v1718_v19  ;;  %v1663_v25 = vpop.f32.mrf.mxu0 }
  0xfc   :  { %v1721_v26 = vpop.f32.mrf.mxu1 }
  0xfd   :  { %v2322_v27 = vadd.f32 %v1720_v24, %v1662_v22  ;;  %v1664_v28 = vpop.f32.mrf.mxu0 }
  0xfe   :  { %v1665_v29 = vadd.f32 %v1664_v28, %v1663_v25  ;;  %v1722_v30 = vpop.f32.mrf.mxu1 }
  0xff   :  { %v1723_v31 = vadd.f32 %v1722_v30, %v1721_v26  ;;  %v1666_v32 = vpop.f32.mrf.mxu0 }
 0x100   :  { %v1724_v33 = vpop.f32.mrf.mxu1 }
 0x101   :  { %v2324_v34 = vadd.f32 %v1723_v31, %v1665_v29  ;;  %v1667_v35 = vpop.f32.mrf.mxu0 }
 0x102   :  { %v1668_v36 = vadd.f32 %v1667_v35, %v1666_v32  ;;  %v1725_v37 = vpop.f32.mrf.mxu1 }
 0x103   :  { %v1726_v38 = vadd.f32 %v1725_v37, %v1724_v33  ;;  %v1669_v39 = vpop.f32.mrf.mxu0 }
 0x104   :  { %v1727_v40 = vpop.f32.mrf.mxu1 }
 0x105   :  { %v2326_v41 = vadd.f32 %v1726_v38, %v1668_v36  ;;  %v1670_v42 = vpop.f32.mrf.mxu0 }
 0x106   :  { %v1671_v43 = vadd.f32 %v1670_v42, %v1669_v39  ;;  %v1728_v44 = vpop.f32.mrf.mxu1 }
 0x107   :  { %v1729_v45 = vadd.f32 %v1728_v44, %v1727_v40  ;;  %v2328_v46 = vpop.f32.mrf.mxu0 }
 0x108   :  { %v2330_v47 = vpop.f32.mrf.mxu1 }
 0x109   :  { %v2332_v48 = vadd.f32 %v1729_v45, %v1671_v43  ;;  %v2334_v49 = vpop.f32.mrf.mxu0 }
 0x10a   :  { %v2336_v50 = vpop.f32.mrf.mxu1 }
 0x10b   :  { %v2338_v51 = vpop.f32.mrf.mxu0 }
 0x10c   :  { %v2340_v52 = vpop.f32.mrf.mxu1 }
 0x10d   :  { %v2342_v53 = vpop.f32.mrf.mxu0 }
 0x10e   :  { %v2344_v54 = vpop.f32.mrf.mxu1 }
 0x10f   :  { %v2346_v55 = vpop.f32.mrf.mxu0 }
 0x110   :  { %v2348_v57 = vpop.f32.mrf.mxu1 }
 0x111   :  { %v2350_v58 = vpop.f32.mrf.mxu0 }
 0x112   :  { %v2352_v59 = vpop.f32.mrf.mxu1 }
 0x113   :  { %v2354_v60 = vpop.f32.mrf.mxu0 }
 0x114   :  { %v2356_v61 = vpop.f32.mrf.mxu1 }
 0x115   :  { %v2358_v62 = vpop.f32.mrf.mxu0 }
 0x116   :  { %v2360_v0 = vpop.f32.mrf.mxu1 }
 0x117   :  { %v2362_v1 = vpop.f32.mrf.mxu0 }
 0x118   :  { %v2364_v2 = vpop.f32.mrf.mxu1 }
 0x119   :  { %v2366_v3 = vpop.f32.mrf.mxu0 }
 0x11a   :  { %v2368_v4 = vpop.f32.mrf.mxu1 }
 0x11b   :  { %v1761_v5 = vpop.f32.mrf.mxu0 }
 0x11c   :  { %v1819_v7 = vpop.f32.mrf.mxu1 }
 0x11d   :  { %v1762_v8 = vpop.f32.mrf.mxu0 }
 0x11e   :  { %v1820_v9 = vpop.f32.mrf.mxu1  ;;  %v1763_v12 = vadd.f32 %v1762_v8, %v1761_v5 }
 0x11f   :  { %v1764_v10 = vpop.f32.mrf.mxu0  ;;  %v1821_v26 = vadd.f32 %v1820_v9, %v1819_v7 }
 0x120   :  { %v1822_v11 = vpop.f32.mrf.mxu1  ;;  %v1079_v21 = vadd.f32 %v1763_v12, %v2312_v56 }
 0x121   :  { %v1765_v14 = vpop.f32.mrf.mxu0 }
 0x122   :  { %v1766_v15 = vadd.f32 %v1765_v14, %v1764_v10  ;;  %v1823_v16 = vpop.f32.mrf.mxu1  ;;  %v2375_v33 = vadd.f32 %v1821_v26, %v1079_v21 }
 0x123   :  { %v1767_v17 = vpop.f32.mrf.mxu0  ;;  %v1824_v22 = vadd.f32 %v1823_v16, %v1822_v11 }
 0x124   :  { %v1082_v18 = vadd.f32 %v1766_v15, %v2314_v63  ;;  %v1825_v19 = vpop.f32.mrf.mxu1 }
 0x125   :  { %v1768_v23 = vpop.f32.mrf.mxu0 }
 0x126   :  { %v1769_v24 = vadd.f32 %v1768_v23, %v1767_v17  ;;  %v1826_v25 = vpop.f32.mrf.mxu1  ;;  %v2372_v28 = vadd.f32 %v1824_v22, %v1082_v18 }
 0x127   :  { %v1770_v29 = vpop.f32.mrf.mxu0  ;;  %v1827_v31 = vadd.f32 %v1826_v25, %v1825_v19 }
 0x128   :  { %v1087_v30 = vadd.f32 %v1769_v24, %v2316_v6  ;;  %v1828_v32 = vpop.f32.mrf.mxu1  ;;  %v1243_v56 = vmul.f32 %v2372_v28, %v2372_v28  ;;  %v1242_v6 = vmul.f32 %v2375_v33, %v2375_v33  ;;  %v1222_v45 = vadd.f32 %v2372_v28, %v2375_v33 }
 0x129   :  { %v1771_v35 = vpop.f32.mrf.mxu0 }
 0x12a   :  { %v2377_v36 = vadd.f32 %v1827_v31, %v1087_v30  ;;  %v1772_v63 = vadd.f32 %v1771_v35, %v1770_v29  ;;  %v1829_v37 = vpop.f32.mrf.mxu1  ;;  %v1256_v9 = vadd.f32 %v1243_v56, %v1242_v6 }
 0x12b   :  { %v1773_v38 = vpop.f32.mrf.mxu0  ;;  %v1830_v40 = vadd.f32 %v1829_v37, %v1828_v32 }
 0x12c   :  { %v1090_v39 = vadd.f32 %v1772_v63, %v2318_v13  ;;  %v1831_v42 = vpop.f32.mrf.mxu1  ;;  %v1244_v43 = vmul.f32 %v2377_v36, %v2377_v36  ;;  %v1223_v13 = vadd.f32 %v1222_v45, %v2377_v36 }
 0x12d   :  { %v1774_v44 = vpop.f32.mrf.mxu0 }
 0x12e   :  { %v2388_v5 = vadd.f32 %v1830_v40, %v1090_v39  ;;  %v1775_v7 = vadd.f32 %v1774_v44, %v1773_v38  ;;  %v1832_v8 = vpop.f32.mrf.mxu1  ;;  %v1257_v16 = vadd.f32 %v1256_v9, %v1244_v43 }
 0x12f   :  { %v1776_v10 = vpop.f32.mrf.mxu0  ;;  %v1833_v14 = vadd.f32 %v1832_v8, %v1831_v42 }
 0x130   :  { %v1245_v11 = vmul.f32 %v2388_v5, %v2388_v5  ;;  %v1095_v12 = vadd.f32 %v1775_v7, %v2320_v20  ;;  %v1834_v15 = vpop.f32.mrf.mxu1  ;;  %v1224_v18 = vadd.f32 %v1223_v13, %v2388_v5 }
 0x131   :  { %v1777_v17 = vpop.f32.mrf.mxu0 }
 0x132   :  { %v2395_v19 = vadd.f32 %v1833_v14, %v1095_v12  ;;  %v1778_v21 = vadd.f32 %v1777_v17, %v1776_v10  ;;  %v1835_v22 = vpop.f32.mrf.mxu1  ;;  %v1258_v23 = vadd.f32 %v1257_v16, %v1245_v11  ;;  %v1732_v14 = vadd.f32 %v2336_v50, %v2330_v47 }
 0x133   :  { %v1779_v24 = vpop.f32.mrf.mxu0  ;;  %v1836_v20 = vadd.f32 %v1835_v22, %v1834_v15  ;;  %v1677_v47 = vadd.f32 %v2342_v53, %v2338_v51  ;;  %v1735_v50 = vadd.f32 %v2344_v54, %v2340_v52  ;;  %v1680_v51 = vadd.f32 %v2350_v58, %v2346_v55 }
 0x134   :  { %v1225_v25 = vadd.f32 %v1224_v18, %v2395_v19  ;;  %v1246_v26 = vmul.f32 %v2395_v19, %v2395_v19  ;;  %v1098_v29 = vadd.f32 %v1778_v21, %v2322_v27  ;;  %v1837_v30 = vpop.f32.mrf.mxu1  ;;  %v1738_v52 = vadd.f32 %v2352_v59, %v2348_v57 }
 0x135   :  { %v1780_v31 = vpop.f32.mrf.mxu0  ;;  %v1030_v54 = vadd.f32 %v1735_v50, %v1677_v47  ;;  %v1683_v57 = vadd.f32 %v2358_v62, %v2354_v60  ;;  %v1741_v59 = vadd.f32 %v2360_v0, %v2356_v61 }
 0x136   :  { %v1259_v32 = vadd.f32 %v1258_v23, %v1246_v26  ;;  %v2401_v35 = vadd.f32 %v1836_v20, %v1098_v29  ;;  %v1781_v63 = vadd.f32 %v1780_v31, %v1779_v24  ;;  %v1838_v37 = vpop.f32.mrf.mxu1 }
 0x137   :  { %v1782_v56 = vpop.f32.mrf.mxu0  ;;  %v1839_v42 = vadd.f32 %v1838_v37, %v1837_v30  ;;  %v1038_v60 = vadd.f32 %v1741_v59, %v1683_v57 }
 0x138   :  { %v1226_v38 = vadd.f32 %v1225_v25, %v2401_v35  ;;  %v1247_v39 = vmul.f32 %v2401_v35, %v2401_v35  ;;  %v1103_v40 = vadd.f32 %v1781_v63, %v2324_v34  ;;  %v1840_v6 = vpop.f32.mrf.mxu1  ;;  %v1674_v34 = vadd.f32 %v2334_v49, %v2328_v46 }
 0x139   :  { %v1783_v43 = vpop.f32.mrf.mxu0 }
 0x13a   :  { %v1260_v27 = vadd.f32 %v1259_v32, %v1247_v39  ;;  %v2407_v44 = vadd.f32 %v1839_v42, %v1103_v40  ;;  %v1784_v45 = vadd.f32 %v1783_v43, %v1782_v56  ;;  %v1841_v7 = vpop.f32.mrf.mxu1  ;;  %v1025_v46 = vadd.f32 %v1732_v14, %v1674_v34 }
 0x13b   :  { %v1785_v8 = vpop.f32.mrf.mxu0  ;;  %v1842_v11 = vadd.f32 %v1841_v7, %v1840_v6 }
 0x13c   :  { %v1227_v9 = vadd.f32 %v1226_v38, %v2407_v44  ;;  %v1248_v10 = vmul.f32 %v2407_v44, %v2407_v44  ;;  %v1106_v13 = vadd.f32 %v1784_v45, %v2326_v41  ;;  %v1843_v12 = vpop.f32.mrf.mxu1 }
 0x13d   :  { %v1786_v15 = vpop.f32.mrf.mxu0 }
 0x13e   :  { %v1261_v16 = vadd.f32 %v1260_v27, %v1248_v10  ;;  %v2417_v17 = vadd.f32 %v1842_v11, %v1106_v13  ;;  %v1787_v18 = vadd.f32 %v1786_v15, %v1785_v8  ;;  %v1844_v21 = vpop.f32.mrf.mxu1 }
 0x13f   :  { %v1788_v22 = vpop.f32.mrf.mxu0  ;;  %v1845_v25 = vadd.f32 %v1844_v21, %v1843_v12  ;;  %v1744_v21 = vadd.f32 %v2368_v4, %v2364_v2 }
 0x140   :  { %v1228_v23 = vadd.f32 %v1227_v9, %v2417_v17  ;;  %v1249_v41 = vmul.f32 %v2417_v17, %v2417_v17  ;;  %v1111_v24 = vadd.f32 %v1787_v18, %v2332_v48  ;;  %v1846_v26 = vpop.f32.mrf.mxu1  ;;  %v1033_v9 = vadd.f32 %v1738_v52, %v1680_v51 }
 0x141   :  { %v1789_v49 = vpop.f32.mrf.mxu0  ;;  %v1686_v18 = vadd.f32 %v2366_v3, %v2362_v1 }
 0x142   :  { %v1262_v29 = vadd.f32 %v1261_v16, %v1249_v41  ;;  %v2427_v20 = vadd.f32 %v1845_v25, %v1111_v24  ;;  %v1790_v30 = vadd.f32 %v1789_v49, %v1788_v22  ;;  %v1847_v31 = vpop.f32.mrf.mxu1 }
 0x143   :  { %v1791_v32 = vpop.f32.mrf.mxu0  ;;  %v1848_v56 = vadd.f32 %v1847_v31, %v1846_v26 }
 0x144   :  { %v1229_v63 = vadd.f32 %v1228_v23, %v2427_v20  ;;  %v1250_v48 = vmul.f32 %v2427_v20, %v2427_v20  ;;  %v1114_v37 = vadd.f32 %v1790_v30, %v1025_v46  ;;  %v1849_v38 = vpop.f32.mrf.mxu1  ;;  %v1041_v46 = vadd.f32 %v1744_v21, %v1686_v18 }
 0x145   :  { %v1792_v53 = vpop.f32.mrf.mxu0 }
 0x146   :  { %v1263_v39 = vadd.f32 %v1262_v29, %v1250_v48  ;;  %v2436_v40 = vadd.f32 %v1848_v56, %v1114_v37  ;;  %v1793_v42 = vadd.f32 %v1792_v53, %v1791_v32  ;;  %v1850_v6 = vpop.f32.mrf.mxu1 }
 0x147   :  { %v1794_v43 = vpop.f32.mrf.mxu0  ;;  %v1851_v55 = vadd.f32 %v1850_v6, %v1849_v38 }
 0x148   :  { %v1230_v27 = vadd.f32 %v1229_v63, %v2436_v40  ;;  %v1251_v45 = vmul.f32 %v2436_v40, %v2436_v40  ;;  %v1119_v7 = vadd.f32 %v1793_v42, %v1030_v54  ;;  %v1852_v8 = vpop.f32.mrf.mxu1 }
 0x149   :  { %v1795_v58 = vpop.f32.mrf.mxu0 }
 0x14a   :  { %v1264_v10 = vadd.f32 %v1263_v39, %v1251_v45  ;;  %v1796_v13 = vadd.f32 %v1795_v58, %v1794_v43  ;;  %v1853_v11 = vpop.f32.mrf.mxu1  ;;  %v2445_v12 = vadd.f32 %v1851_v55, %v1119_v7 }
 0x14b   :  { %v1797_v34 = vpop.f32.mrf.mxu0  ;;  %v1854_v15 = vadd.f32 %v1853_v11, %v1852_v8 }
 0x14c   :  { %v1122_v14 = vadd.f32 %v1796_v13, %v1033_v9  ;;  %v1855_v16 = vpop.f32.mrf.mxu1  ;;  %v1252_v23 = vmul.f32 %v2445_v12, %v2445_v12  ;;  %v1231_v1 = vadd.f32 %v1230_v27, %v2445_v12 }
 0x14d   :  { %v1798_v22 = vpop.f32.mrf.mxu0 }
 0x14e   :  { %v2451_v62 = vadd.f32 %v1854_v15, %v1122_v14  ;;  %v1799_v61 = vadd.f32 %v1798_v22, %v1797_v34  ;;  %v1856_v0 = vpop.f32.mrf.mxu1  ;;  %v1265_v50 = vadd.f32 %v1264_v10, %v1252_v23  ;;  %v1286_v34 = vlaneseq  ;;  %v1281_v15 = vld [vmem:[%s2514_s2] sm:$0x1] }
 0x14f   :  { %v1800_v41 = vpop.f32.mrf.mxu0  ;;  %v1857_v25 = vadd.f32 %v1856_v0, %v1855_v16  ;;  %v1283_v22 = vld [vmem:[%s2515_s3] sm:$0x1] }
 0x150   :  { %v1127_v24 = vadd.f32 %v1799_v61, %v1038_v60  ;;  %v1858_v26 = vpop.f32.mrf.mxu1  ;;  %v1253_v2 = vmul.f32 %v2451_v62, %v2451_v62  ;;  %v1232_v29 = vadd.f32 %v1231_v1, %v2451_v62  ;;  %v1287_v14 = vshrl.u32 %v1286_v34, 7 }
 0x151   :  { %v1801_v47 = vpop.f32.mrf.mxu0 }
 0x152   :  { %v1216_v3 = vadd.f32 %v1857_v25, %v1127_v24  ;;  %v1802_v4 = vadd.f32 %v1801_v47, %v1800_v41  ;;  %v1859_v49 = vpop.f32.mrf.mxu1  ;;  %v1266_v63 = vadd.f32 %v1265_v50, %v1253_v2  ;;  %v1288_v16 = vsub.s32 0, %v1287_v14 }
 0x153   :  { %v1860_v32 = vadd.f32 %v1859_v49, %v1858_v26 }
 0x154   :  { %v1254_v30 = vmul.f32 %v1216_v3, %v1216_v3  ;;  %v1130_v31 = vadd.f32 %v1802_v4, %v1041_v46  ;;  %v1233_v48 = vadd.f32 %v1232_v29, %v1216_v3 }
 0x156   :  { %v1219_v37 = vadd.f32 %v1860_v32, %v1130_v31  ;;  %v1267_v56 = vadd.f32 %v1266_v63, %v1254_v30 }
 0x158   :  { %v1234_v38 = vadd.f32 %v1233_v48, %v1219_v37  ;;  %v1255_v51 = vmul.f32 %v1219_v37, %v1219_v37 }
 0x15a   :  { %v1235_v52 = vrot.slane %v1234_v38, 4  ;;  %v1268_v53 = vadd.f32 %v1267_v56, %v1255_v51 }
 0x15c   :  { %v1236_v54 = vadd.f32 %v1235_v52, %v1234_v38  ;;  %v1269_v39 = vrot.slane %v1268_v53, 4 }
 0x15e   :  { %v1237_v42 = vrot.slane %v1236_v54, 2  ;;  %v1270_v6 = vadd.f32 %v1269_v39, %v1268_v53 }
 0x160   :  { %v1238_v43 = vadd.f32 %v1237_v42, %v1236_v54  ;;  %v1271_v27 = vrot.slane %v1270_v6, 2 }
 0x162   :  { %v1239_v45 = vrot.slane %v1238_v43, 1  ;;  %v1272_v7 = vadd.f32 %v1271_v27, %v1270_v6 }
 0x164   :  { %v1240_v8 = vadd.f32 %v1239_v45, %v1238_v43  ;;  %v1273_v9 = vrot.slane %v1272_v7, 1 }
 0x166   :  { %v1241_v55 = vmul.f32 0.010204081, %v1240_v8  ;;  %v1274_v58 = vadd.f32 %v1273_v9, %v1272_v7 }
 0x168   :  { %v1275_v57 = vmul.f32 0.010204081, %v1274_v58  ;;  %v1276_v59 = vmul.f32 %v1241_v55, %v1241_v55 }
 0x16a   :  { %v1277_v10 = vsub.f32 %v1275_v57, %v1276_v59 }
 0x16c   :  { %v1278_v13 = vmax.f32 %v1277_v10, 0.0 }
 0x16e   :  { %v1279_v11 = vadd.f32 1e-05, %v1278_v13 }
 0x170   :  { %1925 = vrsqrt.f32 %v1279_v11 }
 0x17d   :  { %v1926_v18 = vpop.eup %1925 }
 0x17e   :  { %v1282_v21 = vmul.f32 %v1926_v18, %v1281_v15 }
 0x180   :  { %v1284_v60 = vmul.f32 %v1282_v21, %v1241_v55  ;;  %v1289_v61 = vrot.slane %v1282_v21, %v1288_v16 }
 0x182   :  { %v1285_v0 = vsub.f32 %v1283_v22, %v1284_v60  ;;  %v1293_v23 = vmul.f32 %v1289_v61, %v2388_v5  ;;  %v1294_v41 = vmul.f32 %v1289_v61, %v2395_v19  ;;  %v1295_v24 = vmul.f32 %v1289_v61, %v2401_v35 }
 0x183   :  { %v1296_v25 = vmul.f32 %v1289_v61, %v2407_v44  ;;  %v1297_v26 = vmul.f32 %v1289_v61, %v2417_v17  ;;  %v1298_v46 = vmul.f32 %v1289_v61, %v2427_v20  ;;  %v1299_v47 = vmul.f32 %v1289_v61, %v2436_v40 }
 0x184   :  { %v1290_v1 = vmul.f32 %v1289_v61, %v2375_v33  ;;  %v1291_v2 = vmul.f32 %v1289_v61, %v2372_v28  ;;  %v1292_v4 = vmul.f32 %v1289_v61, %v2377_v36  ;;  %v1308_v49 = vrot.slane %v1285_v0, %v1288_v16 }
 0x185   :  { %v1300_v5 = vmul.f32 %v1289_v61, %v2445_v12  ;;  %v1301_v19 = vmul.f32 %v1289_v61, %v2451_v62  ;;  %v1302_v35 = vmul.f32 %v1289_v61, %v1216_v3  ;;  %v1303_v50 = vmul.f32 %v1289_v61, %v1219_v37 }
 0x186   :  { %v1310_v44 = vadd.f32 %v1308_v49, %v1290_v1  ;;  %v1311_v29 = vadd.f32 %v1308_v49, %v1291_v2  ;;  %v1312_v17 = vadd.f32 %v1308_v49, %v1292_v4  ;;  %v1313_v30 = vadd.f32 %v1308_v49, %v1293_v23 }
 0x187   :  { %v1314_v20 = vadd.f32 %v1308_v49, %v1294_v41  ;;  %v1315_v31 = vadd.f32 %v1308_v49, %v1295_v24  ;;  %v1316_v40 = vadd.f32 %v1308_v49, %v1296_v25  ;;  %v1317_v32 = vadd.f32 %v1308_v49, %v1297_v26 }
 0x188   :  { %v1318_v33 = vadd.f32 %v1308_v49, %v1298_v46  ;;  %v1319_v63 = vadd.f32 %v1308_v49, %v1299_v47  ;;  %v1320_v28 = vadd.f32 %v1308_v49, %v1300_v5  ;;  %v1321_v48 = vadd.f32 %v1308_v49, %v1301_v19 }
 0x189   :  { %v1322_v36 = vadd.f32 %v1308_v49, %v1302_v35  ;;  %v1323_v56 = vadd.f32 %v1308_v49, %v1303_v50  ;;  %vm1324_vm0 = vcmp.ge.f32.partialorder %v1310_v44, 0.0  ;;  %vm1325_vm1 = vcmp.ge.f32.partialorder %v1311_v29, 0.0 }
 0x18a   :  { %vm1326_vm2 = vcmp.ge.f32.partialorder %v1312_v17, 0.0  ;;  %vm1327_vm3 = vcmp.ge.f32.partialorder %v1313_v30, 0.0  ;;  %vm1328_vm4 = vcmp.ge.f32.partialorder %v1314_v20, 0.0  ;;  %vm1329_vm5 = vcmp.ge.f32.partialorder %v1315_v31, 0.0 }
 0x18b   :  { %vm1330_vm6 = vcmp.ge.f32.partialorder %v1316_v40, 0.0  ;;  %vm1331_vm7 = vcmp.ge.f32.partialorder %v1317_v32, 0.0  ;;  %vm1332_vm8 = vcmp.ge.f32.partialorder %v1318_v33, 0.0  ;;  %vm1333_vm9 = vcmp.ge.f32.partialorder %v1319_v63, 0.0 }
 0x18c   :  { %vm1334_vm10 = vcmp.ge.f32.partialorder %v1320_v28, 0.0  ;;  %vm1335_vm11 = vcmp.ge.f32.partialorder %v1321_v48, 0.0  ;;  %vm1336_vm12 = vcmp.ge.f32.partialorder %v1322_v36, 0.0  ;;  %vm1337_vm13 = vcmp.ge.f32.partialorder %v1323_v56, 0.0 }
 0x18d   :  { %v1338_v12 = vmul.f32 0.2, %v1310_v44  ;;  %v1339_v62 = vmul.f32 0.2, %v1311_v29  ;;  %v1340_v3 = vmul.f32 0.2, %v1312_v17 }
 0x18e   :  { %v1341_v37 = vmul.f32 0.2, %v1313_v30  ;;  %v1342_v38 = vmul.f32 0.2, %v1314_v20  ;;  %v1343_v51 = vmul.f32 0.2, %v1315_v31 }
 0x18f   :  { %v1344_v52 = vmul.f32 0.2, %v1316_v40  ;;  %v1345_v53 = vmul.f32 0.2, %v1317_v32  ;;  %v1346_v54 = vmul.f32 0.2, %v1318_v33  ;;  %v1352_v39 = vsel %vm1324_vm0, %v1310_v44, %v1338_v12 }
 0x190   :  { %v1347_v42 = vmul.f32 0.2, %v1319_v63  ;;  %v1348_v6 = vmul.f32 0.2, %v1320_v28  ;;  %v1349_v43 = vmul.f32 0.2, %v1321_v48  ;;  %v1353_v27 = vsel %vm1325_vm1, %v1311_v29, %v1339_v62 }
 0x191   :  { %v1350_v45 = vmul.f32 0.2, %v1322_v36  ;;  %v1351_v7 = vmul.f32 0.2, %v1323_v56  ;;  %v1354_v8 = vsel %vm1326_vm2, %v1312_v17, %v1340_v3  ;;  %v1355_v9 = vsel %vm1327_vm3, %v1313_v30, %v1341_v37 }
 0x192   :  { %v1356_v55 = vsel %vm1328_vm4, %v1314_v20, %v1342_v38  ;;  %v1357_v58 = vsel %vm1329_vm5, %v1315_v31, %v1343_v51  ;;  %v1358_v57 = vsel %vm1330_vm6, %v1316_v40, %v1344_v52  ;;  %v1359_v59 = vsel %vm1331_vm7, %v1317_v32, %v1345_v53 }
 0x193   :  { %v1360_v10 = vsel %vm1332_vm8, %v1318_v33, %v1346_v54  ;;  %v1361_v13 = vsel %vm1333_vm9, %v1319_v63, %v1347_v42  ;;  %v1362_v11 = vsel %vm1334_vm10, %v1320_v28, %v1348_v6  ;;  %v1363_v34 = vsel %vm1335_vm11, %v1321_v48, %v1349_v43 }
 0x194   :  { %v1364_v14 = vsel %vm1336_vm12, %v1322_v36, %v1350_v45  ;;  %v1365_v15 = vsel %vm1337_vm13, %v1323_v56, %v1351_v7  ;;  %v1591_v16 = vpack.c.bf16 %v1353_v27, %v1352_v39  ;;  %v1596_v18 = vpack.c.bf16 %v1355_v9, %v1354_v8 }
 0x195   :  { %v1601_v21 = vpack.c.bf16 %v1357_v58, %v1356_v55  ;;  %v1606_v22 = vpack.c.bf16 %v1359_v59, %v1358_v57  ;;  %v1611_v60 = vpack.c.bf16 %v1361_v13, %v1360_v10  ;;  %v1616_v61 = vpack.c.bf16 %v1363_v34, %v1362_v11 }
 0x196   :  { %1592 = vst [vmem:[%s2516_s4] sm:$0xff] %v1591_v16   ;;  %1623 = vst [vmem:[%s2516_s4 + $0x8] sm:$0xff] %v1596_v18   ;;  %v1621_v0 = vpack.c.bf16 %v1365_v15, %v1364_v14 }
 0x197   :  { %1624 = vst [vmem:[%s2516_s4 + $0x10] sm:$0xff] %v1601_v21   ;;  %1625 = vst [vmem:[%s2516_s4 + $0x18] sm:$0xff] %v1606_v22  }
 0x198   :  { %1626 = vst [vmem:[%s2516_s4 + $0x20] sm:$0xff] %v1611_v60   ;;  %1627 = vst [vmem:[%s2516_s4 + $0x28] sm:$0xff] %v1616_v61  }
 0x199   :  { %1628 = vst [vmem:[%s2516_s4 + $0x30] sm:$0xff] %v1621_v0  }

// kernel: discriminator_forward.6
= control target key start
LH: loop header
LB: loop body
LE: loop exit
PB: predicated region body
PF: predicated region fallthrough
CT: control target
= control target key end

     0   :  { %s2465_s1 = inlined_call_operand.vmem [shape: bf16[1152,256], index: 1, kind: input, shape index: {}]   ;;  %s2466_s0 = inlined_call_operand.vmem [shape: bf16[32,1152], index: 0, kind: input, shape index: {}]   ;;  %s2467_s2 = inlined_call_operand.vmem [shape: f32[1,256], index: 2, kind: input, shape index: {}]   ;;  %s2468_s3 = inlined_call_operand.vmem [shape: f32[1,256], index: 3, kind: input, shape index: {}]   ;;  %s2469_s4 = inlined_call_operand.vmem [shape: bf16[32,256], index: 4, kind: output, shape index: {}]  }
   0x1   :  { %v1632_v0 = vld [vmem:[%s2465_s1 + $0x74] ss:$8 sps:$4 sm:$0xff]   ;;  %v1636_v2 = vld [vmem:[%s2465_s1 + $0x70] ss:$8 sps:$4 sm:$0xff]   ;;  %v1638_v4 = vld [vmem:[%s2465_s1 + $0x64] ss:$8 sps:$4 sm:$0xff]  }
   0x2   :  { %v1634_v1 = vld [vmem:[%s2465_s1 + $0x174] ss:$8 sps:$4 sm:$0xff]   ;;  %994 = vmatprep.subr.bf16.mxu0 %v1632_v0  ;;  %v1637_v3 = vld [vmem:[%s2465_s1 + $0x170] ss:$8 sps:$4 sm:$0xff]   ;;  %v1640_v5 = vld [vmem:[%s2465_s1 + $0x164] ss:$8 sps:$4 sm:$0xff]  }
   0x3   :  { %1047 = vmatprep.subr.bf16.mxu1 %v1634_v1  ;;  %995 = vmatpush1.bf16.msra.mxu0 %v1636_v2  ;;  %v1642_v6 = vld [vmem:[%s2465_s1 + $0x60] ss:$8 sps:$4 sm:$0xff]   ;;  %v1644_v8 = vld [vmem:[%s2465_s1 + $0x54] ss:$8 sps:$4 sm:$0xff]   ;;  %v1648_v10 = vld [vmem:[%s2465_s1 + $0x50] ss:$8 sps:$4 sm:$0xff]  }
   0x4   :  { %1048 = vmatpush1.bf16.msra.mxu1 %v1637_v3  ;;  %996 = vmatprep.subr.bf16.mxu0 %v1638_v4  ;;  %v1643_v7 = vld [vmem:[%s2465_s1 + $0x160] ss:$8 sps:$4 sm:$0xff]   ;;  %v1646_v9 = vld [vmem:[%s2465_s1 + $0x154] ss:$8 sps:$4 sm:$0xff]   ;;  %v1649_v11 = vld [vmem:[%s2465_s1 + $0x150] ss:$8 sps:$4 sm:$0xff]  }
   0x5   :  { %1049 = vmatprep.subr.bf16.mxu1 %v1640_v5  ;;  %v1650_v12 = vld [vmem:[%s2465_s1 + $0x44] ss:$8 sps:$4 sm:$0xff]   ;;  %v1654_v14 = vld [vmem:[%s2465_s1 + $0x40] ss:$8 sps:$4 sm:$0xff]   ;;  %v1656_v16 = vld [vmem:[%s2465_s1 + $0x34] ss:$8 sps:$4 sm:$0xff]  }
   0x6   :  { %v1652_v13 = vld [vmem:[%s2465_s1 + $0x144] ss:$8 sps:$4 sm:$0xff]   ;;  %v1655_v15 = vld [vmem:[%s2465_s1 + $0x140] ss:$8 sps:$4 sm:$0xff]   ;;  %v1658_v17 = vld [vmem:[%s2465_s1 + $0x134] ss:$8 sps:$4 sm:$0xff]  }
   0x7   :  { %997 = vmatpush1.bf16.msra.mxu0 %v1642_v6  ;;  %v1660_v18 = vld [vmem:[%s2465_s1 + $0x30] ss:$8 sps:$4 sm:$0xff]   ;;  %v1662_v20 = vld [vmem:[%s2465_s1 + $0x24] ss:$8 sps:$4 sm:$0xff]   ;;  %v1666_v22 = vld [vmem:[%s2465_s1 + $0x20] ss:$8 sps:$4 sm:$0xff]  }
   0x8   :  { %1050 = vmatpush1.bf16.msra.mxu1 %v1643_v7  ;;  %998 = vmatprep.subr.bf16.mxu0 %v1644_v8  ;;  %v1661_v19 = vld [vmem:[%s2465_s1 + $0x130] ss:$8 sps:$4 sm:$0xff]   ;;  %v1664_v21 = vld [vmem:[%s2465_s1 + $0x124] ss:$8 sps:$4 sm:$0xff]   ;;  %v1667_v23 = vld [vmem:[%s2465_s1 + $0x120] ss:$8 sps:$4 sm:$0xff]  }
   0x9   :  { %1051 = vmatprep.subr.bf16.mxu1 %v1646_v9  ;;  %v1668_v24 = vld [vmem:[%s2465_s1 + $0x14] ss:$8 sps:$4 sm:$0xff]   ;;  %v1672_v26 = vld [vmem:[%s2465_s1 + $0x10] ss:$8 sps:$4 sm:$0xff]   ;;  %v1674_v28 = vld [vmem:[%s2465_s1 + $0x4] ss:$8 sps:$4 sm:$0xff]  }
   0xa   :  { %v1670_v25 = vld [vmem:[%s2465_s1 + $0x114] ss:$8 sps:$4 sm:$0xff]   ;;  %v1673_v27 = vld [vmem:[%s2465_s1 + $0x110] ss:$8 sps:$4 sm:$0xff]   ;;  %v1676_v29 = vld [vmem:[%s2465_s1 + $0x104] ss:$8 sps:$4 sm:$0xff]  }
   0xb   :  { %999 = vmatpush1.bf16.msra.mxu0 %v1648_v10  ;;  %v1678_v30 = vld [vmem:[%s2465_s1] ss:$8 sps:$4 sm:$0xff]   ;;  %v1680_v32 = vld [vmem:[%s2465_s1 + $0xf4] ss:$8 sps:$4 sm:$0xff]   ;;  %v1684_v34 = vld [vmem:[%s2465_s1 + $0xf0] ss:$8 sps:$4 sm:$0xff]  }
   0xc   :  { %1052 = vmatpush1.bf16.msra.mxu1 %v1649_v11  ;;  %1000 = vmatprep.subr.bf16.mxu0 %v1650_v12  ;;  %v1679_v31 = vld [vmem:[%s2465_s1 + $0x100] ss:$8 sps:$4 sm:$0xff]   ;;  %v1682_v33 = vld [vmem:[%s2465_s1 + $0x1f4] ss:$8 sps:$4 sm:$0xff]   ;;  %v1685_v35 = vld [vmem:[%s2465_s1 + $0x1f0] ss:$8 sps:$4 sm:$0xff]  }
   0xd   :  { %1053 = vmatprep.subr.bf16.mxu1 %v1652_v13  ;;  %v1686_v36 = vld [vmem:[%s2465_s1 + $0xe4] ss:$8 sps:$4 sm:$0xff]   ;;  %v1690_v38 = vld [vmem:[%s2465_s1 + $0xe0] ss:$8 sps:$4 sm:$0xff]   ;;  %v1692_v40 = vld [vmem:[%s2465_s1 + $0xd4] ss:$8 sps:$4 sm:$0xff]  }
   0xe   :  { %v1688_v37 = vld [vmem:[%s2465_s1 + $0x1e4] ss:$8 sps:$4 sm:$0xff]   ;;  %v1691_v39 = vld [vmem:[%s2465_s1 + $0x1e0] ss:$8 sps:$4 sm:$0xff]   ;;  %v1694_v41 = vld [vmem:[%s2465_s1 + $0x1d4] ss:$8 sps:$4 sm:$0xff]  }
   0xf   :  { %1001 = vmatpush1.bf16.msra.mxu0 %v1654_v14  ;;  %v1696_v42 = vld [vmem:[%s2465_s1 + $0xd0] ss:$8 sps:$4 sm:$0xff]   ;;  %v1698_v44 = vld [vmem:[%s2465_s1 + $0xc4] ss:$8 sps:$4 sm:$0xff]   ;;  %v1702_v46 = vld [vmem:[%s2465_s1 + $0xc0] ss:$8 sps:$4 sm:$0xff]  }
  0x10   :  { %1054 = vmatpush1.bf16.msra.mxu1 %v1655_v15  ;;  %1002 = vmatprep.subr.bf16.mxu0 %v1656_v16  ;;  %v1697_v43 = vld [vmem:[%s2465_s1 + $0x1d0] ss:$8 sps:$4 sm:$0xff]   ;;  %v1700_v45 = vld [vmem:[%s2465_s1 + $0x1c4] ss:$8 sps:$4 sm:$0xff]   ;;  %v1703_v47 = vld [vmem:[%s2465_s1 + $0x1c0] ss:$8 sps:$4 sm:$0xff]  }
  0x11   :  { %1055 = vmatprep.subr.bf16.mxu1 %v1658_v17  ;;  %v1704_v48 = vld [vmem:[%s2465_s1 + $0xb4] ss:$8 sps:$4 sm:$0xff]   ;;  %v1730_v49 = vld [vmem:[%s2466_s0 + $0x4] ss:$36 sps:$4 sm:$0xff]   ;;  %v1733_v51 = vld [vmem:[%s2466_s0 + $0xc] ss:$36 sps:$4 sm:$0xff]  }
  0x12   :  { %v1706_v50 = vld [vmem:[%s2465_s1 + $0x1b4] ss:$8 sps:$4 sm:$0xff]   ;;  %1026 = vmatprep.mubr.bf16.mxu0 %v1730_v49  ;;  %v1708_v52 = vld [vmem:[%s2465_s1 + $0xb0] ss:$8 sps:$4 sm:$0xff]   ;;  %1079 = vmatprep.mubr.bf16.mxu1 %v1733_v51  ;;  %v1710_v54 = vld [vmem:[%s2465_s1 + $0xa4] ss:$8 sps:$4 sm:$0xff]  }
  0x13   :  { %1003 = vmatpush1.bf16.msra.mxu0 %v1660_v18  ;;  %v1709_v53 = vld [vmem:[%s2465_s1 + $0x1b0] ss:$8 sps:$4 sm:$0xff]   ;;  %v1712_v55 = vld [vmem:[%s2465_s1 + $0x1a4] ss:$8 sps:$4 sm:$0xff]   ;;  %v1714_v56 = vld [vmem:[%s2465_s1 + $0xa0] ss:$8 sps:$4 sm:$0xff]  }
  0x14   :  { %1056 = vmatpush1.bf16.msra.mxu1 %v1661_v19  ;;  %1004 = vmatprep.subr.bf16.mxu0 %v1662_v20  ;;  %v1715_v57 = vld [vmem:[%s2465_s1 + $0x1a0] ss:$8 sps:$4 sm:$0xff]   ;;  %v1716_v58 = vld [vmem:[%s2465_s1 + $0x94] ss:$8 sps:$4 sm:$0xff]   ;;  %v1720_v60 = vld [vmem:[%s2465_s1 + $0x90] ss:$8 sps:$4 sm:$0xff]  }
  0x15   :  { %1057 = vmatprep.subr.bf16.mxu1 %v1664_v21  ;;  %v1718_v59 = vld [vmem:[%s2465_s1 + $0x194] ss:$8 sps:$4 sm:$0xff]   ;;  %v1721_v61 = vld [vmem:[%s2465_s1 + $0x190] ss:$8 sps:$4 sm:$0xff]   ;;  %v1722_v62 = vld [vmem:[%s2465_s1 + $0x84] ss:$8 sps:$4 sm:$0xff]  }
  0x16   :  { %v1724_v63 = vld [vmem:[%s2465_s1 + $0x184] ss:$8 sps:$4 sm:$0xff]   ;;  %v1726_v0 = vld [vmem:[%s2465_s1 + $0x80] ss:$8 sps:$4 sm:$0xff]   ;;  %v1736_v2 = vld [vmem:[%s2465_s1 + $0x274] ss:$8 sps:$4 sm:$0xff]  }
  0x17   :  { %1005 = vmatpush1.bf16.msra.mxu0 %v1666_v22  ;;  %v1727_v1 = vld [vmem:[%s2465_s1 + $0x180] ss:$8 sps:$4 sm:$0xff]   ;;  %v1739_v3 = vld [vmem:[%s2465_s1 + $0x374] ss:$8 sps:$4 sm:$0xff]   ;;  %v1734_v6 = vld [vmem:[%s2465_s1 + $0x270] ss:$8 sps:$4 sm:$0xff]  }
  0x18   :  { %1058 = vmatpush1.bf16.msra.mxu1 %v1667_v23  ;;  %1006 = vmatprep.subr.bf16.mxu0 %v1668_v24  ;;  %v1728_v4 = vld [vmem:[%s2466_s0] ss:$36 sps:$4 sm:$0xff]   ;;  %v1731_v5 = vld [vmem:[%s2466_s0 + $0x8] ss:$36 sps:$4 sm:$0xff]   ;;  %v1737_v7 = vld [vmem:[%s2465_s1 + $0x370] ss:$8 sps:$4 sm:$0xff]  }
  0x19   :  { %1059 = vmatprep.subr.bf16.mxu1 %v1670_v25  ;;  %v1742_v8 = vld [vmem:[%s2465_s1 + $0x264] ss:$8 sps:$4 sm:$0xff]   ;;  %v1740_v10 = vld [vmem:[%s2465_s1 + $0x260] ss:$8 sps:$4 sm:$0xff]   ;;  %v1748_v12 = vld [vmem:[%s2465_s1 + $0x254] ss:$8 sps:$4 sm:$0xff]  }
  0x1a   :  { %v1745_v9 = vld [vmem:[%s2465_s1 + $0x364] ss:$8 sps:$4 sm:$0xff]   ;;  %v1743_v11 = vld [vmem:[%s2465_s1 + $0x360] ss:$8 sps:$4 sm:$0xff]   ;;  %v1751_v13 = vld [vmem:[%s2465_s1 + $0x354] ss:$8 sps:$4 sm:$0xff]  }
  0x1b   :  { %1007 = vmatpush1.bf16.msra.mxu0 %v1672_v26  ;;  %v1746_v14 = vld [vmem:[%s2465_s1 + $0x250] ss:$8 sps:$4 sm:$0xff]   ;;  %v1754_v16 = vld [vmem:[%s2465_s1 + $0x244] ss:$8 sps:$4 sm:$0xff]   ;;  %v1752_v18 = vld [vmem:[%s2465_s1 + $0x240] ss:$8 sps:$4 sm:$0xff]  }
  0x1c   :  { %1060 = vmatpush1.bf16.msra.mxu1 %v1673_v27  ;;  %1008 = vmatprep.subr.bf16.mxu0 %v1674_v28  ;;  %v1749_v15 = vld [vmem:[%s2465_s1 + $0x350] ss:$8 sps:$4 sm:$0xff]   ;;  %v1757_v17 = vld [vmem:[%s2465_s1 + $0x344] ss:$8 sps:$4 sm:$0xff]   ;;  %v1755_v19 = vld [vmem:[%s2465_s1 + $0x340] ss:$8 sps:$4 sm:$0xff]  }
  0x1d   :  { %1061 = vmatprep.subr.bf16.mxu1 %v1676_v29  ;;  %v1760_v20 = vld [vmem:[%s2465_s1 + $0x234] ss:$8 sps:$4 sm:$0xff]   ;;  %v1758_v22 = vld [vmem:[%s2465_s1 + $0x230] ss:$8 sps:$4 sm:$0xff]   ;;  %v1766_v24 = vld [vmem:[%s2465_s1 + $0x224] ss:$8 sps:$4 sm:$0xff]  }
  0x1e   :  { %v1763_v21 = vld [vmem:[%s2465_s1 + $0x334] ss:$8 sps:$4 sm:$0xff]   ;;  %v1761_v23 = vld [vmem:[%s2465_s1 + $0x330] ss:$8 sps:$4 sm:$0xff]   ;;  %v1769_v25 = vld [vmem:[%s2465_s1 + $0x324] ss:$8 sps:$4 sm:$0xff]  }
  0x1f   :  { %1009 = vmatpush1.bf16.msra.mxu0 %v1678_v30  ;;  %v1812_v26 = vld [vmem:[%s2466_s0 + $0x4c] ss:$36 sps:$4 sm:$0xff]   ;;  %v1814_v27 = vld [vmem:[%s2466_s0 + $0x54] ss:$36 sps:$4 sm:$0xff]   ;;  %v1764_v30 = vld [vmem:[%s2465_s1 + $0x220] ss:$8 sps:$4 sm:$0xff]  }
  0x20   :  { %1062 = vmatpush1.bf16.msra.mxu1 %v1679_v31  ;;  %1010 = vmatprep.subr.bf16.mxu0 %v1680_v32  ;;  %v1816_v28 = vld [vmem:[%s2466_s0 + $0x48] ss:$36 sps:$4 sm:$0xff]   ;;  %v1817_v29 = vld [vmem:[%s2466_s0 + $0x50] ss:$36 sps:$4 sm:$0xff]  }
  0x21   :  { %1063 = vmatprep.subr.bf16.mxu1 %v1682_v33  ;;  %v1767_v31 = vld [vmem:[%s2465_s1 + $0x320] ss:$8 sps:$4 sm:$0xff]   ;;  %v1772_v32 = vld [vmem:[%s2465_s1 + $0x214] ss:$8 sps:$4 sm:$0xff]  }
  0x22   :  { %v1775_v33 = vld [vmem:[%s2465_s1 + $0x314] ss:$8 sps:$4 sm:$0xff]   ;;  %v1791_v49 = vld [vmem:[%s2465_s1 + $0x3e0] ss:$8 sps:$4 sm:$0xff]  }
  0x23   :  { %1011 = vmatpush2.bf16.msra.mxu0 %v1684_v34  ;;  %v1770_v34 = vld [vmem:[%s2465_s1 + $0x210] ss:$8 sps:$4 sm:$0xff]   ;;  %v1799_v51 = vld [vmem:[%s2465_s1 + $0x3d4] ss:$8 sps:$4 sm:$0xff]  }
  0x24   :  { %1064 = vmatpush2.bf16.msra.mxu1 %v1685_v35  ;;  %1012 = vmatprep.subr.bf16.mxu0 %v1686_v36  ;;  %v1773_v35 = vld [vmem:[%s2465_s1 + $0x310] ss:$8 sps:$4 sm:$0xff]   ;;  %v1778_v36 = vld [vmem:[%s2465_s1 + $0x204] ss:$8 sps:$4 sm:$0xff]  }
  0x25   :  { %1065 = vmatprep.subr.bf16.mxu1 %v1688_v37  ;;  %v1781_v37 = vld [vmem:[%s2465_s1 + $0x304] ss:$8 sps:$4 sm:$0xff]  }
  0x27   :  { %1013 = vmatpush2.bf16.msra.mxu0 %v1690_v38  ;;  %v1776_v38 = vld [vmem:[%s2465_s1 + $0x200] ss:$8 sps:$4 sm:$0xff]  }
  0x28   :  { %1066 = vmatpush2.bf16.msra.mxu1 %v1691_v39  ;;  %1014 = vmatprep.subr.bf16.mxu0 %v1692_v40  ;;  %v1779_v39 = vld [vmem:[%s2465_s1 + $0x300] ss:$8 sps:$4 sm:$0xff]   ;;  %v1784_v40 = vld [vmem:[%s2465_s1 + $0x2f4] ss:$8 sps:$4 sm:$0xff]  }
  0x29   :  { %1067 = vmatprep.subr.bf16.mxu1 %v1694_v41  ;;  %v1838_v41 = vld [vmem:[%s2466_s0 + $0x14] ss:$36 sps:$4 sm:$0xff]  }
  0x2b   :  { %1015 = vmatpush2.bf16.msra.mxu0 %v1696_v42  ;;  %v1787_v42 = vld [vmem:[%s2465_s1 + $0x3f4] ss:$8 sps:$4 sm:$0xff]  }
  0x2c   :  { %1068 = vmatpush2.bf16.msra.mxu1 %v1697_v43  ;;  %1016 = vmatprep.subr.bf16.mxu0 %v1698_v44  ;;  %v1841_v43 = vld [vmem:[%s2466_s0 + $0x1c] ss:$36 sps:$4 sm:$0xff]   ;;  %v1782_v44 = vld [vmem:[%s2465_s1 + $0x2f0] ss:$8 sps:$4 sm:$0xff]  }
  0x2d   :  { %1069 = vmatprep.subr.bf16.mxu1 %v1700_v45  ;;  %v1785_v45 = vld [vmem:[%s2465_s1 + $0x3f0] ss:$8 sps:$4 sm:$0xff]  }
  0x2f   :  { %1017 = vmatpush2.bf16.msra.mxu0 %v1702_v46  ;;  %v1790_v46 = vld [vmem:[%s2465_s1 + $0x2e4] ss:$8 sps:$4 sm:$0xff]  }
  0x30   :  { %1070 = vmatpush2.bf16.msra.mxu1 %v1703_v47  ;;  %1018 = vmatprep.subr.bf16.mxu0 %v1704_v48  ;;  %v1793_v47 = vld [vmem:[%s2465_s1 + $0x3e4] ss:$8 sps:$4 sm:$0xff]   ;;  %v1788_v48 = vld [vmem:[%s2465_s1 + $0x2e0] ss:$8 sps:$4 sm:$0xff]  }
  0x31   :  { %1071 = vmatprep.subr.bf16.mxu1 %v1706_v50  ;;  %v1796_v50 = vld [vmem:[%s2465_s1 + $0x2d4] ss:$8 sps:$4 sm:$0xff]  }
  0x33   :  { %1019 = vmatpush2.bf16.msra.mxu0 %v1708_v52  ;;  %v1794_v52 = vld [vmem:[%s2465_s1 + $0x2d0] ss:$8 sps:$4 sm:$0xff]  }
  0x34   :  { %1072 = vmatpush2.bf16.msra.mxu1 %v1709_v53  ;;  %1020 = vmatprep.subr.bf16.mxu0 %v1710_v54  ;;  %v1797_v53 = vld [vmem:[%s2465_s1 + $0x3d0] ss:$8 sps:$4 sm:$0xff]   ;;  %v1802_v54 = vld [vmem:[%s2465_s1 + $0x2c4] ss:$8 sps:$4 sm:$0xff]  }
  0x35   :  { %1073 = vmatprep.subr.bf16.mxu1 %v1712_v55  ;;  %v1805_v55 = vld [vmem:[%s2465_s1 + $0x3c4] ss:$8 sps:$4 sm:$0xff]  }
  0x37   :  { %1021 = vmatpush2.bf16.msra.mxu0 %v1714_v56  ;;  %v1800_v56 = vld [vmem:[%s2465_s1 + $0x2c0] ss:$8 sps:$4 sm:$0xff]  }
  0x38   :  { %1074 = vmatpush2.bf16.msra.mxu1 %v1715_v57  ;;  %1022 = vmatprep.subr.bf16.mxu0 %v1716_v58  ;;  %v1803_v57 = vld [vmem:[%s2465_s1 + $0x3c0] ss:$8 sps:$4 sm:$0xff]   ;;  %v1808_v58 = vld [vmem:[%s2465_s1 + $0x2b4] ss:$8 sps:$4 sm:$0xff]  }
  0x39   :  { %1075 = vmatprep.subr.bf16.mxu1 %v1718_v59  ;;  %v1811_v59 = vld [vmem:[%s2465_s1 + $0x3b4] ss:$8 sps:$4 sm:$0xff]  }
  0x3b   :  { %1023 = vmatpush2.bf16.msra.mxu0 %v1720_v60  ;;  %v1806_v60 = vld [vmem:[%s2465_s1 + $0x2b0] ss:$8 sps:$4 sm:$0xff]  }
  0x3c   :  { %1076 = vmatpush2.bf16.msra.mxu1 %v1721_v61  ;;  %1024 = vmatprep.subr.bf16.mxu0 %v1722_v62  ;;  %v1809_v61 = vld [vmem:[%s2465_s1 + $0x3b0] ss:$8 sps:$4 sm:$0xff]   ;;  %v1820_v62 = vld [vmem:[%s2465_s1 + $0x2a4] ss:$8 sps:$4 sm:$0xff]  }
  0x3d   :  { %1077 = vmatprep.subr.bf16.mxu1 %v1724_v63  ;;  %v1823_v63 = vld [vmem:[%s2465_s1 + $0x3a4] ss:$8 sps:$4 sm:$0xff]  }
  0x3f   :  { %1025 = vmatpush2.bf16.msra.mxu0 %v1726_v0  ;;  %v1818_v0 = vld [vmem:[%s2465_s1 + $0x2a0] ss:$8 sps:$4 sm:$0xff]  }
  0x40   :  { %1078 = vmatpush2.bf16.msra.mxu1 %v1727_v1  ;;  %1100 = vmatprep.subr.bf16.mxu0 %v1736_v2  ;;  %v1821_v1 = vld [vmem:[%s2465_s1 + $0x3a0] ss:$8 sps:$4 sm:$0xff]   ;;  %v1826_v2 = vld [vmem:[%s2465_s1 + $0x294] ss:$8 sps:$4 sm:$0xff]  }
  0x41   :  { %1153 = vmatprep.subr.bf16.mxu1 %v1739_v3  ;;  %v1829_v3 = vld [vmem:[%s2465_s1 + $0x394] ss:$8 sps:$4 sm:$0xff]  }
  0x42   :  { %1027 = vmatmul.mubr.bf16.vlgmr.msra.gmra.mxu0 %v1728_v4  ;;  %v1824_v4 = vld [vmem:[%s2465_s1 + $0x290] ss:$8 sps:$4 sm:$0xff]  }
  0x43   :  { %1080 = vmatmul.mubr.bf16.vlgmr.msra.gmra.mxu1 %v1731_v5  ;;  %1101 = vmatpush1.bf16.msra.mxu0 %v1734_v6  ;;  %v1827_v5 = vld [vmem:[%s2465_s1 + $0x390] ss:$8 sps:$4 sm:$0xff]   ;;  %v1832_v6 = vld [vmem:[%s2465_s1 + $0x284] ss:$8 sps:$4 sm:$0xff]  }
  0x44   :  { %1154 = vmatpush1.bf16.msra.mxu1 %v1737_v7  ;;  %1102 = vmatprep.subr.bf16.mxu0 %v1742_v8  ;;  %v1835_v7 = vld [vmem:[%s2465_s1 + $0x384] ss:$8 sps:$4 sm:$0xff]   ;;  %v1830_v8 = vld [vmem:[%s2465_s1 + $0x280] ss:$8 sps:$4 sm:$0xff]  }
  0x45   :  { %1155 = vmatprep.subr.bf16.mxu1 %v1745_v9  ;;  %1036 = vmatprep.mubr.bf16.mxu0 %v1812_v26  ;;  %v1833_v9 = vld [vmem:[%s2465_s1 + $0x380] ss:$8 sps:$4 sm:$0xff]   ;;  %v1860_v26 = vld [vmem:[%s2465_s1 + $0x430] ss:$8 sps:$4 sm:$0xff]  }
  0x46   :  { %1089 = vmatprep.mubr.bf16.mxu1 %v1814_v27  ;;  %v1865_v27 = vld [vmem:[%s2465_s1 + $0x424] ss:$8 sps:$4 sm:$0xff]  }
  0x47   :  { %1103 = vmatpush1.bf16.msra.mxu0 %v1740_v10  ;;  %v1844_v10 = vld [vmem:[%s2465_s1 + $0x474] ss:$8 sps:$4 sm:$0xff]  }
  0x48   :  { %1156 = vmatpush1.bf16.msra.mxu1 %v1743_v11  ;;  %1104 = vmatprep.subr.bf16.mxu0 %v1748_v12  ;;  %v1836_v11 = vld [vmem:[%s2466_s0 + $0x10] ss:$36 sps:$4 sm:$0xff]   ;;  %v1839_v12 = vld [vmem:[%s2466_s0 + $0x18] ss:$36 sps:$4 sm:$0xff]  }
  0x49   :  { %1157 = vmatprep.subr.bf16.mxu1 %v1751_v13  ;;  %v1842_v13 = vld [vmem:[%s2465_s1 + $0x470] ss:$8 sps:$4 sm:$0xff]  }
  0x4a   :  { %1037 = vmatmul.mubr.bf16.gmra.mxu0 %v1816_v28  ;;  %v1863_v28 = vld [vmem:[%s2465_s1 + $0x420] ss:$8 sps:$4 sm:$0xff]  }
  0x4b   :  { %1105 = vmatpush1.bf16.msra.mxu0 %v1746_v14  ;;  %1090 = vmatmul.mubr.bf16.gmra.mxu1 %v1817_v29  ;;  %v1847_v14 = vld [vmem:[%s2465_s1 + $0x464] ss:$8 sps:$4 sm:$0xff]   ;;  %v1868_v29 = vld [vmem:[%s2465_s1 + $0x414] ss:$8 sps:$4 sm:$0xff]  }
  0x4c   :  { %1158 = vmatpush1.bf16.msra.mxu1 %v1749_v15  ;;  %1106 = vmatprep.subr.bf16.mxu0 %v1754_v16  ;;  %v1848_v15 = vld [vmem:[%s2466_s0 + $0x5c] ss:$36 sps:$4 sm:$0xff]   ;;  %v1854_v16 = vld [vmem:[%s2466_s0 + $0x64] ss:$36 sps:$4 sm:$0xff]  }
  0x4d   :  { %1159 = vmatprep.subr.bf16.mxu1 %v1757_v17  ;;  %1132 = vmatprep.mubr.bf16.mxu0 %v1838_v41  ;;  %v1845_v17 = vld [vmem:[%s2465_s1 + $0x460] ss:$8 sps:$4 sm:$0xff]  }
  0x4e   :  { %1185 = vmatprep.mubr.bf16.mxu1 %v1841_v43 }
  0x4f   :  { %1107 = vmatpush1.bf16.msra.mxu0 %v1752_v18  ;;  %v1853_v18 = vld [vmem:[%s2465_s1 + $0x454] ss:$8 sps:$4 sm:$0xff]  }
  0x50   :  { %1160 = vmatpush1.bf16.msra.mxu1 %v1755_v19  ;;  %1108 = vmatprep.subr.bf16.mxu0 %v1760_v20  ;;  %v1850_v19 = vld [vmem:[%s2466_s0 + $0x58] ss:$36 sps:$4 sm:$0xff]   ;;  %v1856_v20 = vld [vmem:[%s2466_s0 + $0x60] ss:$36 sps:$4 sm:$0xff]  }
  0x51   :  { %1161 = vmatprep.subr.bf16.mxu1 %v1763_v21  ;;  %v1851_v21 = vld [vmem:[%s2465_s1 + $0x450] ss:$8 sps:$4 sm:$0xff]  }
  0x53   :  { %1109 = vmatpush1.bf16.msra.mxu0 %v1758_v22  ;;  %v1859_v22 = vld [vmem:[%s2465_s1 + $0x444] ss:$8 sps:$4 sm:$0xff]  }
  0x54   :  { %1162 = vmatpush1.bf16.msra.mxu1 %v1761_v23  ;;  %1110 = vmatprep.subr.bf16.mxu0 %v1766_v24  ;;  %v1857_v23 = vld [vmem:[%s2465_s1 + $0x440] ss:$8 sps:$4 sm:$0xff]   ;;  %v1862_v24 = vld [vmem:[%s2465_s1 + $0x434] ss:$8 sps:$4 sm:$0xff]  }
  0x55   :  { %1163 = vmatprep.subr.bf16.mxu1 %v1769_v25  ;;  %v1878_v25 = vmov 0  }
  0x57   :  { %1111 = vmatpush1.bf16.msra.mxu0 %v1764_v30  ;;  %v1866_v30 = vld [vmem:[%s2465_s1 + $0x410] ss:$8 sps:$4 sm:$0xff]  }
  0x58   :  { %1164 = vmatpush1.bf16.msra.mxu1 %v1767_v31  ;;  %1112 = vmatprep.subr.bf16.mxu0 %v1772_v32  ;;  %v1871_v31 = vld [vmem:[%s2465_s1 + $0x404] ss:$8 sps:$4 sm:$0xff]   ;;  %v1869_v32 = vld [vmem:[%s2465_s1 + $0x400] ss:$8 sps:$4 sm:$0xff]  }
  0x59   :  { %1165 = vmatprep.subr.bf16.mxu1 %v1775_v33  ;;  %v1872_v33 = vld [vmem:[%s2466_s0 + $0x20] ss:$36 sps:$4 sm:$0xff]  }
  0x5b   :  { %1113 = vmatpush1.bf16.msra.mxu0 %v1770_v34  ;;  %v1873_v34 = vld [vmem:[%s2466_s0 + $0x68] ss:$36 sps:$4 sm:$0xff]  }
  0x5c   :  { %1166 = vmatpush1.bf16.msra.mxu1 %v1773_v35  ;;  %1114 = vmatprep.subr.bf16.mxu0 %v1778_v36 }
  0x5d   :  { %1167 = vmatprep.subr.bf16.mxu1 %v1781_v37 }
  0x5f   :  { %1115 = vmatpush1.bf16.msra.mxu0 %v1776_v38 }
  0x60   :  { %1168 = vmatpush1.bf16.msra.mxu1 %v1779_v39  ;;  %1116 = vmatprep.subr.bf16.mxu0 %v1784_v40 }
  0x61   :  { %1169 = vmatprep.subr.bf16.mxu1 %v1787_v42 }
  0x63   :  { %1117 = vmatpush2.bf16.msra.mxu0 %v1782_v44 }
  0x64   :  { %1170 = vmatpush2.bf16.msra.mxu1 %v1785_v45  ;;  %1118 = vmatprep.subr.bf16.mxu0 %v1790_v46 }
  0x65   :  { %1171 = vmatprep.subr.bf16.mxu1 %v1793_v47 }
  0x67   :  { %1119 = vmatpush2.bf16.msra.mxu0 %v1788_v48 }
  0x68   :  { %1172 = vmatpush2.bf16.msra.mxu1 %v1791_v49  ;;  %1120 = vmatprep.subr.bf16.mxu0 %v1796_v50 }
  0x69   :  { %1173 = vmatprep.subr.bf16.mxu1 %v1799_v51 }
  0x6b   :  { %1121 = vmatpush2.bf16.msra.mxu0 %v1794_v52 }
  0x6c   :  { %1174 = vmatpush2.bf16.msra.mxu1 %v1797_v53  ;;  %1122 = vmatprep.subr.bf16.mxu0 %v1802_v54 }
  0x6d   :  { %1175 = vmatprep.subr.bf16.mxu1 %v1805_v55 }
  0x6f   :  { %1123 = vmatpush2.bf16.msra.mxu0 %v1800_v56 }
  0x70   :  { %1176 = vmatpush2.bf16.msra.mxu1 %v1803_v57  ;;  %1124 = vmatprep.subr.bf16.mxu0 %v1808_v58 }
  0x71   :  { %1177 = vmatprep.subr.bf16.mxu1 %v1811_v59 }
  0x73   :  { %1125 = vmatpush2.bf16.msra.mxu0 %v1806_v60 }
  0x74   :  { %1178 = vmatpush2.bf16.msra.mxu1 %v1809_v61  ;;  %1126 = vmatprep.subr.bf16.mxu0 %v1820_v62 }
  0x75   :  { %1179 = vmatprep.subr.bf16.mxu1 %v1823_v63 }
  0x77   :  { %1127 = vmatpush2.bf16.msra.mxu0 %v1818_v0 }
  0x78   :  { %1180 = vmatpush2.bf16.msra.mxu1 %v1821_v1  ;;  %1128 = vmatprep.subr.bf16.mxu0 %v1826_v2 }
  0x79   :  { %1181 = vmatprep.subr.bf16.mxu1 %v1829_v3 }
  0x7b   :  { %1129 = vmatpush2.bf16.msra.mxu0 %v1824_v4 }
  0x7c   :  { %1182 = vmatpush2.bf16.msra.mxu1 %v1827_v5  ;;  %1130 = vmatprep.subr.bf16.mxu0 %v1832_v6 }
  0x7d   :  { %1183 = vmatprep.subr.bf16.mxu1 %v1835_v7 }
  0x7f   :  { %1131 = vmatpush2.bf16.msra.mxu0 %v1830_v8 }
  0x80   :  { %1184 = vmatpush2.bf16.msra.mxu1 %v1833_v9  ;;  %1206 = vmatprep.subr.bf16.mxu0 %v1844_v10 }
  0x81   :  { %1614 = vmatprep.subr.bf16.mxu1 %v1844_v10 }
  0x82   :  { %1133 = vmatmul.mubr.bf16.vlgmr.msra.gmra.mxu0 %v1836_v11 }
  0x83   :  { %1186 = vmatmul.mubr.bf16.vlgmr.msra.gmra.mxu1 %v1839_v12  ;;  %1207 = vmatpush1.bf16.msra.mxu0 %v1842_v13 }
  0x84   :  { %1622 = vmatpush1.bf16.msra.mxu1 %v1842_v13  ;;  %1208 = vmatprep.subr.bf16.mxu0 %v1847_v14 }
  0x85   :  { %1615 = vmatprep.subr.bf16.mxu1 %v1847_v14  ;;  %1142 = vmatprep.mubr.bf16.mxu0 %v1848_v15 }
  0x86   :  { %1195 = vmatprep.mubr.bf16.mxu1 %v1854_v16 }
  0x87   :  { %1209 = vmatpush1.bf16.msra.mxu0 %v1845_v17 }
  0x88   :  { %1623 = vmatpush1.bf16.msra.mxu1 %v1845_v17  ;;  %1210 = vmatprep.subr.bf16.mxu0 %v1853_v18 }
  0x89   :  { %1616 = vmatprep.subr.bf16.mxu1 %v1853_v18 }
  0x8a   :  { %1143 = vmatmul.mubr.bf16.gmra.mxu0 %v1850_v19 }
  0x8b   :  { %1196 = vmatmul.mubr.bf16.gmra.mxu1 %v1856_v20  ;;  %1211 = vmatpush1.bf16.msra.mxu0 %v1851_v21 }
  0x8c   :  { %1624 = vmatpush1.bf16.msra.mxu1 %v1851_v21  ;;  %1212 = vmatprep.subr.bf16.mxu0 %v1859_v22 }
  0x8d   :  { %1617 = vmatprep.subr.bf16.mxu1 %v1859_v22  ;;  %1238 = vmatprep.mubr.bf16.mxu0 %v1878_v25 }
  0x8e   :  { %1248 = vmatprep.mubr.bf16.mxu1 %v1878_v25 }
  0x8f   :  { %1213 = vmatpush1.bf16.msra.mxu0 %v1857_v23 }
  0x90   :  { %1625 = vmatpush1.bf16.msra.mxu1 %v1857_v23  ;;  %1214 = vmatprep.subr.bf16.mxu0 %v1862_v24 }
  0x91   :  { %1618 = vmatprep.subr.bf16.mxu1 %v1862_v24 }
  0x93   :  { %1215 = vmatpush1.bf16.msra.mxu0 %v1860_v26 }
  0x94   :  { %1626 = vmatpush1.bf16.msra.mxu1 %v1860_v26  ;;  %1216 = vmatprep.subr.bf16.mxu0 %v1865_v27 }
  0x95   :  { %1619 = vmatprep.subr.bf16.mxu1 %v1865_v27 }
  0x97   :  { %1217 = vmatpush1.bf16.msra.mxu0 %v1863_v28 }
  0x98   :  { %1627 = vmatpush1.bf16.msra.mxu1 %v1863_v28  ;;  %1218 = vmatprep.subr.bf16.mxu0 %v1868_v29 }
  0x99   :  { %1620 = vmatprep.subr.bf16.mxu1 %v1868_v29 }
  0x9b   :  { %1219 = vmatpush1.bf16.msra.mxu0 %v1866_v30 }
  0x9c   :  { %1628 = vmatpush1.bf16.msra.mxu1 %v1866_v30  ;;  %1220 = vmatprep.subr.bf16.mxu0 %v1871_v31 }
  0x9d   :  { %1621 = vmatprep.subr.bf16.mxu1 %v1871_v31 }
  0x9f   :  { %1221 = vmatpush1.bf16.msra.mxu0 %v1869_v32 }
  0xa0   :  { %1629 = vmatpush1.bf16.msra.mxu1 %v1869_v32 }
  0xa2   :  { %1239 = vmatmul.mubr.bf16.vlgmr.msra.gmra.mxu0 %v1872_v33 }
  0xa3   :  { %1249 = vmatmul.mubr.bf16.vlgmr.msra.gmra.mxu1 %v1873_v34 }
 0x102   :  { %v1028_v35 = vpop.f32.mrf.mxu0 }
 0x103   :  { %v1081_v36 = vpop.f32.mrf.mxu1 }
 0x104   :  { %v1030_v37 = vpop.f32.mrf.mxu0  ;;  %v1082_v1 = vadd.f32 %v1081_v36, %v1028_v35 }
 0x105   :  { %v1083_v38 = vpop.f32.mrf.mxu1 }
 0x106   :  { %v1032_v39 = vpop.f32.mrf.mxu0  ;;  %v1084_v2 = vadd.f32 %v1083_v38, %v1030_v37 }
 0x107   :  { %v1085_v40 = vpop.f32.mrf.mxu1 }
 0x108   :  { %v1034_v41 = vpop.f32.mrf.mxu0  ;;  %v1086_v4 = vadd.f32 %v1085_v40, %v1032_v39 }
 0x109   :  { %v1087_v42 = vpop.f32.mrf.mxu1 }
 0x10a   :  { %v1038_v43 = vpop.f32.mrf.mxu0  ;;  %v1088_v12 = vadd.f32 %v1087_v42, %v1034_v41 }
 0x10b   :  { %v1091_v44 = vpop.f32.mrf.mxu1 }
 0x10c   :  { %v1040_v45 = vpop.f32.mrf.mxu0  ;;  %v1092_v3 = vadd.f32 %v1091_v44, %v1038_v43 }
 0x10d   :  { %v1093_v46 = vpop.f32.mrf.mxu1 }
 0x10e   :  { %v1042_v47 = vpop.f32.mrf.mxu0  ;;  %v1094_v6 = vadd.f32 %v1093_v46, %v1040_v45 }
 0x10f   :  { %v1095_v48 = vpop.f32.mrf.mxu1 }
 0x110   :  { %v1044_v49 = vpop.f32.mrf.mxu0  ;;  %v1096_v7 = vadd.f32 %v1095_v48, %v1042_v47 }
 0x111   :  { %v1097_v50 = vpop.f32.mrf.mxu1 }
 0x112   :  { %v1098_v14 = vadd.f32 %v1097_v50, %v1044_v49 }
 0x142   :  { %v1134_v51 = vpop.f32.mrf.mxu0 }
 0x143   :  { %v1187_v52 = vpop.f32.mrf.mxu1  ;;  %v1135_v5 = vadd.f32 %v1134_v51, %v1082_v1 }
 0x144   :  { %v1136_v53 = vpop.f32.mrf.mxu0 }
 0x145   :  { %v1189_v54 = vpop.f32.mrf.mxu1  ;;  %v1137_v8 = vadd.f32 %v1136_v53, %v1084_v2  ;;  %v1188_v19 = vadd.f32 %v1187_v52, %v1135_v5 }
 0x146   :  { %v1138_v55 = vpop.f32.mrf.mxu0 }
 0x147   :  { %v1191_v56 = vpop.f32.mrf.mxu1  ;;  %v1139_v13 = vadd.f32 %v1138_v55, %v1086_v4  ;;  %v1190_v21 = vadd.f32 %v1189_v54, %v1137_v8 }
 0x148   :  { %v1140_v57 = vpop.f32.mrf.mxu0 }
 0x149   :  { %v1193_v58 = vpop.f32.mrf.mxu1  ;;  %v1141_v20 = vadd.f32 %v1140_v57, %v1088_v12  ;;  %v1192_v26 = vadd.f32 %v1191_v56, %v1139_v13 }
 0x14a   :  { %v1144_v59 = vpop.f32.mrf.mxu0 }
 0x14b   :  { %v1197_v60 = vpop.f32.mrf.mxu1  ;;  %v1145_v9 = vadd.f32 %v1144_v59, %v1092_v3  ;;  %v1194_v34 = vadd.f32 %v1193_v58, %v1141_v20 }
 0x14c   :  { %v1146_v61 = vpop.f32.mrf.mxu0 }
 0x14d   :  { %v1199_v62 = vpop.f32.mrf.mxu1  ;;  %v1147_v15 = vadd.f32 %v1146_v61, %v1094_v6  ;;  %v1198_v22 = vadd.f32 %v1197_v60, %v1145_v9 }
 0x14e   :  { %v1148_v63 = vpop.f32.mrf.mxu0 }
 0x14f   :  { %v1201_v0 = vpop.f32.mrf.mxu1  ;;  %v1149_v16 = vadd.f32 %v1148_v63, %v1096_v7  ;;  %v1200_v28 = vadd.f32 %v1199_v62, %v1147_v15 }
 0x150   :  { %v1150_v10 = vpop.f32.mrf.mxu0 }
 0x151   :  { %v1203_v11 = vpop.f32.mrf.mxu1  ;;  %v1151_v23 = vadd.f32 %v1150_v10, %v1098_v14  ;;  %v1202_v29 = vadd.f32 %v1201_v0, %v1149_v16 }
 0x153   :  { %v1204_v36 = vadd.f32 %v1203_v11, %v1151_v23 }
 0x162   :  { %v1240_v17 = vpop.f32.mrf.mxu0 }
 0x163   :  { %v1250_v18 = vpop.f32.mrf.mxu1  ;;  %v2391_v27 = vadd.f32 %v1240_v17, %v1188_v19 }
 0x164   :  { %v1242_v24 = vpop.f32.mrf.mxu0  ;;  %v2393_v30 = vadd.f32 %v1250_v18, %v1198_v22 }
 0x165   :  { %v1252_v25 = vpop.f32.mrf.mxu1  ;;  %v2395_v31 = vadd.f32 %v1242_v24, %v1190_v21  ;;  %v1279_v41 = vmul.f32 %v2391_v27, %v2391_v27 }
 0x166   :  { %v1244_v32 = vpop.f32.mrf.mxu0  ;;  %v2399_v37 = vadd.f32 %v1252_v25, %v1200_v28  ;;  %v1283_v45 = vmul.f32 %v2393_v30, %v2393_v30 }
 0x167   :  { %v1254_v33 = vpop.f32.mrf.mxu1  ;;  %v2397_v35 = vadd.f32 %v1244_v32, %v1192_v26  ;;  %v1280_v46 = vmul.f32 %v2395_v31, %v2395_v31 }
 0x168   :  { %v2401_v38 = vadd.f32 %v1254_v33, %v1202_v29  ;;  %v1246_v39 = vpop.f32.mrf.mxu0  ;;  %v1284_v52 = vmul.f32 %v2399_v37, %v2399_v37 }
 0x169   :  { %v1256_v40 = vpop.f32.mrf.mxu1  ;;  %v1259_v42 = vadd.f32 %v2397_v35, %v2391_v27  ;;  %v1281_v43 = vmul.f32 %v2397_v35, %v2397_v35  ;;  %v2409_v44 = vadd.f32 %v1246_v39, %v1194_v34 }
 0x16a   :  { %v2415_v47 = vadd.f32 %v1256_v40, %v1204_v36  ;;  %v1285_v53 = vmul.f32 %v2401_v38, %v2401_v38  ;;  %v1319_v40 = vlaneseq }
 0x16b   :  { %v1287_v48 = vadd.f32 %v1281_v43, %v1279_v41  ;;  %v1260_v49 = vadd.f32 %v1259_v42, %v2393_v30  ;;  %v1268_v50 = vadd.f32 %v2409_v44, %v2395_v31  ;;  %v1282_v51 = vmul.f32 %v2409_v44, %v2409_v44 }
 0x16c   :  { %v1286_v58 = vmul.f32 %v2415_v47, %v2415_v47  ;;  %v1320_v42 = vshrl.u32 %v1319_v40, 7 }
 0x16d   :  { %v1261_v54 = vadd.f32 %v1260_v49, %v2401_v38  ;;  %v1288_v55 = vadd.f32 %v1287_v48, %v1283_v45  ;;  %v1296_v56 = vadd.f32 %v1282_v51, %v1280_v46  ;;  %v1269_v57 = vadd.f32 %v1268_v50, %v2399_v37  ;;  %v1317_v45 = vld [vmem:[%s2467_s2] sm:$0x3] }
 0x16e   :  { %v1321_v43 = vsub.s32 0, %v1320_v42  ;;  %v1325_v46 = vsub.s32 1, %v1320_v42  ;;  %v1879_v49 = vmov 1966171168  }
 0x16f   :  { %v1262_v59 = vrot.slane %v1261_v54, 4  ;;  %v1289_v60 = vadd.f32 %v1288_v55, %v1285_v53  ;;  %v1270_v61 = vadd.f32 %v1269_v57, %v2415_v47  ;;  %v1297_v62 = vadd.f32 %v1296_v56, %v1284_v52 }
 0x170   :  { %v1322_v48 = vrot.slane %v1317_v45, %v1321_v43  ;;  %v1338_v50 = vunpack.c.l.s4 %v1879_v49  ;;  %v1326_v51 = vrot.slane %v1317_v45, %v1325_v46 }
 0x171   :  { %v1263_v63 = vadd.f32 %v1262_v59, %v1261_v54  ;;  %v1290_v0 = vrot.slane %v1289_v60, 4  ;;  %v1271_v1 = vrot.slane %v1270_v61, 4  ;;  %v1298_v2 = vadd.f32 %v1297_v62, %v1286_v58 }
 0x172   :  { %v1339_v55 = vunpack.c.0.s8 %v1338_v50 }
 0x173   :  { %v1264_v3 = vrot.slane %v1263_v63, 2  ;;  %v1291_v4 = vadd.f32 %v1290_v0, %v1289_v60  ;;  %v1272_v5 = vadd.f32 %v1271_v1, %v1270_v61  ;;  %v1299_v6 = vrot.slane %v1298_v2, 4 }
 0x174   :  { %v1342_v59 = vsub.s32 %v1339_v55, %v1320_v42 }
 0x175   :  { %v1265_v7 = vadd.f32 %v1264_v3, %v1263_v63  ;;  %v1292_v8 = vrot.slane %v1291_v4, 2  ;;  %v1273_v9 = vrot.slane %v1272_v5, 2  ;;  %v1300_v10 = vadd.f32 %v1299_v6, %v1298_v2  ;;  %v1331_v63 = vld [vmem:[%s2468_s3] sm:$0x3] }
 0x177   :  { %v1266_v11 = vrot.slane %v1265_v7, 1  ;;  %v1293_v12 = vadd.f32 %v1292_v8, %v1291_v4  ;;  %v1274_v13 = vadd.f32 %v1273_v9, %v1272_v5  ;;  %v1301_v14 = vrot.slane %v1300_v10, 2 }
 0x179   :  { %v1267_v15 = vadd.f32 %v1266_v11, %v1265_v7  ;;  %v1294_v16 = vrot.slane %v1293_v12, 1  ;;  %v1275_v17 = vrot.slane %v1274_v13, 1  ;;  %v1302_v18 = vadd.f32 %v1301_v14, %v1300_v10 }
 0x17b   :  { %v1277_v19 = vmul.f32 0.03125, %v1267_v15  ;;  %v1295_v20 = vadd.f32 %v1294_v16, %v1293_v12  ;;  %v1276_v21 = vadd.f32 %v1275_v17, %v1274_v13  ;;  %v1303_v22 = vrot.slane %v1302_v18, 1 }
 0x17d   :  { %v1305_v23 = vmul.f32 0.03125, %v1295_v20  ;;  %v1307_v24 = vmul.f32 %v1277_v19, %v1277_v19  ;;  %v1278_v25 = vmul.f32 0.03125, %v1276_v21  ;;  %v1304_v26 = vadd.f32 %v1303_v22, %v1302_v18 }
 0x17f   :  { %v1309_v28 = vsub.f32 %v1305_v23, %v1307_v24  ;;  %v1306_v29 = vmul.f32 0.03125, %v1304_v26  ;;  %v1308_v32 = vmul.f32 %v1278_v25, %v1278_v25 }
 0x181   :  { %v1311_v33 = vmax.f32 %v1309_v28, 0.0  ;;  %v1310_v34 = vsub.f32 %v1306_v29, %v1308_v32 }
 0x183   :  { %v1313_v36 = vadd.f32 1e-05, %v1311_v33  ;;  %v1312_v39 = vmax.f32 %v1310_v34, 0.0 }
 0x185   :  { %1874 = vrsqrt.f32 %v1313_v36  ;;  %v1314_v41 = vadd.f32 1e-05, %v1312_v39 }
 0x187   :  { %1876 = vrsqrt.f32 %v1314_v41 }
 0x192   :  { %v1875_v52 = vpop.eup %1874 }
 0x193   :  { %v1329_v54 = vmul.f32 %v1875_v52, %v1322_v48 }
 0x194   :  { %v1877_v53 = vpop.eup %1876 }
 0x195   :  { %v1330_v56 = vmul.f32 %v1877_v53, %v1326_v51  ;;  %v1332_v57 = vmul.f32 %v1329_v54, %v1277_v19  ;;  %v1356_v62 = vrot.slane %v1329_v54, %v1321_v43 }
 0x197   :  { %v1333_v58 = vmul.f32 %v1330_v56, %v1278_v25  ;;  %v1360_v1 = vrot.slane %v1330_v56, %v1321_v43  ;;  %v1361_v3 = vmul.f32 %v1356_v62, %v2391_v27  ;;  %v1363_v4 = vmul.f32 %v1356_v62, %v2397_v35 }
 0x198   :  { %v1365_v9 = vmul.f32 %v1356_v62, %v2393_v30  ;;  %v1367_v10 = vmul.f32 %v1356_v62, %v2401_v38 }
 0x199   :  { %v1336_v60 = vcombine.low %v1332_v57, %v1333_v58  ;;  %v1362_v5 = vmul.f32 %v1360_v1, %v2395_v31  ;;  %v1364_v6 = vmul.f32 %v1360_v1, %v2409_v44  ;;  %v1366_v11 = vmul.f32 %v1360_v1, %v2399_v37 }
 0x19a   :  { %v1368_v12 = vmul.f32 %v1360_v1, %v2415_v47 }
 0x19b   :  { %v1343_v61 = vrot.slane %v1336_v60, %v1342_v59 }
 0x19d   :  { %v1350_v0 = vrot.slane %v1343_v61, %v1342_v59 }
 0x19f   :  { %v1352_v2 = vsub.f32 %v1331_v63, %v1350_v0 }
 0x1a1   :  { %v1373_v7 = vrot.slane %v1352_v2, %v1321_v43  ;;  %v1377_v8 = vrot.slane %v1352_v2, %v1325_v46 }
 0x1a3   :  { %v1380_v13 = vadd.f32 %v1373_v7, %v1361_v3  ;;  %v1381_v14 = vadd.f32 %v1377_v8, %v1362_v5  ;;  %v1382_v15 = vadd.f32 %v1373_v7, %v1363_v4  ;;  %v1383_v27 = vadd.f32 %v1377_v8, %v1364_v6 }
 0x1a4   :  { %v1384_v16 = vadd.f32 %v1373_v7, %v1365_v9  ;;  %v1385_v35 = vadd.f32 %v1377_v8, %v1366_v11  ;;  %v1386_v17 = vadd.f32 %v1373_v7, %v1367_v10  ;;  %v1387_v31 = vadd.f32 %v1377_v8, %v1368_v12 }
 0x1a5   :  { %vm1388_vm0 = vcmp.ge.f32.partialorder %v1380_v13, 0.0  ;;  %vm1389_vm1 = vcmp.ge.f32.partialorder %v1381_v14, 0.0  ;;  %vm1390_vm2 = vcmp.ge.f32.partialorder %v1382_v15, 0.0  ;;  %vm1391_vm3 = vcmp.ge.f32.partialorder %v1383_v27, 0.0 }
 0x1a6   :  { %vm1392_vm4 = vcmp.ge.f32.partialorder %v1384_v16, 0.0  ;;  %vm1393_vm5 = vcmp.ge.f32.partialorder %v1385_v35, 0.0  ;;  %vm1394_vm6 = vcmp.ge.f32.partialorder %v1386_v17, 0.0  ;;  %vm1395_vm7 = vcmp.ge.f32.partialorder %v1387_v31, 0.0 }
 0x1a7   :  { %v1396_v30 = vmul.f32 0.2, %v1380_v13  ;;  %v1397_v37 = vmul.f32 0.2, %v1381_v14  ;;  %v1398_v38 = vmul.f32 0.2, %v1382_v15 }
 0x1a8   :  { %v1399_v44 = vmul.f32 0.2, %v1383_v27  ;;  %v1400_v47 = vmul.f32 0.2, %v1384_v16  ;;  %v1401_v18 = vmul.f32 0.2, %v1385_v35 }
 0x1a9   :  { %v1402_v19 = vmul.f32 0.2, %v1386_v17  ;;  %v1403_v20 = vmul.f32 0.2, %v1387_v31  ;;  %v1404_v21 = vsel %vm1388_vm0, %v1380_v13, %v1396_v30  ;;  %v1405_v22 = vsel %vm1389_vm1, %v1381_v14, %v1397_v37 }
 0x1aa   :  { %v1406_v23 = vsel %vm1390_vm2, %v1382_v15, %v1398_v38  ;;  %v1407_v24 = vsel %vm1391_vm3, %v1383_v27, %v1399_v44  ;;  %v1408_v25 = vsel %vm1392_vm4, %v1384_v16, %v1400_v47  ;;  %v1409_v26 = vsel %vm1393_vm5, %v1385_v35, %v1401_v18 }
 0x1ab   :  { %v1410_v28 = vsel %vm1394_vm6, %v1386_v17, %v1402_v19  ;;  %v1411_v29 = vsel %vm1395_vm7, %v1387_v31, %v1403_v20  ;;  %v1610_v32 = vpack.c.bf16 %v1405_v22, %v1404_v21  ;;  %v1611_v33 = vpack.c.bf16 %v1407_v24, %v1406_v23 }
 0x1ac   :  { %v1612_v34 = vpack.c.bf16 %v1409_v26, %v1408_v25  ;;  %v1613_v36 = vpack.c.bf16 %v1411_v29, %v1410_v28 }
 0x1ad   :  { %1436 = vst [vmem:[%s2469_s4] sm:$0xff] %v1610_v32  ;;  %1437 = vst [vmem:[%s2469_s4 + $0x8] sm:$0xff] %v1611_v33 }
 0x1ae   :  { %1438 = vst [vmem:[%s2469_s4 + $0x10] sm:$0xff] %v1612_v34  ;;  %1439 = vst [vmem:[%s2469_s4 + $0x18] sm:$0xff] %v1613_v36 }

// kernel: discriminator_forward.7
= control target key start
LH: loop header
LB: loop body
LE: loop exit
PB: predicated region body
PF: predicated region fallthrough
CT: control target
= control target key end

     0   :  { %s4734_s1 = inlined_call_operand.vmem [shape: bf16[4096,128], index: 1, kind: input, shape index: {}]   ;;  %s4735_s0 = inlined_call_operand.vmem [shape: bf16[16,4096], index: 0, kind: input, shape index: {}]   ;;  %s4736_s2 = inlined_call_operand.vmem [shape: f32[1,128], index: 2, kind: input, shape index: {}]   ;;  %s4737_s3 = inlined_call_operand.vmem [shape: f32[16,128], index: 3, kind: output, shape index: {}]  }
   0x1   :  { %v3577_v0 = vld [vmem:[%s4734_s1 + $0x78] sm:$0xff]   ;;  %v3581_v4 = vld [vmem:[%s4734_s1 + $0x70] sm:$0xff]   ;;  %v3585_v8 = vld [vmem:[%s4734_s1 + $0x68] sm:$0xff]  }
   0x2   :  { %v3578_v1 = vld [vmem:[%s4734_s1 + $0xf8] sm:$0xff]   ;;  %3225 = vmatprep.subr.bf16.mxu0 %v3577_v0  ;;  %v3582_v5 = vld [vmem:[%s4734_s1 + $0xf0] sm:$0xff]   ;;  %v3586_v9 = vld [vmem:[%s4734_s1 + $0xe8] sm:$0xff]  }
   0x3   :  { %v3579_v2 = vld [vmem:[%s4734_s1 + $0x38] sm:$0xff]   ;;  %3247 = vmatprep.subr.bf16.mxu1 %v3578_v1  ;;  %v3583_v6 = vld [vmem:[%s4734_s1 + $0x30] sm:$0xff]   ;;  %v3587_v10 = vld [vmem:[%s4734_s1 + $0x28] sm:$0xff]  }
   0x4   :  { %v3580_v3 = vld [vmem:[%s4734_s1 + $0xb8] sm:$0xff]   ;;  %3226 = vmatpush3.bf16.msra.mxu0 %v3579_v2  ;;  %v3584_v7 = vld [vmem:[%s4734_s1 + $0xb0] sm:$0xff]   ;;  %v3588_v11 = vld [vmem:[%s4734_s1 + $0xa8] sm:$0xff]  }
   0x5   :  { %3248 = vmatpush3.bf16.msra.mxu1 %v3580_v3  ;;  %3227 = vmatprep.subr.bf16.mxu0 %v3581_v4  ;;  %v3589_v12 = vld [vmem:[%s4734_s1 + $0x60] sm:$0xff]   ;;  %v3593_v16 = vld [vmem:[%s4734_s1 + $0x58] sm:$0xff]   ;;  %v3597_v20 = vld [vmem:[%s4734_s1 + $0x50] sm:$0xff]  }
   0x6   :  { %3249 = vmatprep.subr.bf16.mxu1 %v3582_v5  ;;  %v3590_v13 = vld [vmem:[%s4734_s1 + $0xe0] sm:$0xff]   ;;  %v3594_v17 = vld [vmem:[%s4734_s1 + $0xd8] sm:$0xff]   ;;  %v3598_v21 = vld [vmem:[%s4734_s1 + $0xd0] sm:$0xff]  }
   0x7   :  { %v3591_v14 = vld [vmem:[%s4734_s1 + $0x20] sm:$0xff]   ;;  %v3595_v18 = vld [vmem:[%s4734_s1 + $0x18] sm:$0xff]   ;;  %v3599_v22 = vld [vmem:[%s4734_s1 + $0x10] sm:$0xff]  }
   0x8   :  { %3228 = vmatpush3.bf16.msra.mxu0 %v3583_v6  ;;  %v3592_v15 = vld [vmem:[%s4734_s1 + $0xa0] sm:$0xff]   ;;  %v3596_v19 = vld [vmem:[%s4734_s1 + $0x98] sm:$0xff]   ;;  %v3600_v23 = vld [vmem:[%s4734_s1 + $0x90] sm:$0xff]  }
   0x9   :  { %3250 = vmatpush3.bf16.msra.mxu1 %v3584_v7  ;;  %3229 = vmatprep.subr.bf16.mxu0 %v3585_v8  ;;  %v3601_v24 = vld [vmem:[%s4734_s1 + $0x48] sm:$0xff]   ;;  %v3605_v28 = vld [vmem:[%s4734_s1 + $0x40] sm:$0xff]   ;;  %v3609_v40 = vld [vmem:[%s4734_s1 + $0x178] sm:$0xff]  }
   0xa   :  { %3251 = vmatprep.subr.bf16.mxu1 %v3586_v9  ;;  %v3602_v25 = vld [vmem:[%s4734_s1 + $0xc8] sm:$0xff]   ;;  %v3606_v29 = vld [vmem:[%s4734_s1 + $0xc0] sm:$0xff]   ;;  %v3610_v41 = vld [vmem:[%s4734_s1 + $0x1f8] sm:$0xff]  }
   0xb   :  { %v3603_v26 = vld [vmem:[%s4734_s1 + $0x8] sm:$0xff]   ;;  %v3607_v30 = vld [vmem:[%s4734_s1] sm:$0xff]   ;;  %v3611_v42 = vld [vmem:[%s4734_s1 + $0x138] sm:$0xff]  }
   0xc   :  { %3230 = vmatpush3.bf16.msra.mxu0 %v3587_v10  ;;  %v3604_v27 = vld [vmem:[%s4734_s1 + $0x88] sm:$0xff]   ;;  %v3608_v31 = vld [vmem:[%s4734_s1 + $0x80] sm:$0xff]   ;;  %v3612_v43 = vld [vmem:[%s4734_s1 + $0x1b8] sm:$0xff]  }
   0xd   :  { %3252 = vmatpush3.bf16.msra.mxu1 %v3588_v11  ;;  %3231 = vmatprep.subr.bf16.mxu0 %v3589_v12  ;;  %v15_v32 = vld [vmem:[%s4735_s0] sm:$0xff]  ;;  %v16_v34 = vld [vmem:[%s4735_s0 + $0x8] sm:$0xff]  ;;  %v3613_v44 = vld [vmem:[%s4734_s1 + $0x170] sm:$0xff]  }
   0xe   :  { %3253 = vmatprep.subr.bf16.mxu1 %v3590_v13  ;;  %v31_v33 = vld [vmem:[%s4735_s0 + $0x80] sm:$0xff]  ;;  %v32_v37 = vld [vmem:[%s4735_s0 + $0x88] sm:$0xff]  ;;  %v3614_v45 = vld [vmem:[%s4734_s1 + $0x1f0] sm:$0xff]  }
   0xf   :  { %v2937_v35 = vcombine.low %v15_v32, %v31_v33  ;;  %v2938_v36 = vcombine.high %v15_v32, %v31_v33  ;;  %v2939_v38 = vcombine.low %v16_v34, %v32_v37  ;;  %v2940_v39 = vcombine.high %v16_v34, %v32_v37  ;;  %v3615_v46 = vld [vmem:[%s4734_s1 + $0x130] sm:$0xff]   ;;  %v3617_v48 = vld [vmem:[%s4734_s1 + $0x168] sm:$0xff]   ;;  %v3621_v52 = vld [vmem:[%s4734_s1 + $0x160] sm:$0xff]  }
  0x10   :  { %3232 = vmatpush3.bf16.msra.mxu0 %v3591_v14  ;;  %v3616_v47 = vld [vmem:[%s4734_s1 + $0x1b0] sm:$0xff]   ;;  %v3618_v49 = vld [vmem:[%s4734_s1 + $0x1e8] sm:$0xff]   ;;  %v3622_v53 = vld [vmem:[%s4734_s1 + $0x1e0] sm:$0xff]  }
  0x11   :  { %3254 = vmatpush3.bf16.msra.mxu1 %v3592_v15  ;;  %3233 = vmatprep.subr.bf16.mxu0 %v3593_v16  ;;  %v3619_v50 = vld [vmem:[%s4734_s1 + $0x128] sm:$0xff]   ;;  %v3623_v54 = vld [vmem:[%s4734_s1 + $0x120] sm:$0xff]   ;;  %v3625_v56 = vld [vmem:[%s4734_s1 + $0x158] sm:$0xff]  }
  0x12   :  { %3255 = vmatprep.subr.bf16.mxu1 %v3594_v17  ;;  %2294 = vmatprep.mubr.bf16.mxu0 %v2938_v36  ;;  %v3620_v51 = vld [vmem:[%s4734_s1 + $0x1a8] sm:$0xff]   ;;  %v3624_v55 = vld [vmem:[%s4734_s1 + $0x1a0] sm:$0xff]   ;;  %v3626_v57 = vld [vmem:[%s4734_s1 + $0x1d8] sm:$0xff]  }
  0x13   :  { %2335 = vmatprep.mubr.bf16.mxu1 %v2940_v39  ;;  %v3627_v58 = vld [vmem:[%s4734_s1 + $0x118] sm:$0xff]   ;;  %v3629_v60 = vld [vmem:[%s4734_s1 + $0x150] sm:$0xff]   ;;  %v3633_v0 = vld [vmem:[%s4734_s1 + $0x148] sm:$0xff]  }
  0x14   :  { %3234 = vmatpush3.bf16.msra.mxu0 %v3595_v18  ;;  %v3628_v59 = vld [vmem:[%s4734_s1 + $0x198] sm:$0xff]   ;;  %v3630_v61 = vld [vmem:[%s4734_s1 + $0x1d0] sm:$0xff]   ;;  %v3634_v1 = vld [vmem:[%s4734_s1 + $0x1c8] sm:$0xff]  }
  0x15   :  { %3256 = vmatpush3.bf16.msra.mxu1 %v3596_v19  ;;  %3235 = vmatprep.subr.bf16.mxu0 %v3597_v20  ;;  %v3631_v62 = vld [vmem:[%s4734_s1 + $0x110] sm:$0xff]   ;;  %v3635_v2 = vld [vmem:[%s4734_s1 + $0x108] sm:$0xff]   ;;  %v3637_v4 = vld [vmem:[%s4734_s1 + $0x140] sm:$0xff]  }
  0x16   :  { %3257 = vmatprep.subr.bf16.mxu1 %v3598_v21  ;;  %v3632_v63 = vld [vmem:[%s4734_s1 + $0x190] sm:$0xff]   ;;  %v3636_v3 = vld [vmem:[%s4734_s1 + $0x188] sm:$0xff]   ;;  %v3638_v5 = vld [vmem:[%s4734_s1 + $0x1c0] sm:$0xff]  }
  0x17   :  { %v3639_v6 = vld [vmem:[%s4734_s1 + $0x100] sm:$0xff]   ;;  %v17_v8 = vld [vmem:[%s4735_s0 + $0x10] sm:$0xff]  ;;  %v18_v12 = vld [vmem:[%s4735_s0 + $0x18] sm:$0xff] }
  0x18   :  { %3236 = vmatpush3.bf16.msra.mxu0 %v3599_v22  ;;  %v3640_v7 = vld [vmem:[%s4734_s1 + $0x180] sm:$0xff]   ;;  %v33_v9 = vld [vmem:[%s4735_s0 + $0x90] sm:$0xff]  ;;  %v34_v13 = vld [vmem:[%s4735_s0 + $0x98] sm:$0xff] }
  0x19   :  { %3258 = vmatpush3.bf16.msra.mxu1 %v3600_v23  ;;  %3237 = vmatprep.subr.bf16.mxu0 %v3601_v24  ;;  %v2941_v10 = vcombine.low %v17_v8, %v33_v9  ;;  %v2942_v11 = vcombine.high %v17_v8, %v33_v9  ;;  %v2943_v14 = vcombine.low %v18_v12, %v34_v13  ;;  %v3641_v16 = vld [vmem:[%s4734_s1 + $0x278] sm:$0xff]   ;;  %v3645_v20 = vld [vmem:[%s4734_s1 + $0x270] sm:$0xff]   ;;  %v3649_v24 = vld [vmem:[%s4734_s1 + $0x268] sm:$0xff]  }
  0x1a   :  { %3259 = vmatprep.subr.bf16.mxu1 %v3602_v25  ;;  %v2944_v15 = vcombine.high %v18_v12, %v34_v13  ;;  %v3642_v17 = vld [vmem:[%s4734_s1 + $0x2f8] sm:$0xff]   ;;  %v3646_v21 = vld [vmem:[%s4734_s1 + $0x2f0] sm:$0xff]   ;;  %v3650_v25 = vld [vmem:[%s4734_s1 + $0x2e8] sm:$0xff]  }
  0x1b   :  { %v3643_v18 = vld [vmem:[%s4734_s1 + $0x238] sm:$0xff]   ;;  %v3647_v22 = vld [vmem:[%s4734_s1 + $0x230] sm:$0xff]  }
  0x1c   :  { %3238 = vmatpush3.bf16.msra.mxu0 %v3603_v26  ;;  %v3644_v19 = vld [vmem:[%s4734_s1 + $0x2b8] sm:$0xff]   ;;  %v3648_v23 = vld [vmem:[%s4734_s1 + $0x2b0] sm:$0xff]   ;;  %v3651_v26 = vld [vmem:[%s4734_s1 + $0x228] sm:$0xff]  }
  0x1d   :  { %3260 = vmatpush3.bf16.msra.mxu1 %v3604_v27  ;;  %3239 = vmatprep.subr.bf16.mxu0 %v3605_v28  ;;  %v3652_v27 = vld [vmem:[%s4734_s1 + $0x2a8] sm:$0xff]   ;;  %v3653_v28 = vld [vmem:[%s4734_s1 + $0x260] sm:$0xff]   ;;  %v3657_v32 = vld [vmem:[%s4734_s1 + $0x258] sm:$0xff]  }
  0x1e   :  { %3261 = vmatprep.subr.bf16.mxu1 %v3606_v29  ;;  %v3654_v29 = vld [vmem:[%s4734_s1 + $0x2e0] sm:$0xff]   ;;  %v3658_v33 = vld [vmem:[%s4734_s1 + $0x2d8] sm:$0xff]   ;;  %v3661_v36 = vld [vmem:[%s4734_s1 + $0x250] sm:$0xff]  }
  0x1f   :  { %v3659_v34 = vld [vmem:[%s4734_s1 + $0x218] sm:$0xff]   ;;  %v3662_v37 = vld [vmem:[%s4734_s1 + $0x2d0] sm:$0xff]  }
  0x20   :  { %3240 = vmatpush3.bf16.msra.mxu0 %v3607_v30  ;;  %v3655_v30 = vld [vmem:[%s4734_s1 + $0x220] sm:$0xff]   ;;  %v3664_v39 = vld [vmem:[%s4734_s1 + $0x290] sm:$0xff]   ;;  %v3689_v8 = vld [vmem:[%s4734_s1 + $0x358] sm:$0xff]  }
  0x21   :  { %3262 = vmatpush3.bf16.msra.mxu1 %v3608_v31  ;;  %3269 = vmatprep.subr.bf16.mxu0 %v3609_v40  ;;  %v3656_v31 = vld [vmem:[%s4734_s1 + $0x2a0] sm:$0xff]   ;;  %v3665_v40 = vld [vmem:[%s4734_s1 + $0x248] sm:$0xff]   ;;  %v3690_v9 = vld [vmem:[%s4734_s1 + $0x3d8] sm:$0xff]  }
  0x22   :  { %3291 = vmatprep.subr.bf16.mxu1 %v3610_v41  ;;  %v3666_v41 = vld [vmem:[%s4734_s1 + $0x2c8] sm:$0xff]   ;;  %v3693_v12 = vld [vmem:[%s4734_s1 + $0x350] sm:$0xff]  }
  0x23   :  { %2295 = vmatmul.mubr.bf16.vlgmr.msra.gmra.mxu0 %v2937_v35  ;;  %v3660_v35 = vld [vmem:[%s4734_s1 + $0x298] sm:$0xff]   ;;  %v3694_v13 = vld [vmem:[%s4734_s1 + $0x3d0] sm:$0xff]  }
  0x24   :  { %2336 = vmatmul.mubr.bf16.vlgmr.msra.gmra.mxu1 %v2939_v38  ;;  %3270 = vmatpush3.bf16.msra.mxu0 %v3611_v42  ;;  %v3663_v38 = vld [vmem:[%s4734_s1 + $0x210] sm:$0xff]   ;;  %v3667_v42 = vld [vmem:[%s4734_s1 + $0x208] sm:$0xff]  }
  0x25   :  { %3292 = vmatpush3.bf16.msra.mxu1 %v3612_v43  ;;  %3271 = vmatprep.subr.bf16.mxu0 %v3613_v44  ;;  %v3668_v43 = vld [vmem:[%s4734_s1 + $0x288] sm:$0xff]   ;;  %v3669_v44 = vld [vmem:[%s4734_s1 + $0x240] sm:$0xff]  }
  0x26   :  { %3293 = vmatprep.subr.bf16.mxu1 %v3614_v45  ;;  %2376 = vmatprep.mubr.bf16.mxu0 %v2942_v11  ;;  %v3670_v45 = vld [vmem:[%s4734_s1 + $0x2c0] sm:$0xff]   ;;  %v3692_v11 = vld [vmem:[%s4734_s1 + $0x398] sm:$0xff]  }
  0x27   :  { %2417 = vmatprep.mubr.bf16.mxu1 %v2944_v15  ;;  %v3696_v15 = vld [vmem:[%s4734_s1 + $0x390] sm:$0xff]  }
  0x28   :  { %3272 = vmatpush3.bf16.msra.mxu0 %v3615_v46  ;;  %v3671_v46 = vld [vmem:[%s4734_s1 + $0x200] sm:$0xff]  }
  0x29   :  { %3294 = vmatpush3.bf16.msra.mxu1 %v3616_v47  ;;  %3273 = vmatprep.subr.bf16.mxu0 %v3617_v48  ;;  %v3672_v47 = vld [vmem:[%s4734_s1 + $0x280] sm:$0xff]  }
  0x2a   :  { %3295 = vmatprep.subr.bf16.mxu1 %v3618_v49  ;;  %v19_v48 = vld [vmem:[%s4735_s0 + $0x20] sm:$0xff] }
  0x2b   :  { %v35_v49 = vld [vmem:[%s4735_s0 + $0xa0] sm:$0xff] }
  0x2c   :  { %3274 = vmatpush3.bf16.msra.mxu0 %v3619_v50  ;;  %v20_v50 = vld [vmem:[%s4735_s0 + $0x28] sm:$0xff] }
  0x2d   :  { %3296 = vmatpush3.bf16.msra.mxu1 %v3620_v51  ;;  %3275 = vmatprep.subr.bf16.mxu0 %v3621_v52  ;;  %v36_v51 = vld [vmem:[%s4735_s0 + $0xa8] sm:$0xff]  ;;  %v2945_v52 = vcombine.low %v19_v48, %v35_v49 }
  0x2e   :  { %3297 = vmatprep.subr.bf16.mxu1 %v3622_v53  ;;  %v2946_v53 = vcombine.high %v19_v48, %v35_v49  ;;  %v3721_v48 = vld [vmem:[%s4734_s1 + $0x458] sm:$0xff]  }
  0x2f   :  { %v3722_v49 = vld [vmem:[%s4734_s1 + $0x4d8] sm:$0xff]  }
  0x30   :  { %3276 = vmatpush3.bf16.msra.mxu0 %v3623_v54  ;;  %v2947_v54 = vcombine.low %v20_v50, %v36_v51 }
  0x31   :  { %3298 = vmatpush3.bf16.msra.mxu1 %v3624_v55  ;;  %3277 = vmatprep.subr.bf16.mxu0 %v3625_v56  ;;  %v2948_v55 = vcombine.high %v20_v50, %v36_v51  ;;  %v3673_v56 = vld [vmem:[%s4734_s1 + $0x378] sm:$0xff]  }
  0x32   :  { %3299 = vmatprep.subr.bf16.mxu1 %v3626_v57  ;;  %v3674_v57 = vld [vmem:[%s4734_s1 + $0x3f8] sm:$0xff]  }
  0x33   :  { %v3723_v50 = vld [vmem:[%s4734_s1 + $0x418] sm:$0xff]  }
  0x34   :  { %3278 = vmatpush3.bf16.msra.mxu0 %v3627_v58  ;;  %v3675_v58 = vld [vmem:[%s4734_s1 + $0x338] sm:$0xff]  }
  0x35   :  { %3300 = vmatpush3.bf16.msra.mxu1 %v3628_v59  ;;  %3279 = vmatprep.subr.bf16.mxu0 %v3629_v60  ;;  %v3676_v59 = vld [vmem:[%s4734_s1 + $0x3b8] sm:$0xff]   ;;  %v3677_v60 = vld [vmem:[%s4734_s1 + $0x370] sm:$0xff]  }
  0x36   :  { %3301 = vmatprep.subr.bf16.mxu1 %v3630_v61  ;;  %v3678_v61 = vld [vmem:[%s4734_s1 + $0x3f0] sm:$0xff]   ;;  %v3724_v51 = vld [vmem:[%s4734_s1 + $0x498] sm:$0xff]  }
  0x38   :  { %3280 = vmatpush3.bf16.msra.mxu0 %v3631_v62  ;;  %v3679_v62 = vld [vmem:[%s4734_s1 + $0x330] sm:$0xff]  }
  0x39   :  { %3302 = vmatpush3.bf16.msra.mxu1 %v3632_v63  ;;  %3281 = vmatprep.subr.bf16.mxu0 %v3633_v0  ;;  %v3680_v63 = vld [vmem:[%s4734_s1 + $0x3b0] sm:$0xff]   ;;  %v3681_v0 = vld [vmem:[%s4734_s1 + $0x368] sm:$0xff]  }
  0x3a   :  { %3303 = vmatprep.subr.bf16.mxu1 %v3634_v1  ;;  %v3682_v1 = vld [vmem:[%s4734_s1 + $0x3e8] sm:$0xff]  }
  0x3c   :  { %3282 = vmatpush3.bf16.msra.mxu0 %v3635_v2  ;;  %v3683_v2 = vld [vmem:[%s4734_s1 + $0x328] sm:$0xff]  }
  0x3d   :  { %3304 = vmatpush3.bf16.msra.mxu1 %v3636_v3  ;;  %3283 = vmatprep.subr.bf16.mxu0 %v3637_v4  ;;  %v3684_v3 = vld [vmem:[%s4734_s1 + $0x3a8] sm:$0xff]   ;;  %v3685_v4 = vld [vmem:[%s4734_s1 + $0x360] sm:$0xff]  }
  0x3e   :  { %3305 = vmatprep.subr.bf16.mxu1 %v3638_v5  ;;  %v3686_v5 = vld [vmem:[%s4734_s1 + $0x3e0] sm:$0xff]  }
  0x40   :  { %3284 = vmatpush3.bf16.msra.mxu0 %v3639_v6  ;;  %v3687_v6 = vld [vmem:[%s4734_s1 + $0x320] sm:$0xff]  }
  0x41   :  { %3306 = vmatpush3.bf16.msra.mxu1 %v3640_v7  ;;  %3313 = vmatprep.subr.bf16.mxu0 %v3641_v16  ;;  %v3688_v7 = vld [vmem:[%s4734_s1 + $0x3a0] sm:$0xff]   ;;  %v3697_v16 = vld [vmem:[%s4734_s1 + $0x348] sm:$0xff]  }
  0x42   :  { %3335 = vmatprep.subr.bf16.mxu1 %v3642_v17  ;;  %v3698_v17 = vld [vmem:[%s4734_s1 + $0x3c8] sm:$0xff]  }
  0x43   :  { %2377 = vmatmul.mubr.bf16.vlgmr.msra.gmra.mxu0 %v2941_v10  ;;  %v3691_v10 = vld [vmem:[%s4734_s1 + $0x318] sm:$0xff]  }
  0x44   :  { %2418 = vmatmul.mubr.bf16.vlgmr.msra.gmra.mxu1 %v2943_v14  ;;  %3314 = vmatpush3.bf16.msra.mxu0 %v3643_v18  ;;  %v3695_v14 = vld [vmem:[%s4734_s1 + $0x310] sm:$0xff]   ;;  %v3699_v18 = vld [vmem:[%s4734_s1 + $0x308] sm:$0xff]  }
  0x45   :  { %3336 = vmatpush3.bf16.msra.mxu1 %v3644_v19  ;;  %3315 = vmatprep.subr.bf16.mxu0 %v3645_v20  ;;  %v3700_v19 = vld [vmem:[%s4734_s1 + $0x388] sm:$0xff]   ;;  %v3701_v20 = vld [vmem:[%s4734_s1 + $0x340] sm:$0xff]  }
  0x46   :  { %3337 = vmatprep.subr.bf16.mxu1 %v3646_v21  ;;  %2458 = vmatprep.mubr.bf16.mxu0 %v2946_v53  ;;  %v3702_v21 = vld [vmem:[%s4734_s1 + $0x3c0] sm:$0xff]   ;;  %v3726_v53 = vld [vmem:[%s4734_s1 + $0x4d0] sm:$0xff]  }
  0x47   :  { %2499 = vmatprep.mubr.bf16.mxu1 %v2948_v55  ;;  %v3728_v55 = vld [vmem:[%s4734_s1 + $0x490] sm:$0xff]  }
  0x48   :  { %3316 = vmatpush3.bf16.msra.mxu0 %v3647_v22  ;;  %v3703_v22 = vld [vmem:[%s4734_s1 + $0x300] sm:$0xff]  }
  0x49   :  { %3338 = vmatpush3.bf16.msra.mxu1 %v3648_v23  ;;  %3317 = vmatprep.subr.bf16.mxu0 %v3649_v24  ;;  %v3704_v23 = vld [vmem:[%s4734_s1 + $0x380] sm:$0xff]   ;;  %v21_v24 = vld [vmem:[%s4735_s0 + $0x30] sm:$0xff] }
  0x4a   :  { %3339 = vmatprep.subr.bf16.mxu1 %v3650_v25  ;;  %v37_v25 = vld [vmem:[%s4735_s0 + $0xb0] sm:$0xff] }
  0x4c   :  { %3318 = vmatpush3.bf16.msra.mxu0 %v3651_v26  ;;  %v22_v26 = vld [vmem:[%s4735_s0 + $0x38] sm:$0xff] }
  0x4d   :  { %3340 = vmatpush3.bf16.msra.mxu1 %v3652_v27  ;;  %3319 = vmatprep.subr.bf16.mxu0 %v3653_v28  ;;  %v2949_v27 = vcombine.low %v21_v24, %v37_v25  ;;  %v2950_v28 = vcombine.high %v21_v24, %v37_v25  ;;  %v3753_v24 = vld [vmem:[%s4734_s1 + $0x558] sm:$0xff]  }
  0x4e   :  { %3341 = vmatprep.subr.bf16.mxu1 %v3654_v29  ;;  %v38_v29 = vld [vmem:[%s4735_s0 + $0xb8] sm:$0xff] }
  0x4f   :  { %v3754_v25 = vld [vmem:[%s4734_s1 + $0x5d8] sm:$0xff]  }
  0x50   :  { %3320 = vmatpush3.bf16.msra.mxu0 %v3655_v30  ;;  %v2951_v30 = vcombine.low %v22_v26, %v38_v29 }
  0x51   :  { %3342 = vmatpush3.bf16.msra.mxu1 %v3656_v31  ;;  %3321 = vmatprep.subr.bf16.mxu0 %v3657_v32  ;;  %v2952_v31 = vcombine.high %v22_v26, %v38_v29  ;;  %v3705_v32 = vld [vmem:[%s4734_s1 + $0x478] sm:$0xff]   ;;  %v3758_v29 = vld [vmem:[%s4734_s1 + $0x5d0] sm:$0xff]  }
  0x52   :  { %3343 = vmatprep.subr.bf16.mxu1 %v3658_v33  ;;  %v3706_v33 = vld [vmem:[%s4734_s1 + $0x4f8] sm:$0xff]  }
  0x53   :  { %v3755_v26 = vld [vmem:[%s4734_s1 + $0x518] sm:$0xff]  }
  0x54   :  { %3322 = vmatpush3.bf16.msra.mxu0 %v3659_v34  ;;  %v3707_v34 = vld [vmem:[%s4734_s1 + $0x438] sm:$0xff]  }
  0x55   :  { %3344 = vmatpush3.bf16.msra.mxu1 %v3660_v35  ;;  %3323 = vmatprep.subr.bf16.mxu0 %v3661_v36  ;;  %v3708_v35 = vld [vmem:[%s4734_s1 + $0x4b8] sm:$0xff]   ;;  %v3709_v36 = vld [vmem:[%s4734_s1 + $0x470] sm:$0xff]  }
  0x56   :  { %3345 = vmatprep.subr.bf16.mxu1 %v3662_v37  ;;  %v3710_v37 = vld [vmem:[%s4734_s1 + $0x4f0] sm:$0xff]  }
  0x58   :  { %3324 = vmatpush3.bf16.msra.mxu0 %v3663_v38  ;;  %v3711_v38 = vld [vmem:[%s4734_s1 + $0x430] sm:$0xff]  }
  0x59   :  { %3346 = vmatpush3.bf16.msra.mxu1 %v3664_v39  ;;  %3325 = vmatprep.subr.bf16.mxu0 %v3665_v40  ;;  %v3712_v39 = vld [vmem:[%s4734_s1 + $0x4b0] sm:$0xff]   ;;  %v3713_v40 = vld [vmem:[%s4734_s1 + $0x468] sm:$0xff]  }
  0x5a   :  { %3347 = vmatprep.subr.bf16.mxu1 %v3666_v41  ;;  %v3714_v41 = vld [vmem:[%s4734_s1 + $0x4e8] sm:$0xff]  }
  0x5c   :  { %3326 = vmatpush3.bf16.msra.mxu0 %v3667_v42  ;;  %v3715_v42 = vld [vmem:[%s4734_s1 + $0x428] sm:$0xff]  }
  0x5d   :  { %3348 = vmatpush3.bf16.msra.mxu1 %v3668_v43  ;;  %3327 = vmatprep.subr.bf16.mxu0 %v3669_v44  ;;  %v3716_v43 = vld [vmem:[%s4734_s1 + $0x4a8] sm:$0xff]   ;;  %v3717_v44 = vld [vmem:[%s4734_s1 + $0x460] sm:$0xff]  }
  0x5e   :  { %3349 = vmatprep.subr.bf16.mxu1 %v3670_v45  ;;  %v3718_v45 = vld [vmem:[%s4734_s1 + $0x4e0] sm:$0xff]  }
  0x60   :  { %3328 = vmatpush3.bf16.msra.mxu0 %v3671_v46  ;;  %v3719_v46 = vld [vmem:[%s4734_s1 + $0x420] sm:$0xff]  }
  0x61   :  { %3350 = vmatpush3.bf16.msra.mxu1 %v3672_v47  ;;  %3357 = vmatprep.subr.bf16.mxu0 %v3673_v56  ;;  %v3720_v47 = vld [vmem:[%s4734_s1 + $0x4a0] sm:$0xff]   ;;  %v3729_v56 = vld [vmem:[%s4734_s1 + $0x448] sm:$0xff]  }
  0x62   :  { %3379 = vmatprep.subr.bf16.mxu1 %v3674_v57  ;;  %v3730_v57 = vld [vmem:[%s4734_s1 + $0x4c8] sm:$0xff]  }
  0x63   :  { %2459 = vmatmul.mubr.bf16.vlgmr.msra.gmra.mxu0 %v2945_v52  ;;  %v3725_v52 = vld [vmem:[%s4734_s1 + $0x450] sm:$0xff]  }
  0x64   :  { %2500 = vmatmul.mubr.bf16.vlgmr.msra.gmra.mxu1 %v2947_v54  ;;  %3358 = vmatpush3.bf16.msra.mxu0 %v3675_v58  ;;  %v3727_v54 = vld [vmem:[%s4734_s1 + $0x410] sm:$0xff]   ;;  %v3731_v58 = vld [vmem:[%s4734_s1 + $0x408] sm:$0xff]  }
  0x65   :  { %3380 = vmatpush3.bf16.msra.mxu1 %v3676_v59  ;;  %3359 = vmatprep.subr.bf16.mxu0 %v3677_v60  ;;  %v3732_v59 = vld [vmem:[%s4734_s1 + $0x488] sm:$0xff]   ;;  %v3733_v60 = vld [vmem:[%s4734_s1 + $0x440] sm:$0xff]  }
  0x66   :  { %3381 = vmatprep.subr.bf16.mxu1 %v3678_v61  ;;  %2540 = vmatprep.mubr.bf16.mxu0 %v2950_v28  ;;  %v3734_v61 = vld [vmem:[%s4734_s1 + $0x4c0] sm:$0xff]   ;;  %v3757_v28 = vld [vmem:[%s4734_s1 + $0x550] sm:$0xff]  }
  0x67   :  { %2581 = vmatprep.mubr.bf16.mxu1 %v2952_v31  ;;  %v3760_v31 = vld [vmem:[%s4734_s1 + $0x590] sm:$0xff]  }
  0x68   :  { %3360 = vmatpush3.bf16.msra.mxu0 %v3679_v62  ;;  %v3735_v62 = vld [vmem:[%s4734_s1 + $0x400] sm:$0xff]  }
  0x69   :  { %3382 = vmatpush3.bf16.msra.mxu1 %v3680_v63  ;;  %3361 = vmatprep.subr.bf16.mxu0 %v3681_v0  ;;  %v3736_v63 = vld [vmem:[%s4734_s1 + $0x480] sm:$0xff]  }
  0x6a   :  { %3383 = vmatprep.subr.bf16.mxu1 %v3682_v1  ;;  %v23_v0 = vld [vmem:[%s4735_s0 + $0x40] sm:$0xff] }
  0x6b   :  { %v39_v1 = vld [vmem:[%s4735_s0 + $0xc0] sm:$0xff] }
  0x6c   :  { %3362 = vmatpush3.bf16.msra.mxu0 %v3683_v2  ;;  %v2953_v2 = vcombine.low %v23_v0, %v39_v1 }
  0x6d   :  { %3384 = vmatpush3.bf16.msra.mxu1 %v3684_v3  ;;  %3363 = vmatprep.subr.bf16.mxu0 %v3685_v4  ;;  %v2954_v3 = vcombine.high %v23_v0, %v39_v1  ;;  %v24_v4 = vld [vmem:[%s4735_s0 + $0x48] sm:$0xff]  ;;  %v3785_v0 = vld [vmem:[%s4734_s1 + $0x658] sm:$0xff]  }
  0x6e   :  { %3385 = vmatprep.subr.bf16.mxu1 %v3686_v5  ;;  %v40_v5 = vld [vmem:[%s4735_s0 + $0xc8] sm:$0xff]  ;;  %v3786_v1 = vld [vmem:[%s4734_s1 + $0x6d8] sm:$0xff]  }
  0x70   :  { %3364 = vmatpush3.bf16.msra.mxu0 %v3687_v6  ;;  %v2955_v6 = vcombine.low %v24_v4, %v40_v5 }
  0x71   :  { %3386 = vmatpush3.bf16.msra.mxu1 %v3688_v7  ;;  %3365 = vmatprep.subr.bf16.mxu0 %v3689_v8  ;;  %v2956_v7 = vcombine.high %v24_v4, %v40_v5  ;;  %v3737_v8 = vld [vmem:[%s4734_s1 + $0x578] sm:$0xff]   ;;  %v3789_v4 = vld [vmem:[%s4734_s1 + $0x650] sm:$0xff]  }
  0x72   :  { %3387 = vmatprep.subr.bf16.mxu1 %v3690_v9  ;;  %v3738_v9 = vld [vmem:[%s4734_s1 + $0x5f8] sm:$0xff]   ;;  %v3790_v5 = vld [vmem:[%s4734_s1 + $0x6d0] sm:$0xff]  }
  0x74   :  { %3366 = vmatpush3.bf16.msra.mxu0 %v3691_v10  ;;  %v3739_v10 = vld [vmem:[%s4734_s1 + $0x538] sm:$0xff]  }
  0x75   :  { %3388 = vmatpush3.bf16.msra.mxu1 %v3692_v11  ;;  %3367 = vmatprep.subr.bf16.mxu0 %v3693_v12  ;;  %v3740_v11 = vld [vmem:[%s4734_s1 + $0x5b8] sm:$0xff]   ;;  %v3741_v12 = vld [vmem:[%s4734_s1 + $0x570] sm:$0xff]  }
  0x76   :  { %3389 = vmatprep.subr.bf16.mxu1 %v3694_v13  ;;  %v3742_v13 = vld [vmem:[%s4734_s1 + $0x5f0] sm:$0xff]  }
  0x78   :  { %3368 = vmatpush3.bf16.msra.mxu0 %v3695_v14  ;;  %v3743_v14 = vld [vmem:[%s4734_s1 + $0x530] sm:$0xff]  }
  0x79   :  { %3390 = vmatpush3.bf16.msra.mxu1 %v3696_v15  ;;  %3369 = vmatprep.subr.bf16.mxu0 %v3697_v16  ;;  %v3744_v15 = vld [vmem:[%s4734_s1 + $0x5b0] sm:$0xff]   ;;  %v3745_v16 = vld [vmem:[%s4734_s1 + $0x568] sm:$0xff]  }
  0x7a   :  { %3391 = vmatprep.subr.bf16.mxu1 %v3698_v17  ;;  %v3746_v17 = vld [vmem:[%s4734_s1 + $0x5e8] sm:$0xff]  }
  0x7c   :  { %3370 = vmatpush3.bf16.msra.mxu0 %v3699_v18  ;;  %v3747_v18 = vld [vmem:[%s4734_s1 + $0x528] sm:$0xff]  }
  0x7d   :  { %3392 = vmatpush3.bf16.msra.mxu1 %v3700_v19  ;;  %3371 = vmatprep.subr.bf16.mxu0 %v3701_v20  ;;  %v3748_v19 = vld [vmem:[%s4734_s1 + $0x5a8] sm:$0xff]   ;;  %v3749_v20 = vld [vmem:[%s4734_s1 + $0x560] sm:$0xff]  }
  0x7e   :  { %3393 = vmatprep.subr.bf16.mxu1 %v3702_v21  ;;  %v3750_v21 = vld [vmem:[%s4734_s1 + $0x5e0] sm:$0xff]  }
  0x80   :  { %3372 = vmatpush3.bf16.msra.mxu0 %v3703_v22  ;;  %v3751_v22 = vld [vmem:[%s4734_s1 + $0x520] sm:$0xff]  }
  0x81   :  { %3394 = vmatpush3.bf16.msra.mxu1 %v3704_v23  ;;  %3401 = vmatprep.subr.bf16.mxu0 %v3705_v32  ;;  %v3752_v23 = vld [vmem:[%s4734_s1 + $0x5a0] sm:$0xff]   ;;  %v3761_v32 = vld [vmem:[%s4734_s1 + $0x548] sm:$0xff]  }
  0x82   :  { %3423 = vmatprep.subr.bf16.mxu1 %v3706_v33  ;;  %v3762_v33 = vld [vmem:[%s4734_s1 + $0x5c8] sm:$0xff]  }
  0x83   :  { %2541 = vmatmul.mubr.bf16.vlgmr.msra.gmra.mxu0 %v2949_v27  ;;  %v3756_v27 = vld [vmem:[%s4734_s1 + $0x598] sm:$0xff]  }
  0x84   :  { %2582 = vmatmul.mubr.bf16.vlgmr.msra.gmra.mxu1 %v2951_v30  ;;  %3402 = vmatpush3.bf16.msra.mxu0 %v3707_v34  ;;  %v3759_v30 = vld [vmem:[%s4734_s1 + $0x510] sm:$0xff]   ;;  %v3763_v34 = vld [vmem:[%s4734_s1 + $0x508] sm:$0xff]  }
  0x85   :  { %3424 = vmatpush3.bf16.msra.mxu1 %v3708_v35  ;;  %3403 = vmatprep.subr.bf16.mxu0 %v3709_v36  ;;  %v3764_v35 = vld [vmem:[%s4734_s1 + $0x588] sm:$0xff]   ;;  %v3765_v36 = vld [vmem:[%s4734_s1 + $0x540] sm:$0xff]  }
  0x86   :  { %3425 = vmatprep.subr.bf16.mxu1 %v3710_v37  ;;  %2622 = vmatprep.mubr.bf16.mxu0 %v2954_v3  ;;  %v3766_v37 = vld [vmem:[%s4734_s1 + $0x5c0] sm:$0xff]   ;;  %v3788_v3 = vld [vmem:[%s4734_s1 + $0x698] sm:$0xff]  }
  0x87   :  { %2663 = vmatprep.mubr.bf16.mxu1 %v2956_v7  ;;  %v3792_v7 = vld [vmem:[%s4734_s1 + $0x690] sm:$0xff]  }
  0x88   :  { %3404 = vmatpush3.bf16.msra.mxu0 %v3711_v38  ;;  %v3767_v38 = vld [vmem:[%s4734_s1 + $0x500] sm:$0xff]  }
  0x89   :  { %3426 = vmatpush3.bf16.msra.mxu1 %v3712_v39  ;;  %3405 = vmatprep.subr.bf16.mxu0 %v3713_v40  ;;  %v3768_v39 = vld [vmem:[%s4734_s1 + $0x580] sm:$0xff]   ;;  %v25_v40 = vld [vmem:[%s4735_s0 + $0x50] sm:$0xff] }
  0x8a   :  { %3427 = vmatprep.subr.bf16.mxu1 %v3714_v41  ;;  %v41_v41 = vld [vmem:[%s4735_s0 + $0xd0] sm:$0xff] }
  0x8c   :  { %3406 = vmatpush3.bf16.msra.mxu0 %v3715_v42  ;;  %v26_v42 = vld [vmem:[%s4735_s0 + $0x58] sm:$0xff] }
  0x8d   :  { %3428 = vmatpush3.bf16.msra.mxu1 %v3716_v43  ;;  %3407 = vmatprep.subr.bf16.mxu0 %v3717_v44  ;;  %v42_v43 = vld [vmem:[%s4735_s0 + $0xd8] sm:$0xff]  ;;  %v2957_v44 = vcombine.low %v25_v40, %v41_v41 }
  0x8e   :  { %3429 = vmatprep.subr.bf16.mxu1 %v3718_v45  ;;  %v2958_v45 = vcombine.high %v25_v40, %v41_v41  ;;  %v3817_v40 = vld [vmem:[%s4734_s1 + $0x758] sm:$0xff]  }
  0x8f   :  { %v3818_v41 = vld [vmem:[%s4734_s1 + $0x7d8] sm:$0xff]  }
  0x90   :  { %3408 = vmatpush3.bf16.msra.mxu0 %v3719_v46  ;;  %v2959_v46 = vcombine.low %v26_v42, %v42_v43 }
  0x91   :  { %3430 = vmatpush3.bf16.msra.mxu1 %v3720_v47  ;;  %3409 = vmatprep.subr.bf16.mxu0 %v3721_v48  ;;  %v2960_v47 = vcombine.high %v26_v42, %v42_v43  ;;  %v3769_v48 = vld [vmem:[%s4734_s1 + $0x678] sm:$0xff]  }
  0x92   :  { %3431 = vmatprep.subr.bf16.mxu1 %v3722_v49  ;;  %v3770_v49 = vld [vmem:[%s4734_s1 + $0x6f8] sm:$0xff]  }
  0x93   :  { %v3819_v42 = vld [vmem:[%s4734_s1 + $0x718] sm:$0xff]  }
  0x94   :  { %3410 = vmatpush3.bf16.msra.mxu0 %v3723_v50  ;;  %v3771_v50 = vld [vmem:[%s4734_s1 + $0x638] sm:$0xff]  }
  0x95   :  { %3432 = vmatpush3.bf16.msra.mxu1 %v3724_v51  ;;  %3411 = vmatprep.subr.bf16.mxu0 %v3725_v52  ;;  %v3772_v51 = vld [vmem:[%s4734_s1 + $0x6b8] sm:$0xff]   ;;  %v3773_v52 = vld [vmem:[%s4734_s1 + $0x670] sm:$0xff]  }
  0x96   :  { %3433 = vmatprep.subr.bf16.mxu1 %v3726_v53  ;;  %v3774_v53 = vld [vmem:[%s4734_s1 + $0x6f0] sm:$0xff]   ;;  %v3820_v43 = vld [vmem:[%s4734_s1 + $0x798] sm:$0xff]  }
  0x98   :  { %3412 = vmatpush3.bf16.msra.mxu0 %v3727_v54  ;;  %v3775_v54 = vld [vmem:[%s4734_s1 + $0x630] sm:$0xff]  }
  0x99   :  { %3434 = vmatpush3.bf16.msra.mxu1 %v3728_v55  ;;  %3413 = vmatprep.subr.bf16.mxu0 %v3729_v56  ;;  %v3776_v55 = vld [vmem:[%s4734_s1 + $0x6b0] sm:$0xff]   ;;  %v3777_v56 = vld [vmem:[%s4734_s1 + $0x668] sm:$0xff]  }
  0x9a   :  { %3435 = vmatprep.subr.bf16.mxu1 %v3730_v57  ;;  %v3778_v57 = vld [vmem:[%s4734_s1 + $0x6e8] sm:$0xff]  }
  0x9c   :  { %3414 = vmatpush3.bf16.msra.mxu0 %v3731_v58  ;;  %v3779_v58 = vld [vmem:[%s4734_s1 + $0x628] sm:$0xff]  }
  0x9d   :  { %3436 = vmatpush3.bf16.msra.mxu1 %v3732_v59  ;;  %3415 = vmatprep.subr.bf16.mxu0 %v3733_v60  ;;  %v3780_v59 = vld [vmem:[%s4734_s1 + $0x6a8] sm:$0xff]   ;;  %v3781_v60 = vld [vmem:[%s4734_s1 + $0x660] sm:$0xff]  }
  0x9e   :  { %3437 = vmatprep.subr.bf16.mxu1 %v3734_v61  ;;  %v3782_v61 = vld [vmem:[%s4734_s1 + $0x6e0] sm:$0xff]  }
  0xa0   :  { %3416 = vmatpush3.bf16.msra.mxu0 %v3735_v62  ;;  %v3783_v62 = vld [vmem:[%s4734_s1 + $0x620] sm:$0xff]  }
  0xa1   :  { %3438 = vmatpush3.bf16.msra.mxu1 %v3736_v63  ;;  %3445 = vmatprep.subr.bf16.mxu0 %v3737_v8  ;;  %v3784_v63 = vld [vmem:[%s4734_s1 + $0x6a0] sm:$0xff]   ;;  %v3793_v8 = vld [vmem:[%s4734_s1 + $0x648] sm:$0xff]  }
  0xa2   :  { %3467 = vmatprep.subr.bf16.mxu1 %v3738_v9  ;;  %v3794_v9 = vld [vmem:[%s4734_s1 + $0x6c8] sm:$0xff]  }
  0xa3   :  { %2623 = vmatmul.mubr.bf16.vlgmr.msra.gmra.mxu0 %v2953_v2  ;;  %v3787_v2 = vld [vmem:[%s4734_s1 + $0x618] sm:$0xff]  }
  0xa4   :  { %2664 = vmatmul.mubr.bf16.vlgmr.msra.gmra.mxu1 %v2955_v6  ;;  %3446 = vmatpush3.bf16.msra.mxu0 %v3739_v10  ;;  %v3791_v6 = vld [vmem:[%s4734_s1 + $0x610] sm:$0xff]   ;;  %v3795_v10 = vld [vmem:[%s4734_s1 + $0x608] sm:$0xff]  }
  0xa5   :  { %3468 = vmatpush3.bf16.msra.mxu1 %v3740_v11  ;;  %3447 = vmatprep.subr.bf16.mxu0 %v3741_v12  ;;  %v3796_v11 = vld [vmem:[%s4734_s1 + $0x688] sm:$0xff]   ;;  %v3797_v12 = vld [vmem:[%s4734_s1 + $0x640] sm:$0xff]  }
  0xa6   :  { %3469 = vmatprep.subr.bf16.mxu1 %v3742_v13  ;;  %2704 = vmatprep.mubr.bf16.mxu0 %v2958_v45  ;;  %v3798_v13 = vld [vmem:[%s4734_s1 + $0x6c0] sm:$0xff]   ;;  %v3822_v45 = vld [vmem:[%s4734_s1 + $0x7d0] sm:$0xff]  }
  0xa7   :  { %2745 = vmatprep.mubr.bf16.mxu1 %v2960_v47  ;;  %v3824_v47 = vld [vmem:[%s4734_s1 + $0x790] sm:$0xff]  }
  0xa8   :  { %3448 = vmatpush3.bf16.msra.mxu0 %v3743_v14  ;;  %v3799_v14 = vld [vmem:[%s4734_s1 + $0x600] sm:$0xff]  }
  0xa9   :  { %3470 = vmatpush3.bf16.msra.mxu1 %v3744_v15  ;;  %3449 = vmatprep.subr.bf16.mxu0 %v3745_v16  ;;  %v3800_v15 = vld [vmem:[%s4734_s1 + $0x680] sm:$0xff]  }
  0xaa   :  { %3471 = vmatprep.subr.bf16.mxu1 %v3746_v17  ;;  %v27_v16 = vld [vmem:[%s4735_s0 + $0x60] sm:$0xff] }
  0xab   :  { %v43_v17 = vld [vmem:[%s4735_s0 + $0xe0] sm:$0xff] }
  0xac   :  { %3450 = vmatpush3.bf16.msra.mxu0 %v3747_v18  ;;  %v28_v18 = vld [vmem:[%s4735_s0 + $0x68] sm:$0xff] }
  0xad   :  { %3472 = vmatpush3.bf16.msra.mxu1 %v3748_v19  ;;  %3451 = vmatprep.subr.bf16.mxu0 %v3749_v20  ;;  %v2961_v19 = vcombine.low %v27_v16, %v43_v17  ;;  %v2962_v20 = vcombine.high %v27_v16, %v43_v17 }
  0xae   :  { %3473 = vmatprep.subr.bf16.mxu1 %v3750_v21  ;;  %v44_v21 = vld [vmem:[%s4735_s0 + $0xe8] sm:$0xff] }
  0xb0   :  { %3452 = vmatpush3.bf16.msra.mxu0 %v3751_v22  ;;  %v2963_v22 = vcombine.low %v28_v18, %v44_v21 }
  0xb1   :  { %3474 = vmatpush3.bf16.msra.mxu1 %v3752_v23  ;;  %3453 = vmatprep.subr.bf16.mxu0 %v3753_v24  ;;  %v2964_v23 = vcombine.high %v28_v18, %v44_v21  ;;  %v3801_v24 = vld [vmem:[%s4734_s1 + $0x778] sm:$0xff]  }
  0xb2   :  { %3475 = vmatprep.subr.bf16.mxu1 %v3754_v25  ;;  %v3802_v25 = vld [vmem:[%s4734_s1 + $0x7f8] sm:$0xff]  }
  0xb4   :  { %3454 = vmatpush3.bf16.msra.mxu0 %v3755_v26  ;;  %v3803_v26 = vld [vmem:[%s4734_s1 + $0x738] sm:$0xff]  }
  0xb5   :  { %3476 = vmatpush3.bf16.msra.mxu1 %v3756_v27  ;;  %3455 = vmatprep.subr.bf16.mxu0 %v3757_v28  ;;  %v3804_v27 = vld [vmem:[%s4734_s1 + $0x7b8] sm:$0xff]   ;;  %v3805_v28 = vld [vmem:[%s4734_s1 + $0x770] sm:$0xff]  }
  0xb6   :  { %3477 = vmatprep.subr.bf16.mxu1 %v3758_v29  ;;  %v3806_v29 = vld [vmem:[%s4734_s1 + $0x7f0] sm:$0xff]  }
  0xb8   :  { %3456 = vmatpush3.bf16.msra.mxu0 %v3759_v30  ;;  %v3807_v30 = vld [vmem:[%s4734_s1 + $0x730] sm:$0xff]  }
  0xb9   :  { %3478 = vmatpush3.bf16.msra.mxu1 %v3760_v31  ;;  %3457 = vmatprep.subr.bf16.mxu0 %v3761_v32  ;;  %v3808_v31 = vld [vmem:[%s4734_s1 + $0x7b0] sm:$0xff]   ;;  %v3809_v32 = vld [vmem:[%s4734_s1 + $0x768] sm:$0xff]  }
  0xba   :  { %3479 = vmatprep.subr.bf16.mxu1 %v3762_v33  ;;  %v3810_v33 = vld [vmem:[%s4734_s1 + $0x7e8] sm:$0xff]  }
  0xbc   :  { %3458 = vmatpush3.bf16.msra.mxu0 %v3763_v34  ;;  %v3811_v34 = vld [vmem:[%s4734_s1 + $0x728] sm:$0xff]  }
  0xbd   :  { %3480 = vmatpush3.bf16.msra.mxu1 %v3764_v35  ;;  %3459 = vmatprep.subr.bf16.mxu0 %v3765_v36  ;;  %v3812_v35 = vld [vmem:[%s4734_s1 + $0x7a8] sm:$0xff]   ;;  %v3813_v36 = vld [vmem:[%s4734_s1 + $0x760] sm:$0xff]  }
  0xbe   :  { %3481 = vmatprep.subr.bf16.mxu1 %v3766_v37  ;;  %v3814_v37 = vld [vmem:[%s4734_s1 + $0x7e0] sm:$0xff]  }
  0xc0   :  { %3460 = vmatpush3.bf16.msra.mxu0 %v3767_v38  ;;  %v3815_v38 = vld [vmem:[%s4734_s1 + $0x720] sm:$0xff]  }
  0xc1   :  { %3482 = vmatpush3.bf16.msra.mxu1 %v3768_v39  ;;  %3489 = vmatprep.subr.bf16.mxu0 %v3769_v48  ;;  %v3816_v39 = vld [vmem:[%s4734_s1 + $0x7a0] sm:$0xff]   ;;  %v3825_v48 = vld [vmem:[%s4734_s1 + $0x748] sm:$0xff]  }
  0xc2   :  { %3511 = vmatprep.subr.bf16.mxu1 %v3770_v49  ;;  %v3826_v49 = vld [vmem:[%s4734_s1 + $0x7c8] sm:$0xff]  }
  0xc3   :  { %2705 = vmatmul.mubr.bf16.vlgmr.msra.gmra.mxu0 %v2957_v44  ;;  %v3821_v44 = vld [vmem:[%s4734_s1 + $0x750] sm:$0xff]  }
  0xc4   :  { %2746 = vmatmul.mubr.bf16.vlgmr.msra.gmra.mxu1 %v2959_v46  ;;  %3490 = vmatpush3.bf16.msra.mxu0 %v3771_v50  ;;  %v3823_v46 = vld [vmem:[%s4734_s1 + $0x710] sm:$0xff]   ;;  %v3827_v50 = vld [vmem:[%s4734_s1 + $0x708] sm:$0xff]  }
  0xc5   :  { %3512 = vmatpush3.bf16.msra.mxu1 %v3772_v51  ;;  %3491 = vmatprep.subr.bf16.mxu0 %v3773_v52  ;;  %v3828_v51 = vld [vmem:[%s4734_s1 + $0x788] sm:$0xff]   ;;  %v3829_v52 = vld [vmem:[%s4734_s1 + $0x740] sm:$0xff]  }
  0xc6   :  { %3513 = vmatprep.subr.bf16.mxu1 %v3774_v53  ;;  %2786 = vmatprep.mubr.bf16.mxu0 %v2962_v20  ;;  %v3830_v53 = vld [vmem:[%s4734_s1 + $0x7c0] sm:$0xff]  }
  0xc7   :  { %2827 = vmatprep.mubr.bf16.mxu1 %v2964_v23 }
  0xc8   :  { %3492 = vmatpush3.bf16.msra.mxu0 %v3775_v54  ;;  %v3831_v54 = vld [vmem:[%s4734_s1 + $0x700] sm:$0xff]  }
  0xc9   :  { %3514 = vmatpush3.bf16.msra.mxu1 %v3776_v55  ;;  %3493 = vmatprep.subr.bf16.mxu0 %v3777_v56  ;;  %v3832_v55 = vld [vmem:[%s4734_s1 + $0x780] sm:$0xff]   ;;  %v29_v56 = vld [vmem:[%s4735_s0 + $0x70] sm:$0xff] }
  0xca   :  { %3515 = vmatprep.subr.bf16.mxu1 %v3778_v57  ;;  %v45_v57 = vld [vmem:[%s4735_s0 + $0xf0] sm:$0xff] }
  0xcc   :  { %3494 = vmatpush3.bf16.msra.mxu0 %v3779_v58  ;;  %v30_v58 = vld [vmem:[%s4735_s0 + $0x78] sm:$0xff] }
  0xcd   :  { %3516 = vmatpush3.bf16.msra.mxu1 %v3780_v59  ;;  %3495 = vmatprep.subr.bf16.mxu0 %v3781_v60  ;;  %v46_v59 = vld [vmem:[%s4735_s0 + $0xf8] sm:$0xff]  ;;  %v2965_v60 = vcombine.low %v29_v56, %v45_v57 }
  0xce   :  { %3517 = vmatprep.subr.bf16.mxu1 %v3782_v61  ;;  %v2966_v61 = vcombine.high %v29_v56, %v45_v57 }
  0xd0   :  { %3496 = vmatpush3.bf16.msra.mxu0 %v3783_v62  ;;  %v2967_v62 = vcombine.low %v30_v58, %v46_v59 }
  0xd1   :  { %3518 = vmatpush3.bf16.msra.mxu1 %v3784_v63  ;;  %3497 = vmatprep.subr.bf16.mxu0 %v3785_v0  ;;  %v2968_v63 = vcombine.high %v30_v58, %v46_v59 }
  0xd2   :  { %3519 = vmatprep.subr.bf16.mxu1 %v3786_v1 }
  0xd4   :  { %3498 = vmatpush3.bf16.msra.mxu0 %v3787_v2 }
  0xd5   :  { %3520 = vmatpush3.bf16.msra.mxu1 %v3788_v3  ;;  %3499 = vmatprep.subr.bf16.mxu0 %v3789_v4 }
  0xd6   :  { %3521 = vmatprep.subr.bf16.mxu1 %v3790_v5 }
  0xd8   :  { %3500 = vmatpush3.bf16.msra.mxu0 %v3791_v6 }
  0xd9   :  { %3522 = vmatpush3.bf16.msra.mxu1 %v3792_v7  ;;  %3501 = vmatprep.subr.bf16.mxu0 %v3793_v8 }
  0xda   :  { %3523 = vmatprep.subr.bf16.mxu1 %v3794_v9 }
  0xdc   :  { %3502 = vmatpush3.bf16.msra.mxu0 %v3795_v10 }
  0xdd   :  { %3524 = vmatpush3.bf16.msra.mxu1 %v3796_v11  ;;  %3503 = vmatprep.subr.bf16.mxu0 %v3797_v12 }
  0xde   :  { %3525 = vmatprep.subr.bf16.mxu1 %v3798_v13 }
  0xe0   :  { %3504 = vmatpush3.bf16.msra.mxu0 %v3799_v14 }
  0xe1   :  { %3526 = vmatpush3.bf16.msra.mxu1 %v3800_v15  ;;  %3533 = vmatprep.subr.bf16.mxu0 %v3801_v24 }
  0xe2   :  { %3555 = vmatprep.subr.bf16.mxu1 %v3802_v25 }
  0xe3   :  { %2787 = vmatmul.mubr.bf16.vlgmr.msra.gmra.mxu0 %v2961_v19  ;;  %v3241_v0 = vpop.f32.mrf.mxu0 }
  0xe4   :  { %2828 = vmatmul.mubr.bf16.vlgmr.msra.gmra.mxu1 %v2963_v22  ;;  %3534 = vmatpush3.bf16.msra.mxu0 %v3803_v26  ;;  %v3263_v1 = vpop.f32.mrf.mxu1 }
  0xe5   :  { %3556 = vmatpush3.bf16.msra.mxu1 %v3804_v27  ;;  %3535 = vmatprep.subr.bf16.mxu0 %v3805_v28  ;;  %v3242_v2 = vpop.f32.mrf.mxu0 }
  0xe6   :  { %3557 = vmatprep.subr.bf16.mxu1 %v3806_v29  ;;  %2868 = vmatprep.mubr.bf16.mxu0 %v2966_v61  ;;  %v3264_v3 = vpop.f32.mrf.mxu1 }
  0xe7   :  { %2909 = vmatprep.mubr.bf16.mxu1 %v2968_v63  ;;  %v3244_v4 = vpop.f32.mrf.mxu0 }
  0xe8   :  { %3536 = vmatpush3.bf16.msra.mxu0 %v3807_v30  ;;  %v3266_v5 = vpop.f32.mrf.mxu1 }
  0xe9   :  { %3558 = vmatpush3.bf16.msra.mxu1 %v3808_v31  ;;  %3537 = vmatprep.subr.bf16.mxu0 %v3809_v32  ;;  %v3245_v6 = vpop.f32.mrf.mxu0 }
  0xea   :  { %3559 = vmatprep.subr.bf16.mxu1 %v3810_v33  ;;  %v3267_v7 = vpop.f32.mrf.mxu1 }
  0xec   :  { %3538 = vmatpush3.bf16.msra.mxu0 %v3811_v34  ;;  %v3243_v34 = vadd.f32 %v3242_v2, %v3241_v0 }
  0xed   :  { %3560 = vmatpush3.bf16.msra.mxu1 %v3812_v35  ;;  %3539 = vmatprep.subr.bf16.mxu0 %v3813_v36  ;;  %v2936_v35 = vld [vmem:[%s4736_s2] ss:$0 sm:$0xff] }
  0xee   :  { %3561 = vmatprep.subr.bf16.mxu1 %v3814_v37 }
  0xf0   :  { %3540 = vmatpush3.bf16.msra.mxu0 %v3815_v38  ;;  %v2297_v38 = vadd.f32 %v3243_v34, %v2936_v35 }
  0xf1   :  { %3562 = vmatpush3.bf16.msra.mxu1 %v3816_v39  ;;  %3541 = vmatprep.subr.bf16.mxu0 %v3817_v40  ;;  %v3265_v39 = vadd.f32 %v3264_v3, %v3263_v1  ;;  %v3246_v40 = vadd.f32 %v3245_v6, %v3244_v4 }
  0xf2   :  { %3563 = vmatprep.subr.bf16.mxu1 %v3818_v41 }
  0xf4   :  { %3542 = vmatpush3.bf16.msra.mxu0 %v3819_v42 }
  0xf5   :  { %3564 = vmatpush3.bf16.msra.mxu1 %v3820_v43  ;;  %3543 = vmatprep.subr.bf16.mxu0 %v3821_v44  ;;  %v2338_v44 = vadd.f32 %v3265_v39, %v2297_v38 }
  0xf6   :  { %3565 = vmatprep.subr.bf16.mxu1 %v3822_v45  ;;  %v2300_v45 = vadd.f32 %v3246_v40, %v2936_v35 }
  0xf8   :  { %3544 = vmatpush3.bf16.msra.mxu0 %v3823_v46 }
  0xf9   :  { %3566 = vmatpush3.bf16.msra.mxu1 %v3824_v47  ;;  %3545 = vmatprep.subr.bf16.mxu0 %v3825_v48  ;;  %v3268_v47 = vadd.f32 %v3267_v7, %v3266_v5 }
  0xfa   :  { %3567 = vmatprep.subr.bf16.mxu1 %v3826_v49 }
  0xfc   :  { %3546 = vmatpush3.bf16.msra.mxu0 %v3827_v50 }
  0xfd   :  { %3568 = vmatpush3.bf16.msra.mxu1 %v3828_v51  ;;  %3547 = vmatprep.subr.bf16.mxu0 %v3829_v52 }
  0xfe   :  { %3569 = vmatprep.subr.bf16.mxu1 %v3830_v53  ;;  %v2341_v53 = vadd.f32 %v3268_v47, %v2300_v45 }
 0x100   :  { %3548 = vmatpush3.bf16.msra.mxu0 %v3831_v54 }
 0x101   :  { %3570 = vmatpush3.bf16.msra.mxu1 %v3832_v55 }
 0x103   :  { %2869 = vmatmul.mubr.bf16.vlgmr.msra.gmra.mxu0 %v2965_v60  ;;  %v3285_v8 = vpop.f32.mrf.mxu0 }
 0x104   :  { %2910 = vmatmul.mubr.bf16.vlgmr.msra.gmra.mxu1 %v2967_v62  ;;  %v3307_v9 = vpop.f32.mrf.mxu1 }
 0x105   :  { %v3286_v10 = vpop.f32.mrf.mxu0 }
 0x106   :  { %v3308_v11 = vpop.f32.mrf.mxu1  ;;  %v3287_v42 = vadd.f32 %v3286_v10, %v3285_v8 }
 0x107   :  { %v3288_v12 = vpop.f32.mrf.mxu0  ;;  %v3309_v49 = vadd.f32 %v3308_v11, %v3307_v9 }
 0x108   :  { %v3310_v13 = vpop.f32.mrf.mxu1  ;;  %v2379_v48 = vadd.f32 %v3287_v42, %v2338_v44 }
 0x109   :  { %v3289_v14 = vpop.f32.mrf.mxu0 }
 0x10a   :  { %v3311_v15 = vpop.f32.mrf.mxu1  ;;  %v3290_v50 = vadd.f32 %v3289_v14, %v3288_v12  ;;  %v2420_v56 = vadd.f32 %v3309_v49, %v2379_v48 }
 0x10b   :  { %v3312_v59 = vadd.f32 %v3311_v15, %v3310_v13 }
 0x10c   :  { %v2382_v57 = vadd.f32 %v3290_v50, %v2341_v53 }
 0x10e   :  { %v2423_v0 = vadd.f32 %v3312_v59, %v2382_v57 }
 0x123   :  { %v3329_v16 = vpop.f32.mrf.mxu0 }
 0x124   :  { %v3351_v17 = vpop.f32.mrf.mxu1 }
 0x125   :  { %v3330_v18 = vpop.f32.mrf.mxu0 }
 0x126   :  { %v3352_v19 = vpop.f32.mrf.mxu1  ;;  %v3331_v54 = vadd.f32 %v3330_v18, %v3329_v16 }
 0x127   :  { %v3332_v20 = vpop.f32.mrf.mxu0  ;;  %v3353_v61 = vadd.f32 %v3352_v19, %v3351_v17 }
 0x128   :  { %v3354_v21 = vpop.f32.mrf.mxu1  ;;  %v2461_v60 = vadd.f32 %v3331_v54, %v2420_v56 }
 0x129   :  { %v3333_v22 = vpop.f32.mrf.mxu0 }
 0x12a   :  { %v3355_v23 = vpop.f32.mrf.mxu1  ;;  %v3334_v62 = vadd.f32 %v3333_v22, %v3332_v20  ;;  %v2502_v3 = vadd.f32 %v3353_v61, %v2461_v60 }
 0x12b   :  { %v3356_v6 = vadd.f32 %v3355_v23, %v3354_v21 }
 0x12c   :  { %v2464_v4 = vadd.f32 %v3334_v62, %v2423_v0 }
 0x12e   :  { %v2505_v11 = vadd.f32 %v3356_v6, %v2464_v4 }
 0x143   :  { %v3373_v24 = vpop.f32.mrf.mxu0 }
 0x144   :  { %v3395_v25 = vpop.f32.mrf.mxu1 }
 0x145   :  { %v3374_v26 = vpop.f32.mrf.mxu0 }
 0x146   :  { %v3396_v27 = vpop.f32.mrf.mxu1  ;;  %v3375_v1 = vadd.f32 %v3374_v26, %v3373_v24 }
 0x147   :  { %v3376_v28 = vpop.f32.mrf.mxu0  ;;  %v3397_v8 = vadd.f32 %v3396_v27, %v3395_v25 }
 0x148   :  { %v3398_v29 = vpop.f32.mrf.mxu1  ;;  %v2543_v7 = vadd.f32 %v3375_v1, %v2502_v3 }
 0x149   :  { %v3377_v30 = vpop.f32.mrf.mxu0 }
 0x14a   :  { %v3399_v31 = vpop.f32.mrf.mxu1  ;;  %v3378_v9 = vadd.f32 %v3377_v30, %v3376_v28  ;;  %v2584_v13 = vadd.f32 %v3397_v8, %v2543_v7 }
 0x14b   :  { %v3400_v18 = vadd.f32 %v3399_v31, %v3398_v29 }
 0x14c   :  { %v2546_v15 = vadd.f32 %v3378_v9, %v2505_v11 }
 0x14e   :  { %v2587_v26 = vadd.f32 %v3400_v18, %v2546_v15 }
 0x163   :  { %v3417_v32 = vpop.f32.mrf.mxu0 }
 0x164   :  { %v3439_v33 = vpop.f32.mrf.mxu1 }
 0x165   :  { %v3418_v36 = vpop.f32.mrf.mxu0 }
 0x166   :  { %v3440_v37 = vpop.f32.mrf.mxu1  ;;  %v3419_v12 = vadd.f32 %v3418_v36, %v3417_v32 }
 0x167   :  { %v3420_v41 = vpop.f32.mrf.mxu0  ;;  %v3441_v20 = vadd.f32 %v3440_v37, %v3439_v33 }
 0x168   :  { %v3442_v43 = vpop.f32.mrf.mxu1  ;;  %v2625_v19 = vadd.f32 %v3419_v12, %v2584_v13 }
 0x169   :  { %v3421_v46 = vpop.f32.mrf.mxu0 }
 0x16a   :  { %v3443_v51 = vpop.f32.mrf.mxu1  ;;  %v3422_v22 = vadd.f32 %v3421_v46, %v3420_v41  ;;  %v2666_v21 = vadd.f32 %v3441_v20, %v2625_v19 }
 0x16b   :  { %v3444_v27 = vadd.f32 %v3443_v51, %v3442_v43 }
 0x16c   :  { %v2628_v23 = vadd.f32 %v3422_v22, %v2587_v26 }
 0x16e   :  { %v2669_v38 = vadd.f32 %v3444_v27, %v2628_v23 }
 0x183   :  { %v3461_v52 = vpop.f32.mrf.mxu0 }
 0x184   :  { %v3483_v55 = vpop.f32.mrf.mxu1 }
 0x185   :  { %v3462_v58 = vpop.f32.mrf.mxu0 }
 0x186   :  { %v3484_v63 = vpop.f32.mrf.mxu1  ;;  %v3463_v34 = vadd.f32 %v3462_v58, %v3461_v52 }
 0x187   :  { %v3464_v2 = vpop.f32.mrf.mxu0  ;;  %v3485_v30 = vadd.f32 %v3484_v63, %v3483_v55 }
 0x188   :  { %v3486_v5 = vpop.f32.mrf.mxu1  ;;  %v2707_v28 = vadd.f32 %v3463_v34, %v2666_v21 }
 0x189   :  { %v3465_v10 = vpop.f32.mrf.mxu0 }
 0x18a   :  { %v3487_v14 = vpop.f32.mrf.mxu1  ;;  %v3466_v32 = vadd.f32 %v3465_v10, %v3464_v2  ;;  %v2748_v42 = vadd.f32 %v3485_v30, %v2707_v28 }
 0x18b   :  { %v3488_v33 = vadd.f32 %v3487_v14, %v3486_v5 }
 0x18c   :  { %v2710_v29 = vadd.f32 %v3466_v32, %v2669_v38 }
 0x18e   :  { %v2751_v47 = vadd.f32 %v3488_v33, %v2710_v29 }
 0x1a3   :  { %v3505_v16 = vpop.f32.mrf.mxu0 }
 0x1a4   :  { %v3527_v17 = vpop.f32.mrf.mxu1 }
 0x1a5   :  { %v3506_v24 = vpop.f32.mrf.mxu0 }
 0x1a6   :  { %v3528_v35 = vpop.f32.mrf.mxu1  ;;  %v3507_v39 = vadd.f32 %v3506_v24, %v3505_v16 }
 0x1a7   :  { %v3508_v25 = vpop.f32.mrf.mxu0  ;;  %v3529_v41 = vadd.f32 %v3528_v35, %v3527_v17 }
 0x1a8   :  { %v3530_v36 = vpop.f32.mrf.mxu1  ;;  %v2789_v37 = vadd.f32 %v3507_v39, %v2748_v42 }
 0x1a9   :  { %v3509_v40 = vpop.f32.mrf.mxu0 }
 0x1aa   :  { %v3531_v31 = vpop.f32.mrf.mxu1  ;;  %v3510_v44 = vadd.f32 %v3509_v40, %v3508_v25  ;;  %v2830_v43 = vadd.f32 %v3529_v41, %v2789_v37 }
 0x1ab   :  { %v3532_v54 = vadd.f32 %v3531_v31, %v3530_v36 }
 0x1ac   :  { %v2792_v50 = vadd.f32 %v3510_v44, %v2751_v47 }
 0x1ae   :  { %v2833_v59 = vadd.f32 %v3532_v54, %v2792_v50 }
 0x1c3   :  { %v3549_v45 = vpop.f32.mrf.mxu0 }
 0x1c4   :  { %v3571_v46 = vpop.f32.mrf.mxu1 }
 0x1c5   :  { %v3550_v48 = vpop.f32.mrf.mxu0 }
 0x1c6   :  { %v3572_v49 = vpop.f32.mrf.mxu1  ;;  %v3551_v51 = vadd.f32 %v3550_v48, %v3549_v45 }
 0x1c7   :  { %v3552_v52 = vpop.f32.mrf.mxu0  ;;  %v3573_v56 = vadd.f32 %v3572_v49, %v3571_v46 }
 0x1c8   :  { %v3574_v53 = vpop.f32.mrf.mxu1  ;;  %v2871_v55 = vadd.f32 %v3551_v51, %v2830_v43 }
 0x1c9   :  { %v3553_v57 = vpop.f32.mrf.mxu0 }
 0x1ca   :  { %v3575_v58 = vpop.f32.mrf.mxu1  ;;  %v2912_v60 = vadd.f32 %v3573_v56, %v2871_v55  ;;  %v3554_v61 = vadd.f32 %v3553_v57, %v3552_v52 }
 0x1cb   :  { %v3576_v0 = vadd.f32 %v3575_v58, %v3574_v53 }
 0x1cc   :  { %v2918_v62 = vsub.f32 0.0, %v2912_v60  ;;  %v2874_v63 = vadd.f32 %v3554_v61, %v2833_v59 }
 0x1ce   :  { %v2920_v1 = vmul.f32 1.442695, %v2918_v62  ;;  %v2915_v2 = vadd.f32 %v3576_v0, %v2874_v63 }
 0x1d0   :  { %3833 = vpow2.f32 %v2920_v1  ;;  %v2919_v3 = vsub.f32 0.0, %v2915_v2 }
 0x1d2   :  { %v2922_v4 = vmul.f32 1.442695, %v2919_v3 }
 0x1d4   :  { %3835 = vpow2.f32 %v2922_v4 }
 0x1dd   :  { %v3834_v5 = vpop.eup %3833 }
 0x1de   :  { %v2924_v6 = vadd.f32 1.0, %v3834_v5 }
 0x1e0   :  { %3837 = vrcp.f32 %v2924_v6 }
 0x1e1   :  { %v3836_v7 = vpop.eup %3835 }
 0x1e2   :  { %v2925_v8 = vadd.f32 1.0, %v3836_v7 }
 0x1e4   :  { %3839 = vrcp.f32 %v2925_v8 }
 0x1ed   :  { %v3838_v9 = vpop.eup %3837 }
 0x1ee   :  { %2930 = vst [vmem:[%s4737_s3] sm:$0xff] %v3838_v9 }
 0x1f1   :  { %v3840_v10 = vpop.eup %3839 }
 0x1f2   :  { %2931 = vst [vmem:[%s4737_s3 + $0x8] sm:$0xff] %v3840_v10 }

</bundles_post_ra>
